<compile_context>
chip_gen: v6e
topology: v6e:2x2x1
jax: 0.10.0
libtpu: 0.0.40
codegen_flags: <defaults>
</compile_context>

<pallas_src>
import jax
import jax.numpy as jnp
from jax.experimental import pallas as pl
from jax.experimental.pallas import tpu as pltpu

_EPS = 1e-5
_LANES = 128


# ---------------------------------------------------------------------------
# shared in-kernel helpers
# ---------------------------------------------------------------------------
def _fill_halo_and_interior(hpad_ref, top, mid, bot, th, w):
    """Assemble the zero-halo'd conv input tile in VMEM.

    Only the two 1-wide column strips are explicitly zeroed; rows 0 / th+1 are
    overwritten by `top` / `bot` (already zeroed when outside the image) and the
    interior by `mid`, so nothing is double-written.
    """
    zcol = jnp.zeros((th + 2, 1, hpad_ref.shape[-1]), hpad_ref.dtype)
    hpad_ref[:, 0:1, :] = zcol
    hpad_ref[:, w + 1:w + 2, :] = zcol
    hpad_ref[0:1, 1:w + 1, :] = top
    hpad_ref[th + 1:th + 2, 1:w + 1, :] = bot
    hpad_ref[1:th + 1, 1:w + 1, :] = mid


def _im2col_matmul(hpad_ref, lhs_ref, w_ref, th, w, cp):
    """Build the (TH*W, 9*CP) im2col slab with lane-aligned stores, then one fat
    MXU matmul with K = 9*CP (instead of nine K=CP dots with VPU adds)."""
    for k in range(9):
        kh, kw = k // 3, k % 3
        piece = hpad_ref[kh:kh + th, kw:kw + w, :].reshape(th * w, cp)
        lhs_ref[:, k * cp:(k + 1) * cp] = piece
    return jnp.dot(lhs_ref[...], w_ref[...], preferred_element_type=jnp.float32)


def _store_stats(ps_ref, acc):
    """Per-tile partial BN statistics: row 0 = sum, row 1 = sum of squares."""
    ps_ref[0:1, :] = jnp.sum(acc, axis=0, keepdims=True)
    ps_ref[1:2, :] = jnp.sum(acc * acc, axis=0, keepdims=True)


# ---------------------------------------------------------------------------
# Kernel A: conv1 (3x3, stride 1) + partial BN stats.  One (image, row-block)
# per grid step; the full image stays resident across the row axis.
# ---------------------------------------------------------------------------
def _conv1_stats_kernel(x_ref, w_ref, y_ref, ps_ref, hpad_ref, lhs_ref):
    # x_ref : (H, W, CP)    bf16  full image (resident while b is fixed)
    # w_ref : (9*CP, CP)    bf16  resident across the whole grid
    # y_ref : (TH, W, CP)   bf16  conv1 output rows for this tile
    # ps_ref: (2, CP)       f32   per-tile [sum, sumsq] over TH*W pixels
    h, w, cp = x_ref.shape
    th = y_ref.shape[0]
    r = pl.program_id(1)
    nr = pl.num_programs(1)
    r0 = pl.multiple_of(r * th, th)

    mid = x_ref[pl.ds(r0, th)]                                   # (TH, W, CP)
    top = x_ref[pl.ds(jnp.maximum(r0 - 1, 0), 1)]                # (1, W, CP)
    bot = x_ref[pl.ds(jnp.minimum(r0 + th, h - 1), 1)]
    top = jnp.where(r == 0, jnp.zeros_like(top), top)            # zero outside image
    bot = jnp.where(r == nr - 1, jnp.zeros_like(bot), bot)

    _fill_halo_and_interior(hpad_ref, top, mid, bot, th, w)
    acc = _im2col_matmul(hpad_ref, lhs_ref, w_ref, th, w, cp)    # (TH*W, CP) f32

    y_ref[...] = acc.reshape(th, w, cp).astype(y_ref.dtype)
    _store_stats(ps_ref, acc)


# ---------------------------------------------------------------------------
# Kernel B: apply bn1 (per-channel scale/shift) + ReLU, then conv2 + partial
# BN stats.  The normalized intermediate h1 lives only in VMEM.
# ---------------------------------------------------------------------------
def _bn_relu_conv2_stats_kernel(y1_ref, a1_ref, w_ref, y_ref, ps_ref,
                                hpad_ref, lhs_ref):
    # y1_ref: (H, W, CP)  bf16  raw conv1 output, full image (resident)
    # a1_ref: (2, CP)     f32   row0 = scale = rsqrt(var+eps), row1 = shift
    # w_ref : (9*CP, CP)  bf16  resident
    h, w, cp = y1_ref.shape
    th = y_ref.shape[0]
    r = pl.program_id(1)
    nr = pl.num_programs(1)
    r0 = pl.multiple_of(r * th, th)

    scale = a1_ref[0]                                            # (CP,) f32
    shift = a1_ref[1]

    def bn_relu(v):  # bf16 in -> f32 affine + relu -> bf16 out (conv2 operand)
        return jnp.maximum(v.astype(jnp.float32) * scale + shift,
                           0.0).astype(jnp.bfloat16)

    mid = bn_relu(y1_ref[pl.ds(r0, th)])
    top = bn_relu(y1_ref[pl.ds(jnp.maximum(r0 - 1, 0), 1)])
    bot = bn_relu(y1_ref[pl.ds(jnp.minimum(r0 + th, h - 1), 1)])
    # conv2's zero padding applies to h1 = relu(bn1(.)), so out-of-image halo
    # rows must be zeroed *after* bn+relu.
    top = jnp.where(r == 0, jnp.zeros_like(top), top)
    bot = jnp.where(r == nr - 1, jnp.zeros_like(bot), bot)

    _fill_halo_and_interior(hpad_ref, top, mid, bot, th, w)
    acc = _im2col_matmul(hpad_ref, lhs_ref, w_ref, th, w, cp)

    y_ref[...] = acc.reshape(th, w, cp).astype(y_ref.dtype)
    _store_stats(ps_ref, acc)


# ---------------------------------------------------------------------------
# Kernel C: bn2-apply + residual add + ReLU (lane-dense pointwise over M rows).
# ---------------------------------------------------------------------------
def _bn_add_relu_kernel(y2_ref, x_ref, a2_ref, out_ref, out1_ref):
    scale = a2_ref[0]                                            # (CP,)
    shift = a2_ref[1]
    yhat = y2_ref[...].astype(jnp.float32) * scale + shift       # bn2
    out1_ref[...] = jnp.maximum(yhat, 0.0)                       # relu(bn2)
    out_ref[...] = jnp.maximum(x_ref[...].astype(jnp.float32) + yhat, 0.0)


# ---------------------------------------------------------------------------
# pallas_call wrappers
# ---------------------------------------------------------------------------
def _conv1_stats(x, w, th):
    n, h, wd, cp = x.shape
    nr = h // th
    return pl.pallas_call(
        _conv1_stats_kernel,
        out_shape=(jax.ShapeDtypeStruct((n, h, wd, cp), jnp.bfloat16),
                   jax.ShapeDtypeStruct((n, nr, 2, cp), jnp.float32)),
        grid=(n, nr),
        in_specs=[
            pl.BlockSpec((None, h, wd, cp), lambda b, r: (b, 0, 0, 0)),   # image, resident per b
            pl.BlockSpec((9 * cp, cp), lambda b, r: (0, 0)),              # weights, resident
        ],
        out_specs=(
            pl.BlockSpec((None, th, wd, cp), lambda b, r: (b, r, 0, 0)),
            pl.BlockSpec((None, None, 2, cp), lambda b, r: (b, r, 0, 0)),
        ),
        scratch_shapes=[
            pltpu.VMEM((th + 2, wd + 2, cp), jnp.bfloat16),   # zero-halo'd conv input
            pltpu.VMEM((th * wd, 9 * cp), jnp.bfloat16),      # im2col slab
        ],
        compiler_params=pltpu.CompilerParams(
            dimension_semantics=("parallel", "parallel"),
            vmem_limit_bytes=32 * 1024 * 1024),
    )(x, w)


def _bn_relu_conv2_stats(y1, a1, w, th):
    n, h, wd, cp = y1.shape
    nr = h // th
    return pl.pallas_call(
        _bn_relu_conv2_stats_kernel,
        out_shape=(jax.ShapeDtypeStruct((n, h, wd, cp), jnp.bfloat16),
                   jax.ShapeDtypeStruct((n, nr, 2, cp), jnp.float32)),
        grid=(n, nr),
        in_specs=[
            pl.BlockSpec((None, h, wd, cp), lambda b, r: (b, 0, 0, 0)),
            pl.BlockSpec((2, cp), lambda b, r: (0, 0)),                   # bn1 affine, resident
            pl.BlockSpec((9 * cp, cp), lambda b, r: (0, 0)),              # weights, resident
        ],
        out_specs=(
            pl.BlockSpec((None, th, wd, cp), lambda b, r: (b, r, 0, 0)),
            pl.BlockSpec((None, None, 2, cp), lambda b, r: (b, r, 0, 0)),
        ),
        scratch_shapes=[
            pltpu.VMEM((th + 2, wd + 2, cp), jnp.bfloat16),
            pltpu.VMEM((th * wd, 9 * cp), jnp.bfloat16),
        ],
        compiler_params=pltpu.CompilerParams(
            dimension_semantics=("parallel", "parallel"),
            vmem_limit_bytes=32 * 1024 * 1024),
    )(y1, a1, w)


def _bn_add_relu(y2_flat, x_flat, a2, tm):
    m, cp = y2_flat.shape
    return pl.pallas_call(
        _bn_add_relu_kernel,
        out_shape=(jax.ShapeDtypeStruct((m, cp), jnp.float32),
                   jax.ShapeDtypeStruct((m, cp), jnp.float32)),
        grid=(m // tm,),
        in_specs=[
            pl.BlockSpec((tm, cp), lambda i: (i, 0)),
            pl.BlockSpec((tm, cp), lambda i: (i, 0)),
            pl.BlockSpec((2, cp), lambda i: (0, 0)),                      # bn2 affine, resident
        ],
        out_specs=(
            pl.BlockSpec((tm, cp), lambda i: (i, 0)),
            pl.BlockSpec((tm, cp), lambda i: (i, 0)),
        ),
        compiler_params=pltpu.CompilerParams(
            dimension_semantics=("parallel",)),
    )(y2_flat, x_flat, a2)


# ---------------------------------------------------------------------------
# glue (tiny XLA: layout prep, per-channel stat reduction)
# ---------------------------------------------------------------------------
def _bn_affine_from_partials(ps, count):
    """(N, R, 2, CP) partial [sum, sumsq] -> (2, CP) [scale, shift], training BN."""
    s = jnp.sum(ps, axis=(0, 1))                              # (2, CP)
    mean = s[0] / count
    var = jnp.maximum(s[1] / count - mean * mean, 0.0)        # biased variance
    scale = jax.lax.rsqrt(var + _EPS)                         # gamma = 1
    shift = -mean * scale                                     # beta  = 0
    return jnp.stack([scale, shift], axis=0).astype(jnp.float32)


def _round_up(v, m):
    return (v + m - 1) // m * m


def _pick_row_tile(h, n, min_steps=8):
    """Largest row-block th dividing h that yields >= min_steps grid steps."""
    for th in range(h, 0, -1):
        if h % th == 0 and n * (h // th) >= min_steps:
            return th
    return h


def _pick_m_tile(m, cap=2048):
    for t in (2048, 1024, 512, 256, 128, 64, 32, 16, 8):
        if t <= cap and m % t == 0:
            return t
    return m


@jax.jit
def basic_block1_forward(x_nchw, w1_oihw, w2_oihw):
    """Forward of BasicBlock1 (stride=1, downsample=None). Returns (out, out1) NCHW."""
    n, c, h, w = x_nchw.shape
    p = w1_oihw.shape[0]
    assert c == w1_oihw.shape[1] and p == w2_oihw.shape[0] == w2_oihw.shape[1]
    assert c == p, "downsample=None requires inplanes == planes"

    cp = _round_up(max(c, _LANES), _LANES)     # lane-dense channel width

    # NCHW -> NHWC once, zero-pad channels to CP, cast matmul operands to bf16.
    # No spatial pad in HBM: the conv halo is built in VMEM inside the kernels.
    # TODO(synk): the boundary NCHW<->NHWC transposes remain XLA ops; they vanish
    # if the surrounding graph is kept NHWC.
    x_nhwc = jnp.transpose(x_nchw, (0, 2, 3, 1))
    x_pad = jnp.pad(x_nhwc, ((0, 0), (0, 0), (0, 0), (0, cp - c))).astype(jnp.bfloat16)

    def prep_w(w_oihw):
        o, i = w_oihw.shape[0], w_oihw.shape[1]
        wt = jnp.transpose(w_oihw, (2, 3, 1, 0))                    # (3,3,I,O)
        wt = jnp.pad(wt, ((0, 0), (0, 0), (0, cp - i), (0, cp - o)))
        return wt.reshape(9 * cp, cp).astype(jnp.bfloat16)          # rows ordered (kh,kw,cin)

    w1r = prep_w(w1_oihw)
    w2r = prep_w(w2_oihw)

    th = _pick_row_tile(h, n)
    count = n * h * w

    # conv1 -> per-tile partial BN stats -> per-channel scale/shift (tiny XLA)
    y1, ps1 = _conv1_stats(x_pad, w1r, th)
    a1 = _bn_affine_from_partials(ps1, count)

    # bn1 + relu + conv2 fused (h1 never leaves VMEM) -> partial BN stats
    y2, ps2 = _bn_relu_conv2_stats(y1, a1, w2r, th)
    a2 = _bn_affine_from_partials(ps2, count)

    # bn2 + residual add + relu, lane-dense pointwise over M = N*H*W rows
    m = count
    tm = _pick_m_tile(m)
    out2d, out1_2d = _bn_add_relu(y2.reshape(m, cp), x_pad.reshape(m, cp), a2, tm)

    out = jnp.transpose(out2d.reshape(n, h, w, cp)[..., :p], (0, 3, 1, 2))
    out1 = jnp.transpose(out1_2d.reshape(n, h, w, cp)[..., :p], (0, 3, 1, 2))
    return out, out1


def _kaiming_normal_fan_out(key, out_ch, in_ch):
    # kaiming_normal_(mode='fan_out', nonlinearity='relu'): std = sqrt(2 / fan_out)
    fan_out = out_ch * 3 * 3
    std = (2.0 / fan_out) ** 0.5
    return std * jax.random.normal(key, (out_ch, in_ch, 3, 3), dtype=jnp.float32)


def _reference_forward(x, w1, w2):
    """Pure-XLA f32 reference of the PyTorch module (training-mode BN)."""
    def conv(z, wt):
        return jax.lax.conv_general_dilated(
            z, wt, window_strides=(1, 1), padding=((1, 1), (1, 1)),
            dimension_numbers=("NCHW", "OIHW", "NCHW"))

    def bn(z):
        mu = jnp.mean(z, axis=(0, 2, 3), keepdims=True)
        var = jnp.mean((z - mu) ** 2, axis=(0, 2, 3), keepdims=True)
        return (z - mu) * jax.lax.rsqrt(var + _EPS)

    h1 = jax.nn.relu(bn(conv(x, w1)))
    y2 = bn(conv(h1, w2))
    return jax.nn.relu(x + y2), jax.nn.relu(y2)


# ---------------------------------------------------------------------------
# demo
# ---------------------------------------------------------------------------
if __name__ == "__main__":
    key = jax.random.PRNGKey(0)
    k_x, k_w1, k_w2 = jax.random.split(key, 3)

    N, C, H, W = 2, 8, 16, 16          # inplanes == planes (downsample=None)
    planes = C

    x = jax.random.normal(k_x, (N, C, H, W), dtype=jnp.float32)
    w1 = _kaiming_normal_fan_out(k_w1, planes, C)        # conv1 weight (O,I,3,3)
    w2 = _kaiming_normal_fan_out(k_w2, planes, planes)   # conv2 weight (O,I,3,3)
    # bn1/bn2: weight=1, bias=0 -> folded into the normalize step.

    out, out1 = basic_block1_forward(x, w1, w2)
    jax.block_until_ready((out, out1))

    assert out.shape == (N, planes, H, W) and out1.shape == (N, planes, H, W)

    # Numerical check vs f32 XLA reference (kernels use bf16 operands/intermediates).
    ref_out, ref_out1 = _reference_forward(x, w1, w2)
    err = max(float(jnp.max(jnp.abs(out - ref_out))),
              float(jnp.max(jnp.abs(out1 - ref_out1))))
    assert err < 0.2, f"max abs error vs reference too large: {err}"

    print("KERNEL_OK")
</pallas_src>

<mosaic_0001>
module attributes {stable_mosaic.version = 11 : i64} {
  func.func @_bn_add_relu_kernel(%arg0: i32, %arg1: memref<512x128xbf16, #tpu.memory_space<vmem>>, %arg2: memref<512x128xbf16, #tpu.memory_space<vmem>>, %arg3: memref<2x128xf32, #tpu.memory_space<vmem>>, %arg4: memref<512x128xf32, #tpu.memory_space<vmem>>, %arg5: memref<512x128xf32, #tpu.memory_space<vmem>>) attributes {dimension_semantics = [#tpu.dimension_semantics<parallel>], iteration_bounds = array<i64: 1>, scalar_prefetch = 0 : i64, scratch_operands = 0 : i64, tpu.core_type = #tpu.core_type<tc>, window_params = [{transform_indices = @transform_0, window_bounds = array<i64: 512, 128>}, {transform_indices = @transform_1, window_bounds = array<i64: 512, 128>}, {pipeline_mode = #tpu.pipeline_mode<synchronous>, transform_indices = @transform_2, window_bounds = array<i64: 2, 128>}, {transform_indices = @transform_3, window_bounds = array<i64: 512, 128>}, {transform_indices = @transform_4, window_bounds = array<i64: 512, 128>}]} {
    %c0 = arith.constant 0 : index
    %c0_0 = arith.constant 0 : index
    %0 = vector.load %arg3[%c0, %c0_0] : memref<2x128xf32, #tpu.memory_space<vmem>>, vector<1x128xf32>
    %1 = vector.shape_cast %0 : vector<1x128xf32> to vector<128xf32>
    %c1 = arith.constant 1 : index
    %c0_1 = arith.constant 0 : index
    %2 = vector.load %arg3[%c1, %c0_1] : memref<2x128xf32, #tpu.memory_space<vmem>>, vector<1x128xf32>
    %3 = vector.shape_cast %2 : vector<1x128xf32> to vector<128xf32>
    %c0_2 = arith.constant 0 : index
    %c0_3 = arith.constant 0 : index
    %4 = vector.load %arg1[%c0_2, %c0_3] : memref<512x128xbf16, #tpu.memory_space<vmem>>, vector<512x128xbf16>
    %5 = arith.extf %4 : vector<512x128xbf16> to vector<512x128xf32>
    %6 = vector.shape_cast %1 : vector<128xf32> to vector<1x128xf32>
    %7 = vector.broadcast %6 : vector<1x128xf32> to vector<512x128xf32>
    %8 = arith.mulf %5, %7 : vector<512x128xf32>
    %9 = vector.shape_cast %3 : vector<128xf32> to vector<1x128xf32>
    %10 = vector.broadcast %9 : vector<1x128xf32> to vector<512x128xf32>
    %11 = arith.addf %8, %10 : vector<512x128xf32>
    %cst = arith.constant 0.000000e+00 : f32
    %12 = vector.broadcast %cst : f32 to vector<512x128xf32>
    %13 = arith.maximumf %11, %12 : vector<512x128xf32>
    %c0_4 = arith.constant 0 : index
    %c0_5 = arith.constant 0 : index
    %14 = vector.load %arg5[%c0_4, %c0_5] : memref<512x128xf32, #tpu.memory_space<vmem>>, vector<512x128xf32>
    tpu.vector_store %arg5[%c0_4, %c0_5], %13 {strides = array<i32>} : memref<512x128xf32, #tpu.memory_space<vmem>>, vector<512x128xf32>,
    %c0_6 = arith.constant 0 : index
    %c0_7 = arith.constant 0 : index
    %15 = vector.load %arg2[%c0_6, %c0_7] : memref<512x128xbf16, #tpu.memory_space<vmem>>, vector<512x128xbf16>
    %16 = arith.extf %15 : vector<512x128xbf16> to vector<512x128xf32>
    %17 = arith.addf %16, %11 : vector<512x128xf32>
    %cst_8 = arith.constant 0.000000e+00 : f32
    %18 = vector.broadcast %cst_8 : f32 to vector<512x128xf32>
    %19 = arith.maximumf %17, %18 : vector<512x128xf32>
    %c0_9 = arith.constant 0 : index
    %c0_10 = arith.constant 0 : index
    %20 = vector.load %arg4[%c0_9, %c0_10] : memref<512x128xf32, #tpu.memory_space<vmem>>, vector<512x128xf32>
    tpu.vector_store %arg4[%c0_9, %c0_10], %19 {strides = array<i32>} : memref<512x128xf32, #tpu.memory_space<vmem>>, vector<512x128xf32>,
    return
  }
  func.func @transform_0(%arg0: i32) -> (i32, i32) {
    %c0_i32 = arith.constant 0 : i32
    %c0_i32_0 = arith.constant 0 : i32
    return %arg0, %c0_i32 : i32, i32
  }
  func.func @transform_1(%arg0: i32) -> (i32, i32) {
    %c0_i32 = arith.constant 0 : i32
    %c0_i32_0 = arith.constant 0 : i32
    return %arg0, %c0_i32 : i32, i32
  }
  func.func @transform_2(%arg0: i32) -> (i32, i32) {
    %c0_i32 = arith.constant 0 : i32
    %c0_i32_0 = arith.constant 0 : i32
    %c0_i32_1 = arith.constant 0 : i32
    return %c0_i32, %c0_i32_0 : i32, i32
  }
  func.func @transform_3(%arg0: i32) -> (i32, i32) {
    %c0_i32 = arith.constant 0 : i32
    %c0_i32_0 = arith.constant 0 : i32
    return %arg0, %c0_i32 : i32, i32
  }
  func.func @transform_4(%arg0: i32) -> (i32, i32) {
    %c0_i32 = arith.constant 0 : i32
    %c0_i32_0 = arith.constant 0 : i32
    return %arg0, %c0_i32 : i32, i32
  }
}

module attributes {stable_mosaic.version = 11 : i64} {
  func.func @_bn_relu_conv2_stats_kernel(%arg0: i32, %arg1: i32, %arg2: memref<1x16x16x128xbf16, #tpu.memory_space<vmem>>, %arg3: memref<2x128xf32, #tpu.memory_space<vmem>>, %arg4: memref<1152x128xbf16, #tpu.memory_space<vmem>>, %arg5: memref<1x4x16x128xbf16, #tpu.memory_space<vmem>>, %arg6: memref<1x1x2x128xf32, #tpu.memory_space<vmem>>, %arg7: memref<6x18x128xbf16, #tpu.memory_space<vmem>>, %arg8: memref<64x1152xbf16, #tpu.memory_space<vmem>>) attributes {dimension_semantics = [#tpu.dimension_semantics<parallel>, #tpu.dimension_semantics<parallel>], iteration_bounds = array<i64: 2, 4>, scalar_prefetch = 0 : i64, scratch_operands = 2 : i64, tpu.core_type = #tpu.core_type<tc>, window_params = [{transform_indices = @transform_0, window_bounds = array<i64: 1, 16, 16, 128>}, {pipeline_mode = #tpu.pipeline_mode<synchronous>, transform_indices = @transform_1, window_bounds = array<i64: 2, 128>}, {pipeline_mode = #tpu.pipeline_mode<synchronous>, transform_indices = @transform_2, window_bounds = array<i64: 1152, 128>}, {transform_indices = @transform_3, window_bounds = array<i64: 1, 4, 16, 128>}, {transform_indices = @transform_4, window_bounds = array<i64: 1, 1, 2, 128>}]} {
    %c4_i32 = arith.constant 4 : i32
    %0 = arith.muli %arg1, %c4_i32 : i32
    %1 = tpu.assume_multiple %0, 4 : i32
    %c0 = arith.constant 0 : index
    %c0_0 = arith.constant 0 : index
    %2 = vector.load %arg3[%c0, %c0_0] : memref<2x128xf32, #tpu.memory_space<vmem>>, vector<1x128xf32>
    %3 = vector.shape_cast %2 : vector<1x128xf32> to vector<128xf32>
    %c1 = arith.constant 1 : index
    %c0_1 = arith.constant 0 : index
    %4 = vector.load %arg3[%c1, %c0_1] : memref<2x128xf32, #tpu.memory_space<vmem>>, vector<1x128xf32>
    %5 = vector.shape_cast %4 : vector<1x128xf32> to vector<128xf32>
    %c0_2 = arith.constant 0 : index
    %6 = arith.index_cast %1 : i32 to index
    %c0_3 = arith.constant 0 : index
    %c0_4 = arith.constant 0 : index
    %7 = vector.load %arg2[%c0_2, %6, %c0_3, %c0_4] : memref<1x16x16x128xbf16, #tpu.memory_space<vmem>>, vector<1x4x16x128xbf16>
    %8 = vector.shape_cast %7 : vector<1x4x16x128xbf16> to vector<4x16x128xbf16>
    %9 = arith.extf %8 : vector<4x16x128xbf16> to vector<4x16x128xf32>
    %10 = vector.shape_cast %3 : vector<128xf32> to vector<1x1x128xf32>
    %11 = vector.broadcast %10 : vector<1x1x128xf32> to vector<4x16x128xf32>
    %12 = arith.mulf %9, %11 : vector<4x16x128xf32>
    %13 = vector.shape_cast %5 : vector<128xf32> to vector<1x1x128xf32>
    %14 = vector.broadcast %13 : vector<1x1x128xf32> to vector<4x16x128xf32>
    %15 = arith.addf %12, %14 : vector<4x16x128xf32>
    %cst = arith.constant 0.000000e+00 : f32
    %16 = vector.broadcast %cst : f32 to vector<4x16x128xf32>
    %17 = arith.maximumf %15, %16 : vector<4x16x128xf32>
    %18 = arith.truncf %17 : vector<4x16x128xf32> to vector<4x16x128xbf16>
    %c1_i32 = arith.constant 1 : i32
    %19 = arith.subi %1, %c1_i32 : i32
    %c0_i32 = arith.constant 0 : i32
    %20 = arith.maxsi %19, %c0_i32 : i32
    %c0_5 = arith.constant 0 : index
    %21 = arith.index_cast %20 : i32 to index
    %c0_6 = arith.constant 0 : index
    %c0_7 = arith.constant 0 : index
    %22 = vector.load %arg2[%c0_5, %21, %c0_6, %c0_7] : memref<1x16x16x128xbf16, #tpu.memory_space<vmem>>, vector<1x1x16x128xbf16>
    %23 = vector.shape_cast %22 : vector<1x1x16x128xbf16> to vector<1x16x128xbf16>
    %24 = arith.extf %23 : vector<1x16x128xbf16> to vector<1x16x128xf32>
    %25 = vector.shape_cast %3 : vector<128xf32> to vector<1x1x128xf32>
    %26 = vector.broadcast %25 : vector<1x1x128xf32> to vector<1x16x128xf32>
    %27 = arith.mulf %24, %26 : vector<1x16x128xf32>
    %28 = vector.shape_cast %5 : vector<128xf32> to vector<1x1x128xf32>
    %29 = vector.broadcast %28 : vector<1x1x128xf32> to vector<1x16x128xf32>
    %30 = arith.addf %27, %29 : vector<1x16x128xf32>
    %cst_8 = arith.constant 0.000000e+00 : f32
    %31 = vector.broadcast %cst_8 : f32 to vector<1x16x128xf32>
    %32 = arith.maximumf %30, %31 : vector<1x16x128xf32>
    %33 = arith.truncf %32 : vector<1x16x128xf32> to vector<1x16x128xbf16>
    %c4_i32_9 = arith.constant 4 : i32
    %34 = arith.addi %1, %c4_i32_9 : i32
    %c15_i32 = arith.constant 15 : i32
    %35 = arith.minsi %34, %c15_i32 : i32
    %c0_10 = arith.constant 0 : index
    %36 = arith.index_cast %35 : i32 to index
    %c0_11 = arith.constant 0 : index
    %c0_12 = arith.constant 0 : index
    %37 = vector.load %arg2[%c0_10, %36, %c0_11, %c0_12] : memref<1x16x16x128xbf16, #tpu.memory_space<vmem>>, vector<1x1x16x128xbf16>
    %38 = vector.shape_cast %37 : vector<1x1x16x128xbf16> to vector<1x16x128xbf16>
    %39 = arith.extf %38 : vector<1x16x128xbf16> to vector<1x16x128xf32>
    %40 = vector.shape_cast %3 : vector<128xf32> to vector<1x1x128xf32>
    %41 = vector.broadcast %40 : vector<1x1x128xf32> to vector<1x16x128xf32>
    %42 = arith.mulf %39, %41 : vector<1x16x128xf32>
    %43 = vector.shape_cast %5 : vector<128xf32> to vector<1x1x128xf32>
    %44 = vector.broadcast %43 : vector<1x1x128xf32> to vector<1x16x128xf32>
    %45 = arith.addf %42, %44 : vector<1x16x128xf32>
    %cst_13 = arith.constant 0.000000e+00 : f32
    %46 = vector.broadcast %cst_13 : f32 to vector<1x16x128xf32>
    %47 = arith.maximumf %45, %46 : vector<1x16x128xf32>
    %48 = arith.truncf %47 : vector<1x16x128xf32> to vector<1x16x128xbf16>
    %c0_i32_14 = arith.constant 0 : i32
    %49 = arith.cmpi eq, %arg1, %c0_i32_14 : i32
    %cst_15 = arith.constant 0.000000e+00 : bf16
    %50 = vector.broadcast %cst_15 : bf16 to vector<1x16x128xbf16>
    %51 = arith.select %49, %50, %33 : vector<1x16x128xbf16>
    %c3_i32 = arith.constant 3 : i32
    %52 = arith.cmpi eq, %arg1, %c3_i32 : i32
    %cst_16 = arith.constant 0.000000e+00 : bf16
    %53 = vector.broadcast %cst_16 : bf16 to vector<1x16x128xbf16>
    %54 = arith.select %52, %53, %48 : vector<1x16x128xbf16>
    %cst_17 = arith.constant 0.000000e+00 : bf16
    %55 = vector.broadcast %cst_17 : bf16 to vector<6x1x128xbf16>
    %c0_18 = arith.constant 0 : index
    %c0_19 = arith.constant 0 : index
    %c0_20 = arith.constant 0 : index
    %56 = vector.load %arg7[%c0_18, %c0_19, %c0_20] : memref<6x18x128xbf16, #tpu.memory_space<vmem>>, vector<6x1x128xbf16>
    tpu.vector_store %arg7[%c0_18, %c0_19, %c0_20], %55 {strides = array<i32>} : memref<6x18x128xbf16, #tpu.memory_space<vmem>>, vector<6x1x128xbf16>,
    %c0_21 = arith.constant 0 : index
    %c17 = arith.constant 17 : index
    %c0_22 = arith.constant 0 : index
    %57 = vector.load %arg7[%c0_21, %c17, %c0_22] : memref<6x18x128xbf16, #tpu.memory_space<vmem>>, vector<6x1x128xbf16>
    tpu.vector_store %arg7[%c0_21, %c17, %c0_22], %55 {strides = array<i32>} : memref<6x18x128xbf16, #tpu.memory_space<vmem>>, vector<6x1x128xbf16>,
    %c0_23 = arith.constant 0 : index
    %c1_24 = arith.constant 1 : index
    %c0_25 = arith.constant 0 : index
    %58 = vector.load %arg7[%c0_23, %c1_24, %c0_25] : memref<6x18x128xbf16, #tpu.memory_space<vmem>>, vector<1x16x128xbf16>
    tpu.vector_store %arg7[%c0_23, %c1_24, %c0_25], %51 {strides = array<i32>} : memref<6x18x128xbf16, #tpu.memory_space<vmem>>, vector<1x16x128xbf16>,
    %c5 = arith.constant 5 : index
    %c1_26 = arith.constant 1 : index
    %c0_27 = arith.constant 0 : index
    %59 = vector.load %arg7[%c5, %c1_26, %c0_27] : memref<6x18x128xbf16, #tpu.memory_space<vmem>>, vector<1x16x128xbf16>
    tpu.vector_store %arg7[%c5, %c1_26, %c0_27], %54 {strides = array<i32>} : memref<6x18x128xbf16, #tpu.memory_space<vmem>>, vector<1x16x128xbf16>,
    %c1_28 = arith.constant 1 : index
    %c1_29 = arith.constant 1 : index
    %c0_30 = arith.constant 0 : index
    %60 = vector.load %arg7[%c1_28, %c1_29, %c0_30] : memref<6x18x128xbf16, #tpu.memory_space<vmem>>, vector<4x16x128xbf16>
    tpu.vector_store %arg7[%c1_28, %c1_29, %c0_30], %18 {strides = array<i32>} : memref<6x18x128xbf16, #tpu.memory_space<vmem>>, vector<4x16x128xbf16>,
    %c0_31 = arith.constant 0 : index
    %c0_32 = arith.constant 0 : index
    %c0_33 = arith.constant 0 : index
    %61 = vector.load %arg7[%c0_31, %c0_32, %c0_33] : memref<6x18x128xbf16, #tpu.memory_space<vmem>>, vector<4x16x128xbf16>
    %62 = vector.shape_cast %61 : vector<4x16x128xbf16> to vector<64x128xbf16>
    %c0_34 = arith.constant 0 : index
    %c0_35 = arith.constant 0 : index
    %63 = vector.load %arg8[%c0_34, %c0_35] : memref<64x1152xbf16, #tpu.memory_space<vmem>>, vector<64x128xbf16>
    tpu.vector_store %arg8[%c0_34, %c0_35], %62 {strides = array<i32>} : memref<64x1152xbf16, #tpu.memory_space<vmem>>, vector<64x128xbf16>,
    %c0_36 = arith.constant 0 : index
    %c1_37 = arith.constant 1 : index
    %c0_38 = arith.constant 0 : index
    %64 = vector.load %arg7[%c0_36, %c1_37, %c0_38] : memref<6x18x128xbf16, #tpu.memory_space<vmem>>, vector<4x16x128xbf16>
    %65 = vector.shape_cast %64 : vector<4x16x128xbf16> to vector<64x128xbf16>
    %c0_39 = arith.constant 0 : index
    %c128 = arith.constant 128 : index
    %66 = vector.load %arg8[%c0_39, %c128] : memref<64x1152xbf16, #tpu.memory_space<vmem>>, vector<64x128xbf16>
    tpu.vector_store %arg8[%c0_39, %c128], %65 {strides = array<i32>} : memref<64x1152xbf16, #tpu.memory_space<vmem>>, vector<64x128xbf16>,
    %c0_40 = arith.constant 0 : index
    %c2 = arith.constant 2 : index
    %c0_41 = arith.constant 0 : index
    %67 = vector.load %arg7[%c0_40, %c2, %c0_41] : memref<6x18x128xbf16, #tpu.memory_space<vmem>>, vector<4x16x128xbf16>
    %68 = vector.shape_cast %67 : vector<4x16x128xbf16> to vector<64x128xbf16>
    %c0_42 = arith.constant 0 : index
    %c256 = arith.constant 256 : index
    %69 = vector.load %arg8[%c0_42, %c256] : memref<64x1152xbf16, #tpu.memory_space<vmem>>, vector<64x128xbf16>
    tpu.vector_store %arg8[%c0_42, %c256], %68 {strides = array<i32>} : memref<64x1152xbf16, #tpu.memory_space<vmem>>, vector<64x128xbf16>,
    %c1_43 = arith.constant 1 : index
    %c0_44 = arith.constant 0 : index
    %c0_45 = arith.constant 0 : index
    %70 = vector.load %arg7[%c1_43, %c0_44, %c0_45] : memref<6x18x128xbf16, #tpu.memory_space<vmem>>, vector<4x16x128xbf16>
    %71 = vector.shape_cast %70 : vector<4x16x128xbf16> to vector<64x128xbf16>
    %c0_46 = arith.constant 0 : index
    %c384 = arith.constant 384 : index
    %72 = vector.load %arg8[%c0_46, %c384] : memref<64x1152xbf16, #tpu.memory_space<vmem>>, vector<64x128xbf16>
    tpu.vector_store %arg8[%c0_46, %c384], %71 {strides = array<i32>} : memref<64x1152xbf16, #tpu.memory_space<vmem>>, vector<64x128xbf16>,
    %c1_47 = arith.constant 1 : index
    %c1_48 = arith.constant 1 : index
    %c0_49 = arith.constant 0 : index
    %73 = vector.load %arg7[%c1_47, %c1_48, %c0_49] : memref<6x18x128xbf16, #tpu.memory_space<vmem>>, vector<4x16x128xbf16>
    %74 = vector.shape_cast %73 : vector<4x16x128xbf16> to vector<64x128xbf16>
    %c0_50 = arith.constant 0 : index
    %c512 = arith.constant 512 : index
    %75 = vector.load %arg8[%c0_50, %c512] : memref<64x1152xbf16, #tpu.memory_space<vmem>>, vector<64x128xbf16>
    tpu.vector_store %arg8[%c0_50, %c512], %74 {strides = array<i32>} : memref<64x1152xbf16, #tpu.memory_space<vmem>>, vector<64x128xbf16>,
    %c1_51 = arith.constant 1 : index
    %c2_52 = arith.constant 2 : index
    %c0_53 = arith.constant 0 : index
    %76 = vector.load %arg7[%c1_51, %c2_52, %c0_53] : memref<6x18x128xbf16, #tpu.memory_space<vmem>>, vector<4x16x128xbf16>
    %77 = vector.shape_cast %76 : vector<4x16x128xbf16> to vector<64x128xbf16>
    %c0_54 = arith.constant 0 : index
    %c640 = arith.constant 640 : index
    %78 = vector.load %arg8[%c0_54, %c640] : memref<64x1152xbf16, #tpu.memory_space<vmem>>, vector<64x128xbf16>
    tpu.vector_store %arg8[%c0_54, %c640], %77 {strides = array<i32>} : memref<64x1152xbf16, #tpu.memory_space<vmem>>, vector<64x128xbf16>,
    %c2_55 = arith.constant 2 : index
    %c0_56 = arith.constant 0 : index
    %c0_57 = arith.constant 0 : index
    %79 = vector.load %arg7[%c2_55, %c0_56, %c0_57] : memref<6x18x128xbf16, #tpu.memory_space<vmem>>, vector<4x16x128xbf16>
    %80 = vector.shape_cast %79 : vector<4x16x128xbf16> to vector<64x128xbf16>
    %c0_58 = arith.constant 0 : index
    %c768 = arith.constant 768 : index
    %81 = vector.load %arg8[%c0_58, %c768] : memref<64x1152xbf16, #tpu.memory_space<vmem>>, vector<64x128xbf16>
    tpu.vector_store %arg8[%c0_58, %c768], %80 {strides = array<i32>} : memref<64x1152xbf16, #tpu.memory_space<vmem>>, vector<64x128xbf16>,
    %c2_59 = arith.constant 2 : index
    %c1_60 = arith.constant 1 : index
    %c0_61 = arith.constant 0 : index
    %82 = vector.load %arg7[%c2_59, %c1_60, %c0_61] : memref<6x18x128xbf16, #tpu.memory_space<vmem>>, vector<4x16x128xbf16>
    %83 = vector.shape_cast %82 : vector<4x16x128xbf16> to vector<64x128xbf16>
    %c0_62 = arith.constant 0 : index
    %c896 = arith.constant 896 : index
    %84 = vector.load %arg8[%c0_62, %c896] : memref<64x1152xbf16, #tpu.memory_space<vmem>>, vector<64x128xbf16>
    tpu.vector_store %arg8[%c0_62, %c896], %83 {strides = array<i32>} : memref<64x1152xbf16, #tpu.memory_space<vmem>>, vector<64x128xbf16>,
    %c2_63 = arith.constant 2 : index
    %c2_64 = arith.constant 2 : index
    %c0_65 = arith.constant 0 : index
    %85 = vector.load %arg7[%c2_63, %c2_64, %c0_65] : memref<6x18x128xbf16, #tpu.memory_space<vmem>>, vector<4x16x128xbf16>
    %86 = vector.shape_cast %85 : vector<4x16x128xbf16> to vector<64x128xbf16>
    %c0_66 = arith.constant 0 : index
    %c1024 = arith.constant 1024 : index
    %87 = vector.load %arg8[%c0_66, %c1024] : memref<64x1152xbf16, #tpu.memory_space<vmem>>, vector<64x128xbf16>
    tpu.vector_store %arg8[%c0_66, %c1024], %86 {strides = array<i32>} : memref<64x1152xbf16, #tpu.memory_space<vmem>>, vector<64x128xbf16>,
    %c0_67 = arith.constant 0 : index
    %c0_68 = arith.constant 0 : index
    %88 = vector.load %arg8[%c0_67, %c0_68] : memref<64x1152xbf16, #tpu.memory_space<vmem>>, vector<64x1152xbf16>
    %c0_69 = arith.constant 0 : index
    %c0_70 = arith.constant 0 : index
    %89 = vector.load %arg4[%c0_69, %c0_70] : memref<1152x128xbf16, #tpu.memory_space<vmem>>, vector<1152x128xbf16>
    %cst_71 = arith.constant dense<0.000000e+00> : vector<64x128xf32>
    %90 = tpu.matmul %88, %89, %cst_71 {dimension_numbers = #tpu.dot_dimension_numbers<[1], [0], [0], [1], [0, 0, 1, 1], [], []>} : vector<64x1152xbf16>, vector<1152x128xbf16>, vector<64x128xf32> -> vector<64x128xf32>
    %91 = vector.shape_cast %90 : vector<64x128xf32> to vector<4x16x128xf32>
    %92 = arith.truncf %91 : vector<4x16x128xf32> to vector<4x16x128xbf16>
    %c0_72 = arith.constant 0 : index
    %c0_73 = arith.constant 0 : index
    %c0_74 = arith.constant 0 : index
    %c0_75 = arith.constant 0 : index
    %93 = vector.load %arg5[%c0_72, %c0_73, %c0_74, %c0_75] : memref<1x4x16x128xbf16, #tpu.memory_space<vmem>>, vector<1x4x16x128xbf16>
    %94 = vector.shape_cast %93 : vector<1x4x16x128xbf16> to vector<4x16x128xbf16>
    %95 = vector.shape_cast %92 : vector<4x16x128xbf16> to vector<1x4x16x128xbf16>
    tpu.vector_store %arg5[%c0_72, %c0_73, %c0_74, %c0_75], %95 {strides = array<i32>} : memref<1x4x16x128xbf16, #tpu.memory_space<vmem>>, vector<1x4x16x128xbf16>,
    %cst_76 = arith.constant dense<0.000000e+00> : vector<128xf32>
    %96 = vector.multi_reduction <add>, %90, %cst_76 [0] : vector<64x128xf32> to vector<128xf32>
    %97 = vector.shape_cast %96 : vector<128xf32> to vector<1x128xf32>
    %c0_77 = arith.constant 0 : index
    %c0_78 = arith.constant 0 : index
    %c0_79 = arith.constant 0 : index
    %c0_80 = arith.constant 0 : index
    %98 = vector.load %arg6[%c0_77, %c0_78, %c0_79, %c0_80] : memref<1x1x2x128xf32, #tpu.memory_space<vmem>>, vector<1x1x1x128xf32>
    %99 = vector.shape_cast %98 : vector<1x1x1x128xf32> to vector<1x128xf32>
    %100 = vector.shape_cast %97 : vector<1x128xf32> to vector<1x1x1x128xf32>
    tpu.vector_store %arg6[%c0_77, %c0_78, %c0_79, %c0_80], %100 {strides = array<i32>} : memref<1x1x2x128xf32, #tpu.memory_space<vmem>>, vector<1x1x1x128xf32>,
    %101 = arith.mulf %90, %90 : vector<64x128xf32>
    %cst_81 = arith.constant dense<0.000000e+00> : vector<128xf32>
    %102 = vector.multi_reduction <add>, %101, %cst_81 [0] : vector<64x128xf32> to vector<128xf32>
    %103 = vector.shape_cast %102 : vector<128xf32> to vector<1x128xf32>
    %c0_82 = arith.constant 0 : index
    %c0_83 = arith.constant 0 : index
    %c1_84 = arith.constant 1 : index
    %c0_85 = arith.constant 0 : index
    %104 = vector.load %arg6[%c0_82, %c0_83, %c1_84, %c0_85] : memref<1x1x2x128xf32, #tpu.memory_space<vmem>>, vector<1x1x1x128xf32>
    %105 = vector.shape_cast %104 : vector<1x1x1x128xf32> to vector<1x128xf32>
    %106 = vector.shape_cast %103 : vector<1x128xf32> to vector<1x1x1x128xf32>
    tpu.vector_store %arg6[%c0_82, %c0_83, %c1_84, %c0_85], %106 {strides = array<i32>} : memref<1x1x2x128xf32, #tpu.memory_space<vmem>>, vector<1x1x1x128xf32>,
    return
  }
  func.func @transform_0(%arg0: i32, %arg1: i32) -> (i32, i32, i32, i32) {
    %c0_i32 = arith.constant 0 : i32
    %c0_i32_0 = arith.constant 0 : i32
    %c0_i32_1 = arith.constant 0 : i32
    %c0_i32_2 = arith.constant 0 : i32
    return %arg0, %c0_i32, %c0_i32_0, %c0_i32_1 : i32, i32, i32, i32
  }
  func.func @transform_1(%arg0: i32, %arg1: i32) -> (i32, i32) {
    %c0_i32 = arith.constant 0 : i32
    %c0_i32_0 = arith.constant 0 : i32
    %c0_i32_1 = arith.constant 0 : i32
    return %c0_i32, %c0_i32_0 : i32, i32
  }
  func.func @transform_2(%arg0: i32, %arg1: i32) -> (i32, i32) {
    %c0_i32 = arith.constant 0 : i32
    %c0_i32_0 = arith.constant 0 : i32
    %c0_i32_1 = arith.constant 0 : i32
    return %c0_i32, %c0_i32_0 : i32, i32
  }
  func.func @transform_3(%arg0: i32, %arg1: i32) -> (i32, i32, i32, i32) {
    %c0_i32 = arith.constant 0 : i32
    %c0_i32_0 = arith.constant 0 : i32
    %c0_i32_1 = arith.constant 0 : i32
    return %arg0, %arg1, %c0_i32, %c0_i32_0 : i32, i32, i32, i32
  }
  func.func @transform_4(%arg0: i32, %arg1: i32) -> (i32, i32, i32, i32) {
    %c0_i32 = arith.constant 0 : i32
    %c0_i32_0 = arith.constant 0 : i32
    %c0_i32_1 = arith.constant 0 : i32
    return %arg0, %arg1, %c0_i32, %c0_i32_0 : i32, i32, i32, i32
  }
}

module attributes {stable_mosaic.version = 11 : i64} {
  func.func @_conv1_stats_kernel(%arg0: i32, %arg1: i32, %arg2: memref<1x16x16x128xbf16, #tpu.memory_space<vmem>>, %arg3: memref<1152x128xbf16, #tpu.memory_space<vmem>>, %arg4: memref<1x4x16x128xbf16, #tpu.memory_space<vmem>>, %arg5: memref<1x1x2x128xf32, #tpu.memory_space<vmem>>, %arg6: memref<6x18x128xbf16, #tpu.memory_space<vmem>>, %arg7: memref<64x1152xbf16, #tpu.memory_space<vmem>>) attributes {dimension_semantics = [#tpu.dimension_semantics<parallel>, #tpu.dimension_semantics<parallel>], iteration_bounds = array<i64: 2, 4>, scalar_prefetch = 0 : i64, scratch_operands = 2 : i64, tpu.core_type = #tpu.core_type<tc>, window_params = [{transform_indices = @transform_0, window_bounds = array<i64: 1, 16, 16, 128>}, {pipeline_mode = #tpu.pipeline_mode<synchronous>, transform_indices = @transform_1, window_bounds = array<i64: 1152, 128>}, {transform_indices = @transform_2, window_bounds = array<i64: 1, 4, 16, 128>}, {transform_indices = @transform_3, window_bounds = array<i64: 1, 1, 2, 128>}]} {
    %c4_i32 = arith.constant 4 : i32
    %0 = arith.muli %arg1, %c4_i32 : i32
    %1 = tpu.assume_multiple %0, 4 : i32
    %c0 = arith.constant 0 : index
    %2 = arith.index_cast %1 : i32 to index
    %c0_0 = arith.constant 0 : index
    %c0_1 = arith.constant 0 : index
    %3 = vector.load %arg2[%c0, %2, %c0_0, %c0_1] : memref<1x16x16x128xbf16, #tpu.memory_space<vmem>>, vector<1x4x16x128xbf16>
    %4 = vector.shape_cast %3 : vector<1x4x16x128xbf16> to vector<4x16x128xbf16>
    %c1_i32 = arith.constant 1 : i32
    %5 = arith.subi %1, %c1_i32 : i32
    %c0_i32 = arith.constant 0 : i32
    %6 = arith.maxsi %5, %c0_i32 : i32
    %c0_2 = arith.constant 0 : index
    %7 = arith.index_cast %6 : i32 to index
    %c0_3 = arith.constant 0 : index
    %c0_4 = arith.constant 0 : index
    %8 = vector.load %arg2[%c0_2, %7, %c0_3, %c0_4] : memref<1x16x16x128xbf16, #tpu.memory_space<vmem>>, vector<1x1x16x128xbf16>
    %9 = vector.shape_cast %8 : vector<1x1x16x128xbf16> to vector<1x16x128xbf16>
    %c4_i32_5 = arith.constant 4 : i32
    %10 = arith.addi %1, %c4_i32_5 : i32
    %c15_i32 = arith.constant 15 : i32
    %11 = arith.minsi %10, %c15_i32 : i32
    %c0_6 = arith.constant 0 : index
    %12 = arith.index_cast %11 : i32 to index
    %c0_7 = arith.constant 0 : index
    %c0_8 = arith.constant 0 : index
    %13 = vector.load %arg2[%c0_6, %12, %c0_7, %c0_8] : memref<1x16x16x128xbf16, #tpu.memory_space<vmem>>, vector<1x1x16x128xbf16>
    %14 = vector.shape_cast %13 : vector<1x1x16x128xbf16> to vector<1x16x128xbf16>
    %c0_i32_9 = arith.constant 0 : i32
    %15 = arith.cmpi eq, %arg1, %c0_i32_9 : i32
    %cst = arith.constant 0.000000e+00 : bf16
    %16 = vector.broadcast %cst : bf16 to vector<1x16x128xbf16>
    %17 = arith.select %15, %16, %9 : vector<1x16x128xbf16>
    %c3_i32 = arith.constant 3 : i32
    %18 = arith.cmpi eq, %arg1, %c3_i32 : i32
    %cst_10 = arith.constant 0.000000e+00 : bf16
    %19 = vector.broadcast %cst_10 : bf16 to vector<1x16x128xbf16>
    %20 = arith.select %18, %19, %14 : vector<1x16x128xbf16>
    %cst_11 = arith.constant 0.000000e+00 : bf16
    %21 = vector.broadcast %cst_11 : bf16 to vector<6x1x128xbf16>
    %c0_12 = arith.constant 0 : index
    %c0_13 = arith.constant 0 : index
    %c0_14 = arith.constant 0 : index
    %22 = vector.load %arg6[%c0_12, %c0_13, %c0_14] : memref<6x18x128xbf16, #tpu.memory_space<vmem>>, vector<6x1x128xbf16>
    tpu.vector_store %arg6[%c0_12, %c0_13, %c0_14], %21 {strides = array<i32>} : memref<6x18x128xbf16, #tpu.memory_space<vmem>>, vector<6x1x128xbf16>,
    %c0_15 = arith.constant 0 : index
    %c17 = arith.constant 17 : index
    %c0_16 = arith.constant 0 : index
    %23 = vector.load %arg6[%c0_15, %c17, %c0_16] : memref<6x18x128xbf16, #tpu.memory_space<vmem>>, vector<6x1x128xbf16>
    tpu.vector_store %arg6[%c0_15, %c17, %c0_16], %21 {strides = array<i32>} : memref<6x18x128xbf16, #tpu.memory_space<vmem>>, vector<6x1x128xbf16>,
    %c0_17 = arith.constant 0 : index
    %c1 = arith.constant 1 : index
    %c0_18 = arith.constant 0 : index
    %24 = vector.load %arg6[%c0_17, %c1, %c0_18] : memref<6x18x128xbf16, #tpu.memory_space<vmem>>, vector<1x16x128xbf16>
    tpu.vector_store %arg6[%c0_17, %c1, %c0_18], %17 {strides = array<i32>} : memref<6x18x128xbf16, #tpu.memory_space<vmem>>, vector<1x16x128xbf16>,
    %c5 = arith.constant 5 : index
    %c1_19 = arith.constant 1 : index
    %c0_20 = arith.constant 0 : index
    %25 = vector.load %arg6[%c5, %c1_19, %c0_20] : memref<6x18x128xbf16, #tpu.memory_space<vmem>>, vector<1x16x128xbf16>
    tpu.vector_store %arg6[%c5, %c1_19, %c0_20], %20 {strides = array<i32>} : memref<6x18x128xbf16, #tpu.memory_space<vmem>>, vector<1x16x128xbf16>,
    %c1_21 = arith.constant 1 : index
    %c1_22 = arith.constant 1 : index
    %c0_23 = arith.constant 0 : index
    %26 = vector.load %arg6[%c1_21, %c1_22, %c0_23] : memref<6x18x128xbf16, #tpu.memory_space<vmem>>, vector<4x16x128xbf16>
    tpu.vector_store %arg6[%c1_21, %c1_22, %c0_23], %4 {strides = array<i32>} : memref<6x18x128xbf16, #tpu.memory_space<vmem>>, vector<4x16x128xbf16>,
    %c0_24 = arith.constant 0 : index
    %c0_25 = arith.constant 0 : index
    %c0_26 = arith.constant 0 : index
    %27 = vector.load %arg6[%c0_24, %c0_25, %c0_26] : memref<6x18x128xbf16, #tpu.memory_space<vmem>>, vector<4x16x128xbf16>
    %28 = vector.shape_cast %27 : vector<4x16x128xbf16> to vector<64x128xbf16>
    %c0_27 = arith.constant 0 : index
    %c0_28 = arith.constant 0 : index
    %29 = vector.load %arg7[%c0_27, %c0_28] : memref<64x1152xbf16, #tpu.memory_space<vmem>>, vector<64x128xbf16>
    tpu.vector_store %arg7[%c0_27, %c0_28], %28 {strides = array<i32>} : memref<64x1152xbf16, #tpu.memory_space<vmem>>, vector<64x128xbf16>,
    %c0_29 = arith.constant 0 : index
    %c1_30 = arith.constant 1 : index
    %c0_31 = arith.constant 0 : index
    %30 = vector.load %arg6[%c0_29, %c1_30, %c0_31] : memref<6x18x128xbf16, #tpu.memory_space<vmem>>, vector<4x16x128xbf16>
    %31 = vector.shape_cast %30 : vector<4x16x128xbf16> to vector<64x128xbf16>
    %c0_32 = arith.constant 0 : index
    %c128 = arith.constant 128 : index
    %32 = vector.load %arg7[%c0_32, %c128] : memref<64x1152xbf16, #tpu.memory_space<vmem>>, vector<64x128xbf16>
    tpu.vector_store %arg7[%c0_32, %c128], %31 {strides = array<i32>} : memref<64x1152xbf16, #tpu.memory_space<vmem>>, vector<64x128xbf16>,
    %c0_33 = arith.constant 0 : index
    %c2 = arith.constant 2 : index
    %c0_34 = arith.constant 0 : index
    %33 = vector.load %arg6[%c0_33, %c2, %c0_34] : memref<6x18x128xbf16, #tpu.memory_space<vmem>>, vector<4x16x128xbf16>
    %34 = vector.shape_cast %33 : vector<4x16x128xbf16> to vector<64x128xbf16>
    %c0_35 = arith.constant 0 : index
    %c256 = arith.constant 256 : index
    %35 = vector.load %arg7[%c0_35, %c256] : memref<64x1152xbf16, #tpu.memory_space<vmem>>, vector<64x128xbf16>
    tpu.vector_store %arg7[%c0_35, %c256], %34 {strides = array<i32>} : memref<64x1152xbf16, #tpu.memory_space<vmem>>, vector<64x128xbf16>,
    %c1_36 = arith.constant 1 : index
    %c0_37 = arith.constant 0 : index
    %c0_38 = arith.constant 0 : index
    %36 = vector.load %arg6[%c1_36, %c0_37, %c0_38] : memref<6x18x128xbf16, #tpu.memory_space<vmem>>, vector<4x16x128xbf16>
    %37 = vector.shape_cast %36 : vector<4x16x128xbf16> to vector<64x128xbf16>
    %c0_39 = arith.constant 0 : index
    %c384 = arith.constant 384 : index
    %38 = vector.load %arg7[%c0_39, %c384] : memref<64x1152xbf16, #tpu.memory_space<vmem>>, vector<64x128xbf16>
    tpu.vector_store %arg7[%c0_39, %c384], %37 {strides = array<i32>} : memref<64x1152xbf16, #tpu.memory_space<vmem>>, vector<64x128xbf16>,
    %c1_40 = arith.constant 1 : index
    %c1_41 = arith.constant 1 : index
    %c0_42 = arith.constant 0 : index
    %39 = vector.load %arg6[%c1_40, %c1_41, %c0_42] : memref<6x18x128xbf16, #tpu.memory_space<vmem>>, vector<4x16x128xbf16>
    %40 = vector.shape_cast %39 : vector<4x16x128xbf16> to vector<64x128xbf16>
    %c0_43 = arith.constant 0 : index
    %c512 = arith.constant 512 : index
    %41 = vector.load %arg7[%c0_43, %c512] : memref<64x1152xbf16, #tpu.memory_space<vmem>>, vector<64x128xbf16>
    tpu.vector_store %arg7[%c0_43, %c512], %40 {strides = array<i32>} : memref<64x1152xbf16, #tpu.memory_space<vmem>>, vector<64x128xbf16>,
    %c1_44 = arith.constant 1 : index
    %c2_45 = arith.constant 2 : index
    %c0_46 = arith.constant 0 : index
    %42 = vector.load %arg6[%c1_44, %c2_45, %c0_46] : memref<6x18x128xbf16, #tpu.memory_space<vmem>>, vector<4x16x128xbf16>
    %43 = vector.shape_cast %42 : vector<4x16x128xbf16> to vector<64x128xbf16>
    %c0_47 = arith.constant 0 : index
    %c640 = arith.constant 640 : index
    %44 = vector.load %arg7[%c0_47, %c640] : memref<64x1152xbf16, #tpu.memory_space<vmem>>, vector<64x128xbf16>
    tpu.vector_store %arg7[%c0_47, %c640], %43 {strides = array<i32>} : memref<64x1152xbf16, #tpu.memory_space<vmem>>, vector<64x128xbf16>,
    %c2_48 = arith.constant 2 : index
    %c0_49 = arith.constant 0 : index
    %c0_50 = arith.constant 0 : index
    %45 = vector.load %arg6[%c2_48, %c0_49, %c0_50] : memref<6x18x128xbf16, #tpu.memory_space<vmem>>, vector<4x16x128xbf16>
    %46 = vector.shape_cast %45 : vector<4x16x128xbf16> to vector<64x128xbf16>
    %c0_51 = arith.constant 0 : index
    %c768 = arith.constant 768 : index
    %47 = vector.load %arg7[%c0_51, %c768] : memref<64x1152xbf16, #tpu.memory_space<vmem>>, vector<64x128xbf16>
    tpu.vector_store %arg7[%c0_51, %c768], %46 {strides = array<i32>} : memref<64x1152xbf16, #tpu.memory_space<vmem>>, vector<64x128xbf16>,
    %c2_52 = arith.constant 2 : index
    %c1_53 = arith.constant 1 : index
    %c0_54 = arith.constant 0 : index
    %48 = vector.load %arg6[%c2_52, %c1_53, %c0_54] : memref<6x18x128xbf16, #tpu.memory_space<vmem>>, vector<4x16x128xbf16>
    %49 = vector.shape_cast %48 : vector<4x16x128xbf16> to vector<64x128xbf16>
    %c0_55 = arith.constant 0 : index
    %c896 = arith.constant 896 : index
    %50 = vector.load %arg7[%c0_55, %c896] : memref<64x1152xbf16, #tpu.memory_space<vmem>>, vector<64x128xbf16>
    tpu.vector_store %arg7[%c0_55, %c896], %49 {strides = array<i32>} : memref<64x1152xbf16, #tpu.memory_space<vmem>>, vector<64x128xbf16>,
    %c2_56 = arith.constant 2 : index
    %c2_57 = arith.constant 2 : index
    %c0_58 = arith.constant 0 : index
    %51 = vector.load %arg6[%c2_56, %c2_57, %c0_58] : memref<6x18x128xbf16, #tpu.memory_space<vmem>>, vector<4x16x128xbf16>
    %52 = vector.shape_cast %51 : vector<4x16x128xbf16> to vector<64x128xbf16>
    %c0_59 = arith.constant 0 : index
    %c1024 = arith.constant 1024 : index
    %53 = vector.load %arg7[%c0_59, %c1024] : memref<64x1152xbf16, #tpu.memory_space<vmem>>, vector<64x128xbf16>
    tpu.vector_store %arg7[%c0_59, %c1024], %52 {strides = array<i32>} : memref<64x1152xbf16, #tpu.memory_space<vmem>>, vector<64x128xbf16>,
    %c0_60 = arith.constant 0 : index
    %c0_61 = arith.constant 0 : index
    %54 = vector.load %arg7[%c0_60, %c0_61] : memref<64x1152xbf16, #tpu.memory_space<vmem>>, vector<64x1152xbf16>
    %c0_62 = arith.constant 0 : index
    %c0_63 = arith.constant 0 : index
    %55 = vector.load %arg3[%c0_62, %c0_63] : memref<1152x128xbf16, #tpu.memory_space<vmem>>, vector<1152x128xbf16>
    %cst_64 = arith.constant dense<0.000000e+00> : vector<64x128xf32>
    %56 = tpu.matmul %54, %55, %cst_64 {dimension_numbers = #tpu.dot_dimension_numbers<[1], [0], [0], [1], [0, 0, 1, 1], [], []>} : vector<64x1152xbf16>, vector<1152x128xbf16>, vector<64x128xf32> -> vector<64x128xf32>
    %57 = vector.shape_cast %56 : vector<64x128xf32> to vector<4x16x128xf32>
    %58 = arith.truncf %57 : vector<4x16x128xf32> to vector<4x16x128xbf16>
    %c0_65 = arith.constant 0 : index
    %c0_66 = arith.constant 0 : index
    %c0_67 = arith.constant 0 : index
    %c0_68 = arith.constant 0 : index
    %59 = vector.load %arg4[%c0_65, %c0_66, %c0_67, %c0_68] : memref<1x4x16x128xbf16, #tpu.memory_space<vmem>>, vector<1x4x16x128xbf16>
    %60 = vector.shape_cast %59 : vector<1x4x16x128xbf16> to vector<4x16x128xbf16>
    %61 = vector.shape_cast %58 : vector<4x16x128xbf16> to vector<1x4x16x128xbf16>
    tpu.vector_store %arg4[%c0_65, %c0_66, %c0_67, %c0_68], %61 {strides = array<i32>} : memref<1x4x16x128xbf16, #tpu.memory_space<vmem>>, vector<1x4x16x128xbf16>,
    %cst_69 = arith.constant dense<0.000000e+00> : vector<128xf32>
    %62 = vector.multi_reduction <add>, %56, %cst_69 [0] : vector<64x128xf32> to vector<128xf32>
    %63 = vector.shape_cast %62 : vector<128xf32> to vector<1x128xf32>
    %c0_70 = arith.constant 0 : index
    %c0_71 = arith.constant 0 : index
    %c0_72 = arith.constant 0 : index
    %c0_73 = arith.constant 0 : index
    %64 = vector.load %arg5[%c0_70, %c0_71, %c0_72, %c0_73] : memref<1x1x2x128xf32, #tpu.memory_space<vmem>>, vector<1x1x1x128xf32>
    %65 = vector.shape_cast %64 : vector<1x1x1x128xf32> to vector<1x128xf32>
    %66 = vector.shape_cast %63 : vector<1x128xf32> to vector<1x1x1x128xf32>
    tpu.vector_store %arg5[%c0_70, %c0_71, %c0_72, %c0_73], %66 {strides = array<i32>} : memref<1x1x2x128xf32, #tpu.memory_space<vmem>>, vector<1x1x1x128xf32>,
    %67 = arith.mulf %56, %56 : vector<64x128xf32>
    %cst_74 = arith.constant dense<0.000000e+00> : vector<128xf32>
    %68 = vector.multi_reduction <add>, %67, %cst_74 [0] : vector<64x128xf32> to vector<128xf32>
    %69 = vector.shape_cast %68 : vector<128xf32> to vector<1x128xf32>
    %c0_75 = arith.constant 0 : index
    %c0_76 = arith.constant 0 : index
    %c1_77 = arith.constant 1 : index
    %c0_78 = arith.constant 0 : index
    %70 = vector.load %arg5[%c0_75, %c0_76, %c1_77, %c0_78] : memref<1x1x2x128xf32, #tpu.memory_space<vmem>>, vector<1x1x1x128xf32>
    %71 = vector.shape_cast %70 : vector<1x1x1x128xf32> to vector<1x128xf32>
    %72 = vector.shape_cast %69 : vector<1x128xf32> to vector<1x1x1x128xf32>
    tpu.vector_store %arg5[%c0_75, %c0_76, %c1_77, %c0_78], %72 {strides = array<i32>} : memref<1x1x2x128xf32, #tpu.memory_space<vmem>>, vector<1x1x1x128xf32>,
    return
  }
  func.func @transform_0(%arg0: i32, %arg1: i32) -> (i32, i32, i32, i32) {
    %c0_i32 = arith.constant 0 : i32
    %c0_i32_0 = arith.constant 0 : i32
    %c0_i32_1 = arith.constant 0 : i32
    %c0_i32_2 = arith.constant 0 : i32
    return %arg0, %c0_i32, %c0_i32_0, %c0_i32_1 : i32, i32, i32, i32
  }
  func.func @transform_1(%arg0: i32, %arg1: i32) -> (i32, i32) {
    %c0_i32 = arith.constant 0 : i32
    %c0_i32_0 = arith.constant 0 : i32
    %c0_i32_1 = arith.constant 0 : i32
    return %c0_i32, %c0_i32_0 : i32, i32
  }
  func.func @transform_2(%arg0: i32, %arg1: i32) -> (i32, i32, i32, i32) {
    %c0_i32 = arith.constant 0 : i32
    %c0_i32_0 = arith.constant 0 : i32
    %c0_i32_1 = arith.constant 0 : i32
    return %arg0, %arg1, %c0_i32, %c0_i32_0 : i32, i32, i32, i32
  }
  func.func @transform_3(%arg0: i32, %arg1: i32) -> (i32, i32, i32, i32) {
    %c0_i32 = arith.constant 0 : i32
    %c0_i32_0 = arith.constant 0 : i32
    %c0_i32_1 = arith.constant 0 : i32
    return %arg0, %arg1, %c0_i32, %c0_i32_0 : i32, i32, i32, i32
  }
}

</mosaic_0001>

<bundles_post_ra>
// kernel: basic_block1_forward.5
= control target key start
LH: loop header
LB: loop body
LE: loop exit
PB: predicated region body
PF: predicated region fallthrough
CT: control target
= control target key end

     0   :  { %s2053_s0 = inlined_call_operand.vmem [shape: bf16[512,128], index: 0, kind: input, shape index: {}]   ;;  %s2054_s2 = inlined_call_operand.vmem [shape: f32[2,128], index: 2, kind: input, shape index: {}]   ;;  %s2055_s4 = inlined_call_operand.vmem [shape: f32[512,128], index: 4, kind: output, shape index: {1}]   ;;  %s2056_s1 = inlined_call_operand.vmem [shape: bf16[512,128], index: 1, kind: input, shape index: {}]   ;;  %s2057_s3 = inlined_call_operand.vmem [shape: f32[512,128], index: 3, kind: output, shape index: {0}]  }
   0x1   :  { %v1086_v0 = vld [vmem:[%s2054_s2] ss:$0 sm:$0xff]  ;;  %v996_v4 = vld [vmem:[%s2053_s0 + $0x8] sm:$0xff]   ;;  %v997_v5 = vld [vmem:[%s2053_s0 + $0x10] sm:$0xff]  }
   0x2   :  { %v741_v1 = vld [vmem:[%s2053_s0] sm:$0xff]   ;;  %v998_v6 = vld [vmem:[%s2053_s0 + $0x18] sm:$0xff]   ;;  %v746_v8 = vunpack.c.l.bf16 %v996_v4  ;;  %v747_v9 = vunpack.c.h.bf16 %v996_v4  ;;  %v750_v10 = vunpack.c.l.bf16 %v997_v5  ;;  %v751_v11 = vunpack.c.h.bf16 %v997_v5  ;;  %v1000_v33 = vld [vmem:[%s2053_s0 + $0x28] sm:$0xff]  }
   0x3   :  { %v742_v2 = vunpack.c.l.bf16 %v741_v1  ;;  %v743_v3 = vunpack.c.h.bf16 %v741_v1  ;;  %v1103_v7 = vld [vmem:[%s2054_s2 + $0x1] ss:$0 sm:$0xff]  ;;  %v754_v14 = vunpack.c.l.bf16 %v998_v6  ;;  %v755_v15 = vunpack.c.h.bf16 %v998_v6  ;;  %v1001_v34 = vld [vmem:[%s2053_s0 + $0x30] sm:$0xff]   ;;  %v1002_v39 = vld [vmem:[%s2053_s0 + $0x38] sm:$0xff]  }
   0x4   :  { %v152_v16 = vmul.f32 %v746_v8, %v1086_v0  ;;  %v153_v17 = vmul.f32 %v747_v9, %v1086_v0  ;;  %v154_v18 = vmul.f32 %v750_v10, %v1086_v0  ;;  %v155_v19 = vmul.f32 %v751_v11, %v1086_v0  ;;  %v999_v28 = vld [vmem:[%s2053_s0 + $0x20] sm:$0xff]   ;;  %v1004_v6 = vld [vmem:[%s2053_s0 + $0x48] sm:$0xff]   ;;  %v1005_v8 = vld [vmem:[%s2053_s0 + $0x50] sm:$0xff]  }
   0x5   :  { %v150_v12 = vmul.f32 %v742_v2, %v1086_v0  ;;  %v151_v13 = vmul.f32 %v743_v3, %v1086_v0  ;;  %v156_v22 = vmul.f32 %v754_v14, %v1086_v0  ;;  %v157_v23 = vmul.f32 %v755_v15, %v1086_v0  ;;  %v1003_v1 = vld [vmem:[%s2053_s0 + $0x40] sm:$0xff]  }
   0x6   :  { %v1120_v24 = vadd.f32 %v1103_v7, %v152_v16  ;;  %v1123_v25 = vadd.f32 %v1103_v7, %v153_v17  ;;  %v1126_v26 = vadd.f32 %v1103_v7, %v154_v18  ;;  %v1129_v27 = vadd.f32 %v1103_v7, %v155_v19 }
   0x7   :  { %v1112_v20 = vadd.f32 %v1103_v7, %v150_v12  ;;  %v1115_v21 = vadd.f32 %v1103_v7, %v151_v13  ;;  %v1137_v31 = vadd.f32 %v1103_v7, %v156_v22  ;;  %v1140_v32 = vadd.f32 %v1103_v7, %v157_v23  ;;  %v1006_v13 = vld [vmem:[%s2053_s0 + $0x58] sm:$0xff]  }
   0x8   :  { %v284_v35 = vmax.f32 %v1120_v24, 0.0  ;;  %v285_v36 = vmax.f32 %v1123_v25, 0.0  ;;  %v286_v37 = vmax.f32 %v1126_v26, 0.0  ;;  %v287_v38 = vmax.f32 %v1129_v27, 0.0 }
   0x9   :  { %v282_v29 = vmax.f32 %v1112_v20, 0.0  ;;  %v283_v30 = vmax.f32 %v1115_v21, 0.0  ;;  %v288_v40 = vmax.f32 %v1137_v31, 0.0  ;;  %v289_v41 = vmax.f32 %v1140_v32, 0.0 }
   0xa   :  { %v758_v42 = vunpack.c.l.bf16 %v999_v28  ;;  %v759_v43 = vunpack.c.h.bf16 %v999_v28  ;;  %348 = vst [vmem:[%s2055_s4 + $0x10] sm:$0xff] %v284_v35  ;;  %349 = vst [vmem:[%s2055_s4 + $0x18] sm:$0xff] %v285_v36  ;;  %v762_v44 = vunpack.c.l.bf16 %v1000_v33  ;;  %v763_v45 = vunpack.c.h.bf16 %v1000_v33 }
   0xb   :  { %346 = vst [vmem:[%s2055_s4] sm:$0xff] %v282_v29  ;;  %347 = vst [vmem:[%s2055_s4 + $0x8] sm:$0xff] %v283_v30  ;;  %v766_v46 = vunpack.c.l.bf16 %v1001_v34  ;;  %v767_v47 = vunpack.c.h.bf16 %v1001_v34  ;;  %v770_v50 = vunpack.c.l.bf16 %v1002_v39  ;;  %v771_v51 = vunpack.c.h.bf16 %v1002_v39 }
   0xc   :  { %350 = vst [vmem:[%s2055_s4 + $0x20] sm:$0xff] %v286_v37  ;;  %351 = vst [vmem:[%s2055_s4 + $0x28] sm:$0xff] %v287_v38  ;;  %v158_v48 = vmul.f32 %v758_v42, %v1086_v0  ;;  %v159_v49 = vmul.f32 %v759_v43, %v1086_v0  ;;  %v160_v52 = vmul.f32 %v762_v44, %v1086_v0  ;;  %v774_v16 = vunpack.c.l.bf16 %v1003_v1 }
   0xd   :  { %352 = vst [vmem:[%s2055_s4 + $0x30] sm:$0xff] %v288_v40  ;;  %353 = vst [vmem:[%s2055_s4 + $0x38] sm:$0xff] %v289_v41  ;;  %v161_v53 = vmul.f32 %v763_v45, %v1086_v0  ;;  %v162_v54 = vmul.f32 %v766_v46, %v1086_v0  ;;  %v163_v55 = vmul.f32 %v767_v47, %v1086_v0  ;;  %v775_v17 = vunpack.c.h.bf16 %v1003_v1  ;;  %v1007_v46 = vld [vmem:[%s2053_s0 + $0x60] sm:$0xff]  }
   0xe   :  { %v1188_v56 = vadd.f32 %v1103_v7, %v158_v48  ;;  %v1191_v57 = vadd.f32 %v1103_v7, %v159_v49  ;;  %v164_v58 = vmul.f32 %v770_v50, %v1086_v0  ;;  %v165_v59 = vmul.f32 %v771_v51, %v1086_v0  ;;  %v1008_v51 = vld [vmem:[%s2053_s0 + $0x68] sm:$0xff]  }
   0xf   :  { %v1196_v60 = vadd.f32 %v1103_v7, %v160_v52  ;;  %v1199_v61 = vadd.f32 %v1103_v7, %v161_v53  ;;  %v1202_v62 = vadd.f32 %v1103_v7, %v162_v54  ;;  %v1205_v63 = vadd.f32 %v1103_v7, %v163_v55  ;;  %v1009_v52 = vld [vmem:[%s2053_s0 + $0x70] sm:$0xff]  }
  0x10   :  { %v290_v2 = vmax.f32 %v1188_v56, 0.0  ;;  %v291_v3 = vmax.f32 %v1191_v57, 0.0  ;;  %v1213_v4 = vadd.f32 %v1103_v7, %v164_v58  ;;  %v1216_v5 = vadd.f32 %v1103_v7, %v165_v59  ;;  %v1010_v59 = vld [vmem:[%s2053_s0 + $0x78] sm:$0xff]  }
  0x11   :  { %v292_v9 = vmax.f32 %v1196_v60, 0.0  ;;  %v293_v10 = vmax.f32 %v1199_v61, 0.0  ;;  %v294_v11 = vmax.f32 %v1202_v62, 0.0  ;;  %v295_v12 = vmax.f32 %v1205_v63, 0.0 }
  0x12   :  { %354 = vst [vmem:[%s2055_s4 + $0x40] sm:$0xff] %v290_v2  ;;  %355 = vst [vmem:[%s2055_s4 + $0x48] sm:$0xff] %v291_v3  ;;  %v296_v14 = vmax.f32 %v1213_v4, 0.0  ;;  %v297_v15 = vmax.f32 %v1216_v5, 0.0  ;;  %v778_v18 = vunpack.c.l.bf16 %v1004_v6  ;;  %v779_v19 = vunpack.c.h.bf16 %v1004_v6 }
  0x13   :  { %356 = vst [vmem:[%s2055_s4 + $0x50] sm:$0xff] %v292_v9  ;;  %357 = vst [vmem:[%s2055_s4 + $0x58] sm:$0xff] %v293_v10  ;;  %v782_v22 = vunpack.c.l.bf16 %v1005_v8  ;;  %v783_v23 = vunpack.c.h.bf16 %v1005_v8  ;;  %v166_v28 = vmul.f32 %v774_v16, %v1086_v0  ;;  %v167_v29 = vmul.f32 %v775_v17, %v1086_v0 }
  0x14   :  { %358 = vst [vmem:[%s2055_s4 + $0x60] sm:$0xff] %v294_v11  ;;  %359 = vst [vmem:[%s2055_s4 + $0x68] sm:$0xff] %v295_v12  ;;  %v786_v30 = vunpack.c.l.bf16 %v1006_v13  ;;  %v787_v33 = vunpack.c.h.bf16 %v1006_v13  ;;  %v168_v34 = vmul.f32 %v778_v18, %v1086_v0  ;;  %v169_v35 = vmul.f32 %v779_v19, %v1086_v0 }
  0x15   :  { %360 = vst [vmem:[%s2055_s4 + $0x70] sm:$0xff] %v296_v14  ;;  %361 = vst [vmem:[%s2055_s4 + $0x78] sm:$0xff] %v297_v15  ;;  %v170_v36 = vmul.f32 %v782_v22, %v1086_v0  ;;  %v171_v37 = vmul.f32 %v783_v23, %v1086_v0  ;;  %v1264_v38 = vadd.f32 %v1103_v7, %v166_v28  ;;  %v790_v3 = vunpack.c.l.bf16 %v1007_v46 }
  0x16   :  { %v1267_v39 = vadd.f32 %v1103_v7, %v167_v29  ;;  %v172_v40 = vmul.f32 %v786_v30, %v1086_v0  ;;  %v173_v41 = vmul.f32 %v787_v33, %v1086_v0  ;;  %v1272_v42 = vadd.f32 %v1103_v7, %v168_v34 }
  0x17   :  { %v1275_v43 = vadd.f32 %v1103_v7, %v169_v35  ;;  %v1278_v44 = vadd.f32 %v1103_v7, %v170_v36  ;;  %v1281_v45 = vadd.f32 %v1103_v7, %v171_v37  ;;  %v298_v47 = vmax.f32 %v1264_v38, 0.0  ;;  %v1011_v36 = vld [vmem:[%s2053_s0 + $0x80] sm:$0xff]  }
  0x18   :  { %v299_v48 = vmax.f32 %v1267_v39, 0.0  ;;  %v1289_v49 = vadd.f32 %v1103_v7, %v172_v40  ;;  %v1292_v50 = vadd.f32 %v1103_v7, %v173_v41  ;;  %v300_v53 = vmax.f32 %v1272_v42, 0.0 }
  0x19   :  { %v301_v54 = vmax.f32 %v1275_v43, 0.0  ;;  %v302_v55 = vmax.f32 %v1278_v44, 0.0  ;;  %v303_v58 = vmax.f32 %v1281_v45, 0.0  ;;  %362 = vst [vmem:[%s2055_s4 + $0x80] sm:$0xff] %v298_v47  ;;  %v791_v6 = vunpack.c.h.bf16 %v1007_v46  ;;  %v1012_v47 = vld [vmem:[%s2053_s0 + $0x88] sm:$0xff]  }
  0x1a   :  { %363 = vst [vmem:[%s2055_s4 + $0x88] sm:$0xff] %v299_v48  ;;  %v304_v1 = vmax.f32 %v1289_v49, 0.0  ;;  %v305_v2 = vmax.f32 %v1292_v50, 0.0  ;;  %364 = vst [vmem:[%s2055_s4 + $0x90] sm:$0xff] %v300_v53  ;;  %v794_v8 = vunpack.c.l.bf16 %v1008_v51  ;;  %v795_v9 = vunpack.c.h.bf16 %v1008_v51  ;;  %v1013_v48 = vld [vmem:[%s2053_s0 + $0x90] sm:$0xff]  }
  0x1b   :  { %365 = vst [vmem:[%s2055_s4 + $0x98] sm:$0xff] %v301_v54  ;;  %366 = vst [vmem:[%s2055_s4 + $0xa0] sm:$0xff] %v302_v55  ;;  %v798_v10 = vunpack.c.l.bf16 %v1009_v52  ;;  %v799_v11 = vunpack.c.h.bf16 %v1009_v52  ;;  %v174_v12 = vmul.f32 %v790_v3, %v1086_v0  ;;  %v175_v13 = vmul.f32 %v791_v6, %v1086_v0  ;;  %v1014_v55 = vld [vmem:[%s2053_s0 + $0x98] sm:$0xff]  }
  0x1c   :  { %367 = vst [vmem:[%s2055_s4 + $0xa8] sm:$0xff] %v303_v58  ;;  %368 = vst [vmem:[%s2055_s4 + $0xb0] sm:$0xff] %v304_v1  ;;  %v802_v14 = vunpack.c.l.bf16 %v1010_v59  ;;  %v803_v15 = vunpack.c.h.bf16 %v1010_v59  ;;  %v176_v16 = vmul.f32 %v794_v8, %v1086_v0  ;;  %v177_v17 = vmul.f32 %v795_v9, %v1086_v0 }
  0x1d   :  { %369 = vst [vmem:[%s2055_s4 + $0xb8] sm:$0xff] %v305_v2  ;;  %v178_v18 = vmul.f32 %v798_v10, %v1086_v0  ;;  %v179_v19 = vmul.f32 %v799_v11, %v1086_v0  ;;  %v1340_v22 = vadd.f32 %v1103_v7, %v174_v12  ;;  %v1343_v23 = vadd.f32 %v1103_v7, %v175_v13 }
  0x1e   :  { %v180_v28 = vmul.f32 %v802_v14, %v1086_v0  ;;  %v181_v29 = vmul.f32 %v803_v15, %v1086_v0  ;;  %v1348_v30 = vadd.f32 %v1103_v7, %v176_v16  ;;  %v1351_v33 = vadd.f32 %v1103_v7, %v177_v17 }
  0x1f   :  { %v1354_v34 = vadd.f32 %v1103_v7, %v178_v18  ;;  %v1357_v35 = vadd.f32 %v1103_v7, %v179_v19  ;;  %v306_v37 = vmax.f32 %v1340_v22, 0.0  ;;  %v307_v40 = vmax.f32 %v1343_v23, 0.0 }
  0x20   :  { %v1365_v41 = vadd.f32 %v1103_v7, %v180_v28  ;;  %v1368_v46 = vadd.f32 %v1103_v7, %v181_v29  ;;  %v308_v51 = vmax.f32 %v1348_v30, 0.0  ;;  %v309_v52 = vmax.f32 %v1351_v33, 0.0 }
  0x21   :  { %v310_v53 = vmax.f32 %v1354_v34, 0.0  ;;  %v311_v54 = vmax.f32 %v1357_v35, 0.0  ;;  %370 = vst [vmem:[%s2055_s4 + $0xc0] sm:$0xff] %v306_v37  ;;  %371 = vst [vmem:[%s2055_s4 + $0xc8] sm:$0xff] %v307_v40  ;;  %v806_v1 = vunpack.c.l.bf16 %v1011_v36  ;;  %v807_v2 = vunpack.c.h.bf16 %v1011_v36 }
  0x22   :  { %v312_v58 = vmax.f32 %v1365_v41, 0.0  ;;  %v313_v59 = vmax.f32 %v1368_v46, 0.0  ;;  %372 = vst [vmem:[%s2055_s4 + $0xd0] sm:$0xff] %v308_v51  ;;  %373 = vst [vmem:[%s2055_s4 + $0xd8] sm:$0xff] %v309_v52  ;;  %v810_v3 = vunpack.c.l.bf16 %v1012_v47  ;;  %v811_v6 = vunpack.c.h.bf16 %v1012_v47 }
  0x23   :  { %374 = vst [vmem:[%s2055_s4 + $0xe0] sm:$0xff] %v310_v53  ;;  %375 = vst [vmem:[%s2055_s4 + $0xe8] sm:$0xff] %v311_v54  ;;  %v814_v8 = vunpack.c.l.bf16 %v1013_v48  ;;  %v815_v9 = vunpack.c.h.bf16 %v1013_v48  ;;  %v182_v10 = vmul.f32 %v806_v1, %v1086_v0  ;;  %v183_v11 = vmul.f32 %v807_v2, %v1086_v0  ;;  %v1015_v48 = vld [vmem:[%s2053_s0 + $0xa0] sm:$0xff]  }
  0x24   :  { %376 = vst [vmem:[%s2055_s4 + $0xf0] sm:$0xff] %v312_v58  ;;  %377 = vst [vmem:[%s2055_s4 + $0xf8] sm:$0xff] %v313_v59  ;;  %v818_v12 = vunpack.c.l.bf16 %v1014_v55  ;;  %v819_v13 = vunpack.c.h.bf16 %v1014_v55  ;;  %v184_v14 = vmul.f32 %v810_v3, %v1086_v0  ;;  %v185_v15 = vmul.f32 %v811_v6, %v1086_v0  ;;  %v1016_v55 = vld [vmem:[%s2053_s0 + $0xa8] sm:$0xff]   ;;  %v1017_v58 = vld [vmem:[%s2053_s0 + $0xb0] sm:$0xff]  }
  0x25   :  { %v186_v16 = vmul.f32 %v814_v8, %v1086_v0  ;;  %v187_v17 = vmul.f32 %v815_v9, %v1086_v0  ;;  %v1416_v18 = vadd.f32 %v1103_v7, %v182_v10  ;;  %v1419_v19 = vadd.f32 %v1103_v7, %v183_v11  ;;  %v1018_v6 = vld [vmem:[%s2053_s0 + $0xb8] sm:$0xff]  }
  0x26   :  { %v188_v28 = vmul.f32 %v818_v12, %v1086_v0  ;;  %v189_v29 = vmul.f32 %v819_v13, %v1086_v0  ;;  %v1424_v36 = vadd.f32 %v1103_v7, %v184_v14  ;;  %v1427_v37 = vadd.f32 %v1103_v7, %v185_v15 }
  0x27   :  { %v1430_v40 = vadd.f32 %v1103_v7, %v186_v16  ;;  %v1433_v47 = vadd.f32 %v1103_v7, %v187_v17  ;;  %v314_v51 = vmax.f32 %v1416_v18, 0.0  ;;  %v315_v52 = vmax.f32 %v1419_v19, 0.0 }
  0x28   :  { %v1441_v53 = vadd.f32 %v1103_v7, %v188_v28  ;;  %v1444_v54 = vadd.f32 %v1103_v7, %v189_v29  ;;  %v316_v59 = vmax.f32 %v1424_v36, 0.0  ;;  %v317_v1 = vmax.f32 %v1427_v37, 0.0 }
  0x29   :  { %v318_v2 = vmax.f32 %v1430_v40, 0.0  ;;  %v319_v3 = vmax.f32 %v1433_v47, 0.0  ;;  %378 = vst [vmem:[%s2055_s4 + $0x100] sm:$0xff] %v314_v51  ;;  %379 = vst [vmem:[%s2055_s4 + $0x108] sm:$0xff] %v315_v52  ;;  %v822_v10 = vunpack.c.l.bf16 %v1015_v48  ;;  %v823_v11 = vunpack.c.h.bf16 %v1015_v48 }
  0x2a   :  { %v320_v8 = vmax.f32 %v1441_v53, 0.0  ;;  %v321_v9 = vmax.f32 %v1444_v54, 0.0  ;;  %380 = vst [vmem:[%s2055_s4 + $0x110] sm:$0xff] %v316_v59  ;;  %381 = vst [vmem:[%s2055_s4 + $0x118] sm:$0xff] %v317_v1  ;;  %v826_v12 = vunpack.c.l.bf16 %v1016_v55  ;;  %v827_v13 = vunpack.c.h.bf16 %v1016_v55 }
  0x2b   :  { %382 = vst [vmem:[%s2055_s4 + $0x120] sm:$0xff] %v318_v2  ;;  %383 = vst [vmem:[%s2055_s4 + $0x128] sm:$0xff] %v319_v3  ;;  %v830_v14 = vunpack.c.l.bf16 %v1017_v58  ;;  %v831_v15 = vunpack.c.h.bf16 %v1017_v58  ;;  %v190_v16 = vmul.f32 %v822_v10, %v1086_v0  ;;  %v191_v17 = vmul.f32 %v823_v11, %v1086_v0  ;;  %v1019_v10 = vld [vmem:[%s2053_s0 + $0xc0] sm:$0xff]  }
  0x2c   :  { %384 = vst [vmem:[%s2055_s4 + $0x130] sm:$0xff] %v320_v8  ;;  %385 = vst [vmem:[%s2055_s4 + $0x138] sm:$0xff] %v321_v9  ;;  %v834_v28 = vunpack.c.l.bf16 %v1018_v6  ;;  %v835_v29 = vunpack.c.h.bf16 %v1018_v6  ;;  %v192_v48 = vmul.f32 %v826_v12, %v1086_v0  ;;  %v193_v51 = vmul.f32 %v827_v13, %v1086_v0 }
  0x2d   :  { %v194_v52 = vmul.f32 %v830_v14, %v1086_v0  ;;  %v195_v55 = vmul.f32 %v831_v15, %v1086_v0  ;;  %v1492_v58 = vadd.f32 %v1103_v7, %v190_v16  ;;  %v1495_v59 = vadd.f32 %v1103_v7, %v191_v17  ;;  %v1020_v15 = vld [vmem:[%s2053_s0 + $0xc8] sm:$0xff]   ;;  %v1021_v16 = vld [vmem:[%s2053_s0 + $0xd0] sm:$0xff]  }
  0x2e   :  { %v196_v1 = vmul.f32 %v834_v28, %v1086_v0  ;;  %v197_v2 = vmul.f32 %v835_v29, %v1086_v0  ;;  %v1500_v3 = vadd.f32 %v1103_v7, %v192_v48  ;;  %v1503_v6 = vadd.f32 %v1103_v7, %v193_v51  ;;  %v1022_v51 = vld [vmem:[%s2053_s0 + $0xd8] sm:$0xff]  }
  0x2f   :  { %v1506_v8 = vadd.f32 %v1103_v7, %v194_v52  ;;  %v1509_v9 = vadd.f32 %v1103_v7, %v195_v55  ;;  %v322_v11 = vmax.f32 %v1492_v58, 0.0  ;;  %v323_v12 = vmax.f32 %v1495_v59, 0.0 }
  0x30   :  { %v1517_v13 = vadd.f32 %v1103_v7, %v196_v1  ;;  %v1520_v14 = vadd.f32 %v1103_v7, %v197_v2  ;;  %v324_v17 = vmax.f32 %v1500_v3, 0.0  ;;  %v325_v28 = vmax.f32 %v1503_v6, 0.0 }
  0x31   :  { %2076 = vst [vmem:[#allocation2_spill] sm:$0xff] %v1506_v8  ;;  %2077 = vst [vmem:[#allocation3_spill] sm:$0xff] %v1509_v9  ;;  %v326_v29 = vmax.f32 %v1506_v8, 0.0  ;;  %v327_v48 = vmax.f32 %v1509_v9, 0.0  ;;  %v838_v1 = vunpack.c.l.bf16 %v1019_v10  ;;  %v839_v2 = vunpack.c.h.bf16 %v1019_v10 }
  0x32   :  { %2078 = vst [vmem:[#allocation4_spill] sm:$0xff] %v1517_v13  ;;  %2079 = vst [vmem:[#allocation5_spill] sm:$0xff] %v1520_v14  ;;  %v328_v52 = vmax.f32 %v1517_v13, 0.0  ;;  %v329_v55 = vmax.f32 %v1520_v14, 0.0  ;;  %v846_v14 = vunpack.c.l.bf16 %v1021_v16  ;;  %v847_v10 = vunpack.c.h.bf16 %v1021_v16 }
  0x33   :  { %386 = vst [vmem:[%s2055_s4 + $0x140] sm:$0xff] %v322_v11  ;;  %387 = vst [vmem:[%s2055_s4 + $0x148] sm:$0xff] %v323_v12  ;;  %v842_v11 = vunpack.c.l.bf16 %v1020_v15  ;;  %v843_v12 = vunpack.c.h.bf16 %v1020_v15  ;;  %v851_v13 = vunpack.c.h.bf16 %v1022_v51 }
  0x34   :  { %388 = vst [vmem:[%s2055_s4 + $0x150] sm:$0xff] %v324_v17  ;;  %389 = vst [vmem:[%s2055_s4 + $0x158] sm:$0xff] %v325_v28  ;;  %v198_v17 = vmul.f32 %v838_v1, %v1086_v0  ;;  %v199_v28 = vmul.f32 %v839_v2, %v1086_v0  ;;  %v202_v16 = vmul.f32 %v846_v14, %v1086_v0 }
  0x35   :  { %390 = vst [vmem:[%s2055_s4 + $0x160] sm:$0xff] %v326_v29  ;;  %391 = vst [vmem:[%s2055_s4 + $0x168] sm:$0xff] %v327_v48  ;;  %v850_v29 = vunpack.c.l.bf16 %v1022_v51  ;;  %v200_v48 = vmul.f32 %v842_v11, %v1086_v0  ;;  %v201_v15 = vmul.f32 %v843_v12, %v1086_v0  ;;  %v203_v9 = vmul.f32 %v847_v10, %v1086_v0  ;;  %v1023_v12 = vld [vmem:[%s2053_s0 + $0xe0] sm:$0xff]  }
  0x36   :  { %392 = vst [vmem:[%s2055_s4 + $0x170] sm:$0xff] %v328_v52  ;;  %393 = vst [vmem:[%s2055_s4 + $0x178] sm:$0xff] %v329_v55  ;;  %v1568_v52 = vadd.f32 %v1103_v7, %v198_v17  ;;  %v1571_v8 = vadd.f32 %v1103_v7, %v199_v28  ;;  %v205_v1 = vmul.f32 %v851_v13, %v1086_v0 }
  0x37   :  { %v204_v55 = vmul.f32 %v850_v29, %v1086_v0  ;;  %v1576_v51 = vadd.f32 %v1103_v7, %v200_v48  ;;  %v1579_v2 = vadd.f32 %v1103_v7, %v201_v15  ;;  %v1582_v14 = vadd.f32 %v1103_v7, %v202_v16  ;;  %v1024_v29 = vld [vmem:[%s2053_s0 + $0xe8] sm:$0xff]  }
  0x38   :  { %2080 = vst [vmem:[#allocation6_spill] sm:$0xff] %v1568_v52  ;;  %2081 = vst [vmem:[#allocation7_spill] sm:$0xff] %v1571_v8  ;;  %v1585_v11 = vadd.f32 %v1103_v7, %v203_v9  ;;  %v330_v10 = vmax.f32 %v1568_v52, 0.0  ;;  %v331_v13 = vmax.f32 %v1571_v8, 0.0  ;;  %v1596_v28 = vadd.f32 %v1103_v7, %v205_v1  ;;  %v1025_v9 = vld [vmem:[%s2053_s0 + $0xf0] sm:$0xff]   ;;  %v1026_v1 = vld [vmem:[%s2053_s0 + $0xf8] sm:$0xff]  }
  0x39   :  { %2082 = vst [vmem:[#allocation8_spill] sm:$0xff] %v1576_v51  ;;  %2083 = vst [vmem:[#allocation9_spill] sm:$0xff] %v1579_v2  ;;  %v1593_v17 = vadd.f32 %v1103_v7, %v204_v55  ;;  %v332_v48 = vmax.f32 %v1576_v51, 0.0  ;;  %v333_v15 = vmax.f32 %v1579_v2, 0.0  ;;  %v334_v16 = vmax.f32 %v1582_v14, 0.0 }
  0x3a   :  { %2084 = vst [vmem:[#allocation10_spill] sm:$0xff] %v1582_v14  ;;  %2085 = vst [vmem:[#allocation11_spill] sm:$0xff] %v1585_v11  ;;  %v335_v55 = vmax.f32 %v1585_v11, 0.0  ;;  %v337_v2 = vmax.f32 %v1596_v28, 0.0  ;;  %v854_v8 = vunpack.c.l.bf16 %v1023_v12  ;;  %v855_v14 = vunpack.c.h.bf16 %v1023_v12 }
  0x3b   :  { %2086 = vst [vmem:[#allocation12_spill] sm:$0xff] %v1593_v17  ;;  %2087 = vst [vmem:[#allocation13_spill] sm:$0xff] %v1596_v28  ;;  %v336_v51 = vmax.f32 %v1593_v17, 0.0  ;;  %v862_v28 = vunpack.c.l.bf16 %v1025_v9  ;;  %v863_v12 = vunpack.c.h.bf16 %v1025_v9  ;;  %v867_v17 = vunpack.c.h.bf16 %v1026_v1 }
  0x3c   :  { %394 = vst [vmem:[%s2055_s4 + $0x180] sm:$0xff] %v330_v10  ;;  %395 = vst [vmem:[%s2055_s4 + $0x188] sm:$0xff] %v331_v13  ;;  %v858_v10 = vunpack.c.l.bf16 %v1024_v29  ;;  %v859_v13 = vunpack.c.h.bf16 %v1024_v29 }
  0x3d   :  { %396 = vst [vmem:[%s2055_s4 + $0x190] sm:$0xff] %v332_v48  ;;  %397 = vst [vmem:[%s2055_s4 + $0x198] sm:$0xff] %v333_v15  ;;  %v206_v48 = vmul.f32 %v854_v8, %v1086_v0  ;;  %v207_v15 = vmul.f32 %v855_v14, %v1086_v0  ;;  %v210_v9 = vmul.f32 %v862_v28, %v1086_v0 }
  0x3e   :  { %398 = vst [vmem:[%s2055_s4 + $0x1a0] sm:$0xff] %v334_v16  ;;  %399 = vst [vmem:[%s2055_s4 + $0x1a8] sm:$0xff] %v335_v55  ;;  %v866_v16 = vunpack.c.l.bf16 %v1026_v1  ;;  %v208_v55 = vmul.f32 %v858_v10, %v1086_v0  ;;  %v209_v29 = vmul.f32 %v859_v13, %v1086_v0  ;;  %v211_v11 = vmul.f32 %v863_v12, %v1086_v0  ;;  %v869_v13 = vld [vmem:[%s2056_s1] sm:$0xff]  }
  0x3f   :  { %400 = vst [vmem:[%s2055_s4 + $0x1b0] sm:$0xff] %v336_v51  ;;  %401 = vst [vmem:[%s2055_s4 + $0x1b8] sm:$0xff] %v337_v2  ;;  %v1644_v51 = vadd.f32 %v1103_v7, %v206_v48  ;;  %v1647_v52 = vadd.f32 %v1103_v7, %v207_v15  ;;  %v213_v2 = vmul.f32 %v867_v17, %v1086_v0  ;;  %v1027_v15 = vld [vmem:[%s2056_s1 + $0x8] sm:$0xff]  }
  0x40   :  { %v212_v8 = vmul.f32 %v866_v16, %v1086_v0  ;;  %v1652_v14 = vadd.f32 %v1103_v7, %v208_v55  ;;  %v1655_v1 = vadd.f32 %v1103_v7, %v209_v29  ;;  %v1658_v28 = vadd.f32 %v1103_v7, %v210_v9 }
  0x41   :  { %v1661_v10 = vadd.f32 %v1103_v7, %v211_v11  ;;  %v338_v12 = vmax.f32 %v1644_v51, 0.0  ;;  %v339_v0 = vmax.f32 %v1647_v52, 0.0  ;;  %v1672_v48 = vadd.f32 %v1103_v7, %v213_v2  ;;  %v1028_v11 = vld [vmem:[%s2056_s1 + $0x10] sm:$0xff]  }
  0x42   :  { %2088 = vst [vmem:[#allocation14_spill] sm:$0xff] %v1652_v14  ;;  %2089 = vst [vmem:[#allocation15_spill] sm:$0xff] %v1655_v1  ;;  %v1669_v17 = vadd.f32 %v1103_v7, %v212_v8  ;;  %v340_v16 = vmax.f32 %v1652_v14, 0.0  ;;  %v341_v55 = vmax.f32 %v1655_v1, 0.0  ;;  %v342_v29 = vmax.f32 %v1658_v28, 0.0  ;;  %v1029_v7 = vld [vmem:[%s2056_s1 + $0x18] sm:$0xff]  }
  0x43   :  { %2090 = vst [vmem:[#allocation16_spill] sm:$0xff] %v1658_v28  ;;  %2091 = vst [vmem:[#allocation17_spill] sm:$0xff] %v1661_v10  ;;  %v343_v9 = vmax.f32 %v1661_v10, 0.0  ;;  %v345_v2 = vmax.f32 %v1672_v48, 0.0  ;;  %v870_v1 = vunpack.c.l.bf16 %v869_v13  ;;  %v871_v28 = vunpack.c.h.bf16 %v869_v13 }
  0x44   :  { %2092 = vst [vmem:[#allocation18_spill] sm:$0xff] %v1669_v17  ;;  %2093 = vst [vmem:[#allocation19_spill] sm:$0xff] %v1672_v48  ;;  %v344_v8 = vmax.f32 %v1669_v17, 0.0  ;;  %v878_v48 = vunpack.c.l.bf16 %v1028_v11  ;;  %v879_v13 = vunpack.c.h.bf16 %v1028_v11  ;;  %v883_v17 = vunpack.c.h.bf16 %v1029_v7 }
  0x45   :  { %402 = vst [vmem:[%s2055_s4 + $0x1c0] sm:$0xff] %v338_v12  ;;  %403 = vst [vmem:[%s2055_s4 + $0x1c8] sm:$0xff] %v339_v0  ;;  %v874_v12 = vunpack.c.l.bf16 %v1027_v15  ;;  %v875_v0 = vunpack.c.h.bf16 %v1027_v15 }
  0x46   :  { %404 = vst [vmem:[%s2055_s4 + $0x1d0] sm:$0xff] %v340_v16  ;;  %405 = vst [vmem:[%s2055_s4 + $0x1d8] sm:$0xff] %v341_v55  ;;  %v538_v16 = vadd.f32 %v870_v1, %v1112_v20  ;;  %v539_v55 = vadd.f32 %v871_v28, %v1115_v21  ;;  %v542_v11 = vadd.f32 %v878_v48, %v1126_v26  ;;  %v1033_v48 = vld [vmem:[%s2056_s1 + $0x38] sm:$0xff]  }
  0x47   :  { %406 = vst [vmem:[%s2055_s4 + $0x1e0] sm:$0xff] %v342_v29  ;;  %407 = vst [vmem:[%s2055_s4 + $0x1e8] sm:$0xff] %v343_v9  ;;  %v882_v29 = vunpack.c.l.bf16 %v1029_v7  ;;  %v540_v9 = vadd.f32 %v874_v12, %v1120_v24  ;;  %v541_v15 = vadd.f32 %v875_v0, %v1123_v25  ;;  %v543_v10 = vadd.f32 %v879_v13, %v1129_v27  ;;  %v1031_v24 = vld [vmem:[%s2056_s1 + $0x28] sm:$0xff]   ;;  %v1032_v25 = vld [vmem:[%s2056_s1 + $0x30] sm:$0xff]  }
  0x48   :  { %408 = vst [vmem:[%s2055_s4 + $0x1f0] sm:$0xff] %v344_v8  ;;  %409 = vst [vmem:[%s2055_s4 + $0x1f8] sm:$0xff] %v345_v2  ;;  %v1030_v8 = vld [vmem:[%s2056_s1 + $0x20] sm:$0xff]   ;;  %v602_v14 = vmax.f32 %v538_v16, 0.0  ;;  %v603_v2 = vmax.f32 %v539_v55, 0.0  ;;  %v545_v21 = vadd.f32 %v883_v17, %v1140_v32  ;;  %v606_v1 = vmax.f32 %v542_v11, 0.0 }
  0x49   :  { %v544_v20 = vadd.f32 %v882_v29, %v1137_v31  ;;  %v604_v26 = vmax.f32 %v540_v9, 0.0  ;;  %v605_v27 = vmax.f32 %v541_v15, 0.0  ;;  %v607_v28 = vmax.f32 %v543_v10, 0.0 }
  0x4a   :  { %666 = vst [vmem:[%s2057_s3] sm:$0xff] %v602_v14  ;;  %667 = vst [vmem:[%s2057_s3 + $0x8] sm:$0xff] %v603_v2  ;;  %v609_v32 = vmax.f32 %v545_v21, 0.0  ;;  %v886_v17 = vunpack.c.l.bf16 %v1030_v8  ;;  %v887_v7 = vunpack.c.h.bf16 %v1030_v8  ;;  %v890_v14 = vunpack.c.l.bf16 %v1031_v24  ;;  %v1034_v2 = vld [vmem:[%s2056_s1 + $0x40] sm:$0xff]  }
  0x4b   :  { %v608_v31 = vmax.f32 %v544_v20, 0.0  ;;  %668 = vst [vmem:[%s2057_s3 + $0x10] sm:$0xff] %v604_v26  ;;  %669 = vst [vmem:[%s2057_s3 + $0x18] sm:$0xff] %v605_v27  ;;  %v891_v10 = vunpack.c.h.bf16 %v1031_v24  ;;  %v894_v12 = vunpack.c.l.bf16 %v1032_v25  ;;  %v895_v0 = vunpack.c.h.bf16 %v1032_v25  ;;  %v1037_v26 = vld [vmem:[%s2056_s1 + $0x58] sm:$0xff]  }
  0x4c   :  { %670 = vst [vmem:[%s2057_s3 + $0x20] sm:$0xff] %v606_v1  ;;  %671 = vst [vmem:[%s2057_s3 + $0x28] sm:$0xff] %v607_v28  ;;  %v546_v13 = vadd.f32 %v886_v17, %v1188_v56  ;;  %v547_v16 = vadd.f32 %v887_v7, %v1191_v57  ;;  %v898_v55 = vunpack.c.l.bf16 %v1033_v48  ;;  %v899_v29 = vunpack.c.h.bf16 %v1033_v48 }
  0x4d   :  { %672 = vst [vmem:[%s2057_s3 + $0x30] sm:$0xff] %v608_v31  ;;  %673 = vst [vmem:[%s2057_s3 + $0x38] sm:$0xff] %v609_v32  ;;  %v548_v9 = vadd.f32 %v890_v14, %v1196_v60  ;;  %v549_v15 = vadd.f32 %v891_v10, %v1199_v61  ;;  %v550_v11 = vadd.f32 %v894_v12, %v1202_v62  ;;  %v1035_v60 = vld [vmem:[%s2056_s1 + $0x48] sm:$0xff]   ;;  %v1036_v61 = vld [vmem:[%s2056_s1 + $0x50] sm:$0xff]   ;;  %v902_v27 = vunpack.c.l.bf16 %v1034_v2 }
  0x4e   :  { %v551_v8 = vadd.f32 %v895_v0, %v1205_v63  ;;  %v610_v20 = vmax.f32 %v546_v13, 0.0  ;;  %v611_v21 = vmax.f32 %v547_v16, 0.0  ;;  %v552_v56 = vadd.f32 %v898_v55, %v1213_v4  ;;  %v1038_v55 = vld [vmem:[%s2056_s1 + $0x60] sm:$0xff]  }
  0x4f   :  { %v553_v57 = vadd.f32 %v899_v29, %v1216_v5  ;;  %v612_v62 = vmax.f32 %v548_v9, 0.0  ;;  %v613_v63 = vmax.f32 %v549_v15, 0.0  ;;  %v614_v24 = vmax.f32 %v550_v11, 0.0 }
  0x50   :  { %v615_v25 = vmax.f32 %v551_v8, 0.0  ;;  %674 = vst [vmem:[%s2057_s3 + $0x40] sm:$0xff] %v610_v20  ;;  %675 = vst [vmem:[%s2057_s3 + $0x48] sm:$0xff] %v611_v21  ;;  %v616_v4 = vmax.f32 %v552_v56, 0.0  ;;  %v903_v1 = vunpack.c.h.bf16 %v1034_v2  ;;  %v906_v28 = vunpack.c.l.bf16 %v1035_v60  ;;  %v1041_v8 = vld [vmem:[%s2056_s1 + $0x78] sm:$0xff]  }
  0x51   :  { %v617_v5 = vmax.f32 %v553_v57, 0.0  ;;  %676 = vst [vmem:[%s2057_s3 + $0x50] sm:$0xff] %v612_v62  ;;  %677 = vst [vmem:[%s2057_s3 + $0x58] sm:$0xff] %v613_v63  ;;  %v907_v48 = vunpack.c.h.bf16 %v1035_v60  ;;  %v910_v31 = vunpack.c.l.bf16 %v1036_v61  ;;  %v911_v32 = vunpack.c.h.bf16 %v1036_v61 }
  0x52   :  { %678 = vst [vmem:[%s2057_s3 + $0x60] sm:$0xff] %v614_v24  ;;  %679 = vst [vmem:[%s2057_s3 + $0x68] sm:$0xff] %v615_v25  ;;  %v554_v17 = vadd.f32 %v902_v27, %v1264_v38  ;;  %v555_v7 = vadd.f32 %v903_v1, %v1267_v39  ;;  %v914_v14 = vunpack.c.l.bf16 %v1037_v26  ;;  %v915_v10 = vunpack.c.h.bf16 %v1037_v26  ;;  %v1042_v27 = vld [vmem:[%s2056_s1 + $0x80] sm:$0xff]  }
  0x53   :  { %680 = vst [vmem:[%s2057_s3 + $0x70] sm:$0xff] %v616_v4  ;;  %681 = vst [vmem:[%s2057_s3 + $0x78] sm:$0xff] %v617_v5  ;;  %v556_v12 = vadd.f32 %v906_v28, %v1272_v42  ;;  %v557_v0 = vadd.f32 %v907_v48, %v1275_v43  ;;  %v558_v13 = vadd.f32 %v910_v31, %v1278_v44  ;;  %v1039_v42 = vld [vmem:[%s2056_s1 + $0x68] sm:$0xff]   ;;  %v1040_v43 = vld [vmem:[%s2056_s1 + $0x70] sm:$0xff]   ;;  %v918_v2 = vunpack.c.l.bf16 %v1038_v55 }
  0x54   :  { %v559_v16 = vadd.f32 %v911_v32, %v1281_v45  ;;  %v618_v29 = vmax.f32 %v554_v17, 0.0  ;;  %v619_v9 = vmax.f32 %v555_v7, 0.0  ;;  %v560_v38 = vadd.f32 %v914_v14, %v1289_v49  ;;  %v1045_v32 = vld [vmem:[%s2056_s1 + $0x98] sm:$0xff]  }
  0x55   :  { %v561_v39 = vadd.f32 %v915_v10, %v1292_v50  ;;  %v620_v44 = vmax.f32 %v556_v12, 0.0  ;;  %v621_v45 = vmax.f32 %v557_v0, 0.0  ;;  %v622_v15 = vmax.f32 %v558_v13, 0.0 }
  0x56   :  { %v623_v11 = vmax.f32 %v559_v16, 0.0  ;;  %682 = vst [vmem:[%s2057_s3 + $0x80] sm:$0xff] %v618_v29  ;;  %683 = vst [vmem:[%s2057_s3 + $0x88] sm:$0xff] %v619_v9  ;;  %v624_v49 = vmax.f32 %v560_v38, 0.0  ;;  %v919_v20 = vunpack.c.h.bf16 %v1038_v55  ;;  %v922_v21 = vunpack.c.l.bf16 %v1039_v42 }
  0x57   :  { %v625_v50 = vmax.f32 %v561_v39, 0.0  ;;  %684 = vst [vmem:[%s2057_s3 + $0x90] sm:$0xff] %v620_v44  ;;  %685 = vst [vmem:[%s2057_s3 + $0x98] sm:$0xff] %v621_v45  ;;  %v923_v56 = vunpack.c.h.bf16 %v1039_v42  ;;  %v926_v57 = vunpack.c.l.bf16 %v1040_v43  ;;  %v927_v60 = vunpack.c.h.bf16 %v1040_v43  ;;  %v1046_v43 = vld [vmem:[%s2056_s1 + $0xa0] sm:$0xff]  }
  0x58   :  { %686 = vst [vmem:[%s2057_s3 + $0xa0] sm:$0xff] %v622_v15  ;;  %687 = vst [vmem:[%s2057_s3 + $0xa8] sm:$0xff] %v623_v11  ;;  %v562_v61 = vadd.f32 %v918_v2, %v1340_v22  ;;  %v563_v62 = vadd.f32 %v919_v20, %v1343_v23  ;;  %v930_v63 = vunpack.c.l.bf16 %v1041_v8  ;;  %v931_v24 = vunpack.c.h.bf16 %v1041_v8  ;;  %v1049_v8 = vld [vmem:[%s2056_s1 + $0xb8] sm:$0xff]  }
  0x59   :  { %688 = vst [vmem:[%s2057_s3 + $0xb0] sm:$0xff] %v624_v49  ;;  %689 = vst [vmem:[%s2057_s3 + $0xb8] sm:$0xff] %v625_v50  ;;  %v564_v25 = vadd.f32 %v922_v21, %v1348_v30  ;;  %v565_v26 = vadd.f32 %v923_v56, %v1351_v33  ;;  %v566_v4 = vadd.f32 %v926_v57, %v1354_v34  ;;  %v1043_v30 = vld [vmem:[%s2056_s1 + $0x88] sm:$0xff]   ;;  %v1044_v33 = vld [vmem:[%s2056_s1 + $0x90] sm:$0xff]   ;;  %v934_v17 = vunpack.c.l.bf16 %v1042_v27 }
  0x5a   :  { %v567_v5 = vadd.f32 %v927_v60, %v1357_v35  ;;  %v626_v1 = vmax.f32 %v562_v61, 0.0  ;;  %v627_v28 = vmax.f32 %v563_v62, 0.0  ;;  %v568_v22 = vadd.f32 %v930_v63, %v1365_v41 }
  0x5b   :  { %v569_v23 = vadd.f32 %v931_v24, %v1368_v46  ;;  %v628_v34 = vmax.f32 %v564_v25, 0.0  ;;  %v629_v35 = vmax.f32 %v565_v26, 0.0  ;;  %v630_v48 = vmax.f32 %v566_v4, 0.0  ;;  %v2094_v25 = vld [vmem:[#allocation2_spill] sm:$0xff]  ;;  %v2095_v4 = vld [vmem:[#allocation3_spill] sm:$0xff] }
  0x5c   :  { %v631_v31 = vmax.f32 %v567_v5, 0.0  ;;  %690 = vst [vmem:[%s2057_s3 + $0xc0] sm:$0xff] %v626_v1  ;;  %691 = vst [vmem:[%s2057_s3 + $0xc8] sm:$0xff] %v627_v28  ;;  %v632_v41 = vmax.f32 %v568_v22, 0.0  ;;  %v935_v7 = vunpack.c.h.bf16 %v1042_v27  ;;  %v938_v14 = vunpack.c.l.bf16 %v1043_v30  ;;  %v1050_v27 = vld [vmem:[%s2056_s1 + $0xc0] sm:$0xff]   ;;  %v2096_v22 = vld [vmem:[#allocation4_spill] sm:$0xff] }
  0x5d   :  { %v633_v46 = vmax.f32 %v569_v23, 0.0  ;;  %692 = vst [vmem:[%s2057_s3 + $0xd0] sm:$0xff] %v628_v34  ;;  %693 = vst [vmem:[%s2057_s3 + $0xd8] sm:$0xff] %v629_v35  ;;  %v939_v10 = vunpack.c.h.bf16 %v1043_v30  ;;  %v942_v12 = vunpack.c.l.bf16 %v1044_v33  ;;  %v943_v0 = vunpack.c.h.bf16 %v1044_v33  ;;  %v2097_v23 = vld [vmem:[#allocation5_spill] sm:$0xff] }
  0x5e   :  { %694 = vst [vmem:[%s2057_s3 + $0xe0] sm:$0xff] %v630_v48  ;;  %695 = vst [vmem:[%s2057_s3 + $0xe8] sm:$0xff] %v631_v31  ;;  %v570_v13 = vadd.f32 %v934_v17, %v1416_v18  ;;  %v571_v16 = vadd.f32 %v935_v7, %v1419_v19  ;;  %v946_v55 = vunpack.c.l.bf16 %v1045_v32  ;;  %v947_v29 = vunpack.c.h.bf16 %v1045_v32  ;;  %v1053_v48 = vld [vmem:[%s2056_s1 + $0xd8] sm:$0xff]  }
  0x5f   :  { %696 = vst [vmem:[%s2057_s3 + $0xf0] sm:$0xff] %v632_v41  ;;  %697 = vst [vmem:[%s2057_s3 + $0xf8] sm:$0xff] %v633_v46  ;;  %v572_v9 = vadd.f32 %v938_v14, %v1424_v36  ;;  %v573_v38 = vadd.f32 %v939_v10, %v1427_v37  ;;  %v574_v39 = vadd.f32 %v942_v12, %v1430_v40  ;;  %v1047_v36 = vld [vmem:[%s2056_s1 + $0xa8] sm:$0xff]   ;;  %v1048_v37 = vld [vmem:[%s2056_s1 + $0xb0] sm:$0xff]   ;;  %v950_v49 = vunpack.c.l.bf16 %v1046_v43 }
  0x60   :  { %v575_v42 = vadd.f32 %v943_v0, %v1433_v47  ;;  %v634_v44 = vmax.f32 %v570_v13, 0.0  ;;  %v635_v45 = vmax.f32 %v571_v16, 0.0  ;;  %v576_v18 = vadd.f32 %v946_v55, %v1441_v53  ;;  %v2098_v12 = vld [vmem:[#allocation6_spill] sm:$0xff]  ;;  %v2099_v13 = vld [vmem:[#allocation7_spill] sm:$0xff] }
  0x61   :  { %v577_v19 = vadd.f32 %v947_v29, %v1444_v54  ;;  %v636_v40 = vmax.f32 %v572_v9, 0.0  ;;  %v637_v47 = vmax.f32 %v573_v38, 0.0  ;;  %v638_v15 = vmax.f32 %v574_v39, 0.0  ;;  %v2100_v9 = vld [vmem:[#allocation8_spill] sm:$0xff]  ;;  %v2101_v39 = vld [vmem:[#allocation9_spill] sm:$0xff] }
  0x62   :  { %v639_v11 = vmax.f32 %v575_v42, 0.0  ;;  %698 = vst [vmem:[%s2057_s3 + $0x100] sm:$0xff] %v634_v44  ;;  %699 = vst [vmem:[%s2057_s3 + $0x108] sm:$0xff] %v635_v45  ;;  %v640_v53 = vmax.f32 %v576_v18, 0.0  ;;  %v951_v50 = vunpack.c.h.bf16 %v1046_v43  ;;  %v954_v2 = vunpack.c.l.bf16 %v1047_v36  ;;  %v2102_v43 = vld [vmem:[#allocation10_spill] sm:$0xff]  ;;  %v2103_v45 = vld [vmem:[#allocation11_spill] sm:$0xff] }
  0x63   :  { %v641_v54 = vmax.f32 %v577_v19, 0.0  ;;  %700 = vst [vmem:[%s2057_s3 + $0x110] sm:$0xff] %v636_v40  ;;  %701 = vst [vmem:[%s2057_s3 + $0x118] sm:$0xff] %v637_v47  ;;  %v955_v20 = vunpack.c.h.bf16 %v1047_v36  ;;  %v958_v21 = vunpack.c.l.bf16 %v1048_v37  ;;  %v959_v56 = vunpack.c.h.bf16 %v1048_v37  ;;  %v1054_v19 = vld [vmem:[%s2056_s1 + $0xe0] sm:$0xff]   ;;  %v2104_v40 = vld [vmem:[#allocation12_spill] sm:$0xff] }
  0x64   :  { %702 = vst [vmem:[%s2057_s3 + $0x120] sm:$0xff] %v638_v15  ;;  %703 = vst [vmem:[%s2057_s3 + $0x128] sm:$0xff] %v639_v11  ;;  %v578_v57 = vadd.f32 %v950_v49, %v1492_v58  ;;  %v579_v60 = vadd.f32 %v951_v50, %v1495_v59  ;;  %v962_v61 = vunpack.c.l.bf16 %v1049_v8  ;;  %v963_v62 = vunpack.c.h.bf16 %v1049_v8  ;;  %v2105_v15 = vld [vmem:[#allocation13_spill] sm:$0xff]  ;;  %v1055_v8 = vld [vmem:[%s2056_s1 + $0xe8] sm:$0xff]  }
  0x65   :  { %704 = vst [vmem:[%s2057_s3 + $0x130] sm:$0xff] %v640_v53  ;;  %705 = vst [vmem:[%s2057_s3 + $0x138] sm:$0xff] %v641_v54  ;;  %v580_v63 = vadd.f32 %v954_v2, %v1500_v3  ;;  %v581_v24 = vadd.f32 %v955_v20, %v1503_v6  ;;  %v582_v26 = vadd.f32 %v958_v21, %v2094_v25  ;;  %v1051_v3 = vld [vmem:[%s2056_s1 + $0xc8] sm:$0xff]   ;;  %v1052_v6 = vld [vmem:[%s2056_s1 + $0xd0] sm:$0xff]   ;;  %v966_v41 = vunpack.c.l.bf16 %v1050_v27 }
  0x66   :  { %v583_v5 = vadd.f32 %v959_v56, %v2095_v4  ;;  %v642_v1 = vmax.f32 %v578_v57, 0.0  ;;  %v643_v28 = vmax.f32 %v579_v60, 0.0  ;;  %v584_v58 = vadd.f32 %v962_v61, %v2096_v22  ;;  %v1056_v53 = vld [vmem:[%s2056_s1 + $0xf0] sm:$0xff]   ;;  %v1057_v20 = vld [vmem:[%s2056_s1 + $0xf8] sm:$0xff]  }
  0x67   :  { %v585_v59 = vadd.f32 %v963_v62, %v2097_v23  ;;  %v644_v30 = vmax.f32 %v580_v63, 0.0  ;;  %v645_v33 = vmax.f32 %v581_v24, 0.0  ;;  %v646_v34 = vmax.f32 %v582_v26, 0.0 }
  0x68   :  { %v647_v35 = vmax.f32 %v583_v5, 0.0  ;;  %706 = vst [vmem:[%s2057_s3 + $0x140] sm:$0xff] %v642_v1  ;;  %707 = vst [vmem:[%s2057_s3 + $0x148] sm:$0xff] %v643_v28  ;;  %v648_v31 = vmax.f32 %v584_v58, 0.0  ;;  %v967_v46 = vunpack.c.h.bf16 %v1050_v27  ;;  %v970_v17 = vunpack.c.l.bf16 %v1051_v3  ;;  %v2106_v27 = vld [vmem:[#allocation14_spill] sm:$0xff]  ;;  %v2107_v28 = vld [vmem:[#allocation15_spill] sm:$0xff] }
  0x69   :  { %v649_v32 = vmax.f32 %v585_v59, 0.0  ;;  %708 = vst [vmem:[%s2057_s3 + $0x150] sm:$0xff] %v644_v30  ;;  %709 = vst [vmem:[%s2057_s3 + $0x158] sm:$0xff] %v645_v33  ;;  %v971_v7 = vunpack.c.h.bf16 %v1051_v3  ;;  %v974_v14 = vunpack.c.l.bf16 %v1052_v6  ;;  %v975_v10 = vunpack.c.h.bf16 %v1052_v6  ;;  %v2108_v58 = vld [vmem:[#allocation16_spill] sm:$0xff]  ;;  %v2109_v59 = vld [vmem:[#allocation17_spill] sm:$0xff] }
  0x6a   :  { %710 = vst [vmem:[%s2057_s3 + $0x160] sm:$0xff] %v646_v34  ;;  %711 = vst [vmem:[%s2057_s3 + $0x168] sm:$0xff] %v647_v35  ;;  %v586_v0 = vadd.f32 %v966_v41, %v2098_v12  ;;  %v587_v16 = vadd.f32 %v967_v46, %v2099_v13  ;;  %v978_v55 = vunpack.c.l.bf16 %v1053_v48  ;;  %v979_v29 = vunpack.c.h.bf16 %v1053_v48  ;;  %v2110_v33 = vld [vmem:[#allocation18_spill] sm:$0xff]  ;;  %v2111_v35 = vld [vmem:[#allocation19_spill] sm:$0xff] }
  0x6b   :  { %712 = vst [vmem:[%s2057_s3 + $0x170] sm:$0xff] %v648_v31  ;;  %713 = vst [vmem:[%s2057_s3 + $0x178] sm:$0xff] %v649_v32  ;;  %v588_v38 = vadd.f32 %v970_v17, %v2100_v9  ;;  %v589_v42 = vadd.f32 %v971_v7, %v2101_v39  ;;  %v590_v44 = vadd.f32 %v974_v14, %v2102_v43  ;;  %v982_v57 = vunpack.c.l.bf16 %v1054_v19 }
  0x6c   :  { %v591_v18 = vadd.f32 %v975_v10, %v2103_v45  ;;  %v650_v36 = vmax.f32 %v586_v0, 0.0  ;;  %v651_v37 = vmax.f32 %v587_v16, 0.0  ;;  %v592_v47 = vadd.f32 %v978_v55, %v2104_v40 }
  0x6d   :  { %v593_v11 = vadd.f32 %v979_v29, %v2105_v15  ;;  %v652_v54 = vmax.f32 %v588_v38, 0.0  ;;  %v653_v49 = vmax.f32 %v589_v42, 0.0  ;;  %v654_v50 = vmax.f32 %v590_v44, 0.0 }
  0x6e   :  { %v655_v2 = vmax.f32 %v591_v18, 0.0  ;;  %714 = vst [vmem:[%s2057_s3 + $0x180] sm:$0xff] %v650_v36  ;;  %715 = vst [vmem:[%s2057_s3 + $0x188] sm:$0xff] %v651_v37  ;;  %v656_v21 = vmax.f32 %v592_v47, 0.0  ;;  %v983_v60 = vunpack.c.h.bf16 %v1054_v19  ;;  %v986_v61 = vunpack.c.l.bf16 %v1055_v8 }
  0x6f   :  { %v657_v56 = vmax.f32 %v593_v11, 0.0  ;;  %716 = vst [vmem:[%s2057_s3 + $0x190] sm:$0xff] %v652_v54  ;;  %717 = vst [vmem:[%s2057_s3 + $0x198] sm:$0xff] %v653_v49  ;;  %v987_v62 = vunpack.c.h.bf16 %v1055_v8  ;;  %v990_v63 = vunpack.c.l.bf16 %v1056_v53  ;;  %v991_v24 = vunpack.c.h.bf16 %v1056_v53 }
  0x70   :  { %718 = vst [vmem:[%s2057_s3 + $0x1a0] sm:$0xff] %v654_v50  ;;  %719 = vst [vmem:[%s2057_s3 + $0x1a8] sm:$0xff] %v655_v2  ;;  %v594_v25 = vadd.f32 %v982_v57, %v1644_v51  ;;  %v595_v26 = vadd.f32 %v983_v60, %v1647_v52  ;;  %v994_v4 = vunpack.c.l.bf16 %v1057_v20  ;;  %v995_v5 = vunpack.c.h.bf16 %v1057_v20 }
  0x71   :  { %720 = vst [vmem:[%s2057_s3 + $0x1b0] sm:$0xff] %v656_v21  ;;  %721 = vst [vmem:[%s2057_s3 + $0x1b8] sm:$0xff] %v657_v56  ;;  %v596_v1 = vadd.f32 %v986_v61, %v2106_v27  ;;  %v597_v22 = vadd.f32 %v987_v62, %v2107_v28  ;;  %v598_v23 = vadd.f32 %v990_v63, %v2108_v58 }
  0x72   :  { %v599_v3 = vadd.f32 %v991_v24, %v2109_v59  ;;  %v658_v6 = vmax.f32 %v594_v25, 0.0  ;;  %v659_v30 = vmax.f32 %v595_v26, 0.0  ;;  %v600_v34 = vadd.f32 %v994_v4, %v2110_v33 }
  0x73   :  { %v601_v48 = vadd.f32 %v995_v5, %v2111_v35  ;;  %v660_v31 = vmax.f32 %v596_v1, 0.0  ;;  %v661_v51 = vmax.f32 %v597_v22, 0.0  ;;  %v662_v32 = vmax.f32 %v598_v23, 0.0 }
  0x74   :  { %v663_v52 = vmax.f32 %v599_v3, 0.0  ;;  %722 = vst [vmem:[%s2057_s3 + $0x1c0] sm:$0xff] %v658_v6  ;;  %723 = vst [vmem:[%s2057_s3 + $0x1c8] sm:$0xff] %v659_v30  ;;  %v664_v41 = vmax.f32 %v600_v34, 0.0 }
  0x75   :  { %v665_v46 = vmax.f32 %v601_v48, 0.0  ;;  %724 = vst [vmem:[%s2057_s3 + $0x1d0] sm:$0xff] %v660_v31  ;;  %725 = vst [vmem:[%s2057_s3 + $0x1d8] sm:$0xff] %v661_v51 }
  0x76   :  { %726 = vst [vmem:[%s2057_s3 + $0x1e0] sm:$0xff] %v662_v32  ;;  %727 = vst [vmem:[%s2057_s3 + $0x1e8] sm:$0xff] %v663_v52 }
  0x77   :  { %728 = vst [vmem:[%s2057_s3 + $0x1f0] sm:$0xff] %v664_v41  ;;  %729 = vst [vmem:[%s2057_s3 + $0x1f8] sm:$0xff] %v665_v46 }

// kernel: basic_block1_forward.4
= control target key start
LH: loop header
LB: loop body
LE: loop exit
PB: predicated region body
PF: predicated region fallthrough
CT: control target
= control target key end

     0   :  { %s3240_s15 = smov 0   ;;  %s3242_s16 = smov 0   ;;  %s3956_s0 = inlined_call_operand.vmem [shape: bf16[2,16,16,128], index: 0, kind: input, shape index: {}]   ;;  %s3957_s1 = inlined_call_operand.vmem [shape: f32[2,128], index: 1, kind: input, shape index: {}]   ;;  %s3958_s2 = inlined_call_operand.vmem [shape: bf16[1152,128], index: 2, kind: input, shape index: {}]   ;;  %s3959_s3 = inlined_call_operand.vmem [shape: bf16[2,16,16,128], index: 3, kind: output, shape index: {0}]   ;;  %s3960_s4 = inlined_call_operand.vmem [shape: f32[2,4,2,128], index: 4, kind: output, shape index: {1}]  }
   0x1   :  { %s3244_s17 = smov 0   ;;  %s3246_s18 = smov 0  }
   0x2   :  { %s3248_s19 = smov 0  }
   0x3 LB: > { %s24_s20 = sadd.s32 1, %s3205_s17  ;;  %s27_s21 = sadd.s32 1, %s3209_s18  ;;  %s3213_s19 = sphi %s3248_s19, %s15_s19   ;;  %s3209_s18 = sphi %s3246_s18, %s3989_s18   ;;  %s3205_s17 = sphi %s3244_s17, %s3988_s17   ;;  %s3201_s16 = sphi %s3242_s16, %s3987_s16   ;;  %s3197_s15 = sphi %s3240_s15, %s3986_s15  }
   0x4   : > { %p25_p0 = scmp.ge.s32.totalorder %s24_s20, 4  ;;  %p2565_p1 = scmp.ge.s32.totalorder %s3213_s19, 1 }
   0x5   : > { %p181_p2 = scmp.lt.s32.totalorder %s3213_s19, 9 }
   0x6   : > { %s3991_s20 = smov (%p25_p0, %s24_s20), 0  ;;  %s3993_s21 = smov (!%p25_p0, %s27_s21), %s3209_s18 }
   0x7   : > { %p182_p3 = pnand %p2565_p1, %p181_p2  ;;  %p29_p4 = scmp.ge.s32.totalorder %s3993_s21, 2 }
   0x9   : > { %s3995_s21 = smov (%p29_p4, %s3993_s21), 0  ;;  %185 = sbr.rel (%p182_p3) target bundleno = 421 (0x1a5), region = 32 }
   0xe   : > { %v3049_v0 = vld [vmem:[%s3958_s2 + $0xf8] sm:$0xff]   ;;  %v3053_v4 = vld [vmem:[%s3958_s2 + $0xf0] sm:$0xff]   ;;  %v3057_v8 = vld [vmem:[%s3958_s2 + $0xe8] sm:$0xff]   ;;  %s3314_s29 = sshll.u32 %s3197_s15, 2  ;;  %p220_p5 = scmp.lt.s32.totalorder %s3201_s16, 1  ;;  %vm347_vm0 = vcmask 1040384  }
   0xf   : > { %v3050_v1 = vld [vmem:[%s3958_s2 + $0xb8] sm:$0xff]   ;;  %2837 = vmatprep.subr.bf16.mxu1 %v3049_v0  ;;  %v3054_v5 = vld [vmem:[%s3958_s2 + $0xb0] sm:$0xff]   ;;  %v3058_v9 = vld [vmem:[%s3958_s2 + $0xa8] sm:$0xff]   ;;  %s2579_s10 = sadd.s32 4294967295, %s3314_s29  ;;  %s2728_s22 = sshll.u32 %s3197_s15, 5  ;;  %vm415_vm7 = vcmask 1043456  }
  0x10   : > { %v3051_v2 = vld [vmem:[%s3958_s2 + $0x78] sm:$0xff]   ;;  %2838 = vmatpush3.bf16.msra.mxu1 %v3050_v1  ;;  %v3055_v6 = vld [vmem:[%s3958_s2 + $0x70] sm:$0xff]   ;;  %v3059_v10 = vld [vmem:[%s3958_s2 + $0x68] sm:$0xff]   ;;  %p304_p6 = scmp.gt.s32.totalorder %s2579_s10, 0  ;;  %s3997_s16 = smov (!%p220_p5, %s3201_s16), 1  ;;  %vm753_vm10 = vcmask 1042432  }
  0x11   : > { %v3052_v3 = vld [vmem:[%s3958_s2 + $0x38] sm:$0xff]   ;;  %2797 = vmatprep.subr.bf16.mxu0 %v3051_v2  ;;  %2839 = vmatprep.subr.bf16.mxu1 %v3053_v4  ;;  %v3056_v7 = vld [vmem:[%s3958_s2 + $0x30] sm:$0xff]   ;;  %v3060_v11 = vld [vmem:[%s3958_s2 + $0x28] sm:$0xff]   ;;  %s2726_s9 = sshll.u32 %s3997_s16, 7  ;;  %p337_p7 = scmp.eq.s32.totalorder %s3197_s15, 0  ;;  %vm754_vm11 = vcmask 1046532  }
  0x12   : > { %2798 = vmatpush3.bf16.msra.mxu0 %v3052_v3  ;;  %v3061_v12 = vld [vmem:[%s3958_s2 + $0xe0] sm:$0xff]   ;;  %v3065_v16 = vld [vmem:[%s3958_s2 + $0xd8] sm:$0xff]   ;;  %v3069_v20 = vld [vmem:[%s3958_s2 + $0xd0] sm:$0xff]   ;;  %s3999_s10 = smov (!%p304_p6, %s2579_s10), 0  ;;  %s3368_s27 = scalar_lea.vmem %s3956_s0, %s2726_s9  ;;  %vm348_vm1 = vsmask.f32 256 }
  0x13   : > { %2799 = vmatprep.subr.bf16.mxu0 %v3055_v6  ;;  %v3062_v13 = vld [vmem:[%s3958_s2 + $0xa0] sm:$0xff]   ;;  %v3066_v17 = vld [vmem:[%s3958_s2 + $0x98] sm:$0xff]   ;;  %v3070_v21 = vld [vmem:[%s3958_s2 + $0x90] sm:$0xff]   ;;  %s2729_s28 = sshll.u32 %s3999_s10, 3  ;;  %s3377_s8 = scalar_lea.vmem %s3368_s27, %s2728_s22  ;;  %vm368_vm3 = vsmask.f32 7938 }
  0x14   : > { %2840 = vmatpush3.bf16.msra.mxu1 %v3054_v5  ;;  %v3063_v14 = vld [vmem:[%s3958_s2 + $0x60] sm:$0xff]   ;;  %v3067_v18 = vld [vmem:[%s3958_s2 + $0x58] sm:$0xff]   ;;  %v3071_v22 = vld [vmem:[%s3958_s2 + $0x50] sm:$0xff]   ;;  %s308_s10 = scalar_lea.vmem %s3368_s27, %s2729_s28  ;;  %vm393_vm6 = vsmask.f32 4368  ;;  %s320_s24 = sadd.s32 4, %s3314_s29 }
  0x15   : > { %2841 = vmatprep.subr.bf16.mxu1 %v3057_v8  ;;  %v3064_v15 = vld [vmem:[%s3958_s2 + $0x20] sm:$0xff]   ;;  %v3068_v19 = vld [vmem:[%s3958_s2 + $0x18] sm:$0xff]   ;;  %v3072_v23 = vld [vmem:[%s3958_s2 + $0x10] sm:$0xff]   ;;  %s3400_s25 = scalar_select %p337_p7, 1, 0 }
  0x16   : > { %2800 = vmatpush3.bf16.msra.mxu0 %v3056_v7  ;;  %v3073_v24 = vld [vmem:[%s3958_s2 + $0xc8] sm:$0xff]   ;;  %v3077_v28 = vld [vmem:[%s3958_s2 + $0xc0] sm:$0xff]   ;;  %vm3407_vm2 = vmand %vm347_vm0, %vm348_vm1  ;;  %vm614_vm12 = vsmask.f32 3328  ;;  %vm615_vm13 = vsmask.f32 7440 }
  0x17   : > { %2801 = vmatprep.subr.bf16.mxu0 %v3059_v10  ;;  %v3074_v25 = vld [vmem:[%s3958_s2 + $0x88] sm:$0xff]   ;;  %v3078_v29 = vld [vmem:[%s3958_s2 + $0x80] sm:$0xff]   ;;  %vm3417_vm4 = vmand %vm347_vm0, %vm368_vm3  ;;  %v339_v57 = vstv %s3400_s25  ;;  %p3641_p8 = scmp.lt.s32.totalorder %s320_s24, 15  ;;  %p342_p9 = scmp.eq.s32.totalorder %s3197_s15, 3 }
  0x18   : > { %2842 = vmatpush3.bf16.msra.mxu1 %v3058_v9  ;;  %v3075_v26 = vld [vmem:[%s3958_s2 + $0x48] sm:$0xff]   ;;  %v3079_v30 = vld [vmem:[%s3958_s2 + $0x40] sm:$0xff]   ;;  %v3084_v54 = vld [vmem:[%s3958_s2 + $0x1f8] sm:$0xff]   ;;  %vm340_vm5 = vcmp.eq.s32.totalorder %v339_v57, 1  ;;  %p228_p10 = scmp.lt.s32.totalorder %s3314_s29, 15  ;;  %s2570_s9 = sshll.u32 %s3997_s16, 5 }
  0x19   : > { %2843 = vmatprep.subr.bf16.mxu1 %v3061_v12  ;;  %v3076_v27 = vld [vmem:[%s3958_s2 + $0x8] sm:$0xff]   ;;  %v3390_v31 = vld [vmem:[%s3957_s1] ss:$0 sm:$0xff]  ;;  %v3396_v33 = vld [vmem:[%s3957_s1 + $0x1] ss:$0 sm:$0xff]  ;;  %s4001_s24 = smov (!%p3641_p8, %s320_s24), 15 }
  0x1a   : > { %2802 = vmatpush3.bf16.msra.mxu0 %v3060_v11  ;;  %v2748_v32 = vld [vmem:[%s3377_s8] sm:$0xff]   ;;  %v353_v42 = vld [vmem:[#allocation2 + $0xc] sm:$0x1]  ;;  %v370_v47 = vld [vmem:[#allocation2 + $0x8] sm:$0x1]  ;;  %s2730_s6 = sshll.u32 %s4001_s24, 3 }
  0x1b   : > { %2803 = vmatprep.subr.bf16.mxu0 %v3063_v14  ;;  %v2749_v34 = vunpack.c.l.bf16 %v2748_v32  ;;  %v2750_v35 = vunpack.c.h.bf16 %v2748_v32  ;;  %v2764_v36 = vld [vmem:[%s308_s10] sm:$0xff]   ;;  %v354_v50 = vsel %vm3407_vm2, 0, %v353_v42  ;;  %v371_v53 = vsel %vm3417_vm4, 0, %v370_v47  ;;  %v3089_v60 = vld [vmem:[%s3958_s2 + $0x178] sm:$0xff]   ;;  %v2791_v12 = vld [vmem:[%s3377_s8 + $0x8] sm:$0xff]   ;;  %s325_s24 = scalar_lea.vmem %s3368_s27, %s2730_s6  ;;  %s4003_s29 = smov (!%p228_p10, %s3314_s29), 15 }
  0x1c   : > { %2844 = vmatpush3.bf16.msra.mxu1 %v3062_v13  ;;  %v3083_v37 = vld [vmem:[%s3958_s2] sm:$0xff]   ;;  %v2765_v38 = vunpack.c.l.bf16 %v2764_v36  ;;  %v2766_v39 = vunpack.c.h.bf16 %v2764_v36  ;;  %355 = vst [vmem:[#allocation2 + $0xc] sm:$0x1] %v354_v50  ;;  %372 = vst [vmem:[#allocation2 + $0x8] sm:$0x1] %v371_v53  ;;  %s2569_s7 = sshll.u32 %s4003_s29, 1 }
  0x1d   : > { %2845 = vmatprep.subr.bf16.mxu1 %v3065_v16  ;;  %v350_v41 = vld [vmem:[#allocation2] sm:$0x1]  ;;  %v271_v43 = vmul.f32 %v2749_v34, %v3390_v31  ;;  %v272_v44 = vmul.f32 %v2750_v35, %v3390_v31  ;;  %v356_v13 = vld [vmem:[#allocation2 + $0x18] sm:$0x1]  ;;  %v373_v14 = vld [vmem:[#allocation2 + $0x14] sm:$0x1]  ;;  %s3906_s11 = sadd.s32 %s2570_s9, %s2569_s7 }
  0x1e   : > { %2804 = vmatpush3.bf16.msra.mxu0 %v3064_v15  ;;  %v351_v45 = vsel %vm3407_vm2, 0, %v350_v41  ;;  %v313_v48 = vmul.f32 %v2765_v38, %v3390_v31  ;;  %v314_v49 = vmul.f32 %v2766_v39, %v3390_v31  ;;  %vm3443_vm8 = vmand %vm415_vm7, %vm368_vm3  ;;  %v357_v34 = vsel %vm3407_vm2, 0, %v356_v13  ;;  %v359_v53 = vld [vmem:[#allocation2 + $0x24] sm:$0x1]  ;;  %s343_s30 = scalar_select %p342_p9, 1, 0 }
  0x1f   : > { %2805 = vmatprep.subr.bf16.mxu0 %v3067_v18  ;;  %352 = vst [vmem:[#allocation2] sm:$0x1] %v351_v45  ;;  %v283_v51 = vadd.f32 %v3396_v33, %v271_v43  ;;  %v284_v52 = vadd.f32 %v3396_v33, %v272_v44  ;;  %vm3450_vm9 = vmor %vm348_vm1, %vm393_vm6  ;;  %v374_v35 = vsel %vm3417_vm4, 0, %v373_v14  ;;  %s2571_s29 = sshll.u32 %s3906_s11, 2  ;;  %p238_p11 = scmp.lt.s32.totalorder %s3197_s15, 3 }
  0x20   : > { %2846 = vmatpush3.bf16.msra.mxu1 %v3066_v17  ;;  %v315_v55 = vadd.f32 %v3396_v33, %v313_v48  ;;  %v316_v56 = vadd.f32 %v3396_v33, %v314_v49  ;;  %358 = vst [vmem:[#allocation2 + $0x18] sm:$0x1] %v357_v34  ;;  %375 = vst [vmem:[#allocation2 + $0x14] sm:$0x1] %v374_v35  ;;  %s3926_s13 = scalar_lea.vmem %s3959_s3, %s2571_s29  ;;  %s2572_s14 = sshll.u32 %s3997_s16, 2 }
  0x21   : > { %2847 = vmatprep.subr.bf16.mxu1 %v3069_v20  ;;  %v291_v58 = vmax.f32 %v283_v51, 0.0  ;;  %v292_v59 = vmax.f32 %v284_v52, 0.0  ;;  %v2792_v52 = vld [vmem:[%s3377_s8 + $0x10] sm:$0xff]   ;;  %vm3483_vm14 = vmor %vm753_vm10, %vm754_vm11  ;;  %s4005_s15 = smov (!%p238_p11, %s3197_s15), 3 }
  0x22   : > { %2806 = vmatpush3.bf16.msra.mxu0 %v3068_v19  ;;  %v317_v61 = vmax.f32 %v315_v55, 0.0  ;;  %v318_v62 = vmax.f32 %v316_v56, 0.0  ;;  %v2758_v55 = vunpack.c.h.bf16 %v2792_v52  ;;  %v360_v56 = vsel %vm3407_vm2, 0, %v359_v53  ;;  %vm3506_vm15 = vmor %vm614_vm12, %vm615_vm13 }
  0x23   : > { %2807 = vmatprep.subr.bf16.mxu0 %v3071_v22  ;;  %v2731_v63 = vpack.c.bf16 %v291_v58, %v291_v58  ;;  %v2732_v0 = vpack.c.bf16 %v292_v59, %v292_v59  ;;  %v558_v11 = vld [vmem:[#allocation2 + $0xc] sm:$0xf]  ;;  %361 = vst [vmem:[#allocation2 + $0x24] sm:$0x1] %v360_v56 }
  0x24   : > { %2848 = vmatpush3.bf16.msra.mxu1 %v3070_v21  ;;  %v319_v1 = vpack.c.bf16 %v318_v62, %v317_v61  ;;  %v421_v21 = vld [vmem:[#allocation2 + $0x8] sm:$0x1] }
  0x25   : > { %2849 = vmatprep.subr.bf16.mxu1 %v3073_v24  ;;  %v478_v2 = vshrl.u32 %v2731_v63, 16  ;;  %v486_v3 = vshrl.u32 %v2732_v0, 16  ;;  %v481_v5 = vshll.u32 %v2731_v63, 16  ;;  %v489_v6 = vshll.u32 %v2732_v0, 16 }
  0x26   : > { %2808 = vmatpush3.bf16.msra.mxu0 %v3072_v23  ;;  %v341_v4 = vsel %vm340_vm5, 0, %v319_v1  ;;  %v417_v20 = vld [vmem:[#allocation2] sm:$0xf] }
  0x27   : > { %2809 = vmatprep.subr.bf16.mxu0 %v3075_v26  ;;  %v2584_v7 = vcombine.low %v341_v4, %v341_v4  ;;  %v2585_v8 = vcombine.high %v341_v4, %v341_v4  ;;  %v480_v9 = vrot.slane %v478_v2, 7  ;;  %v3438_v10 = vrot.slane %v486_v3, 7  ;;  %v562_v61 = vld [vmem:[#allocation2 + $0x14] sm:$0x1] }
  0x28   : > { %2850 = vmatpush3.bf16.msra.mxu1 %v3074_v25 }
  0x29   : > { %2851 = vmatprep.subr.bf16.mxu1 %v3077_v28  ;;  %v396_v15 = vshrl.u32 %v2584_v7, 16  ;;  %v399_v16 = vshll.u32 %v2584_v7, 16  ;;  %v404_v17 = vshrl.u32 %v2585_v8, 16  ;;  %v407_v18 = vshll.u32 %v2585_v8, 16 }
  0x2a   : > { %2810 = vmatpush3.bf16.msra.mxu0 %v3076_v27  ;;  %v483_v22 = vor.u32 %v481_v5, %v480_v9  ;;  %v484_v23 = vrot.slane %v480_v9, 4  ;;  %v491_v24 = vor.u32 %v489_v6, %v3438_v10  ;;  %v2753_v28 = vunpack.c.l.bf16 %v2791_v12 }
  0x2b   : > { %2811 = vmatprep.subr.bf16.mxu0 %v3079_v30  ;;  %v398_v26 = vrot.slane %v396_v15, 7  ;;  %v406_v27 = vrot.slane %v404_v17, 7  ;;  %v493_v49 = vrot.slane %v3438_v10, 4  ;;  %v276_v9 = vmul.f32 %v2758_v55, %v3390_v31 }
  0x2c   : > { %2852 = vmatpush3.bf16.msra.mxu1 %v3078_v29  ;;  %v2754_v29 = vunpack.c.h.bf16 %v2791_v12  ;;  %v492_v30 = vsel %vm3450_vm9, %v484_v23, %v491_v24  ;;  %v559_v32 = vsel %vm3443_vm8, %v483_v22, %v558_v11  ;;  %v273_v41 = vmul.f32 %v2753_v28, %v3390_v31 }
  0x2d   : > { %2917 = vmatprep.subr.bf16.mxu1 %v3084_v54  ;;  %v401_v36 = vor.u32 %v399_v16, %v398_v26  ;;  %v409_v38 = vor.u32 %v407_v18, %v406_v27  ;;  %v411_v39 = vrot.slane %v406_v27, 4  ;;  %560 = vst [vmem:[#allocation2 + $0xc] sm:$0xf] %v559_v32  ;;  %561 = vst [vmem:[#allocation2 + $0x10] sm:$0xf] %v492_v30  ;;  %v2757_v54 = vunpack.c.l.bf16 %v2792_v52 }
  0x2e   : > { %2812 = vmatpush3.bf16.msra.mxu0 %v3083_v37  ;;  %v402_v37 = vrot.slane %v398_v26, 4  ;;  %v274_v42 = vmul.f32 %v2754_v29, %v3390_v31  ;;  %v285_v47 = vadd.f32 %v3396_v33, %v273_v41  ;;  %v563_v62 = vsel %vm3407_vm2, %v493_v49, %v562_v61  ;;  %v565_v18 = vld [vmem:[#allocation2 + $0x18] sm:$0xf] }
  0x2f   : > { %2877 = vmatprep.subr.bf16.mxu0 %v3089_v60  ;;  %v418_v44 = vsel %vm3443_vm8, %v401_v36, %v417_v20  ;;  %v422_v45 = vsel %vm3407_vm2, %v411_v39, %v421_v21  ;;  %v275_v63 = vmul.f32 %v2757_v54, %v3390_v31  ;;  %564 = vst [vmem:[#allocation2 + $0x14] sm:$0x1] %v563_v62 }
  0x30   : > { %v410_v43 = vsel %vm3450_vm9, %v402_v37, %v409_v38  ;;  %419 = vst [vmem:[#allocation2] sm:$0xf] %v418_v44  ;;  %423 = vst [vmem:[#allocation2 + $0x8] sm:$0x1] %v422_v45  ;;  %v286_v48 = vadd.f32 %v3396_v33, %v274_v42  ;;  %v293_v50 = vmax.f32 %v285_v47, 0.0  ;;  %v3498_v41 = vadd.f32 %v3396_v33, %v276_v9 }
  0x31   : > { %420 = vst [vmem:[#allocation2 + $0x4] sm:$0xf] %v410_v43  ;;  %v3491_v22 = vadd.f32 %v3396_v33, %v275_v63 }
  0x32   : > { %v294_v51 = vmax.f32 %v286_v48, 0.0  ;;  %v2733_v59 = vpack.c.bf16 %v293_v50, %v293_v50 }
  0x34   : > { %v800_v57 = vld [vmem:[#allocation2 + $0xc] sm:$0xf]  ;;  %v801_v58 = vld [vmem:[#allocation2 + $0x10] sm:$0xf]  ;;  %v3476_v60 = vpack.c.bf16 %v294_v51, %v294_v51  ;;  %v495_v1 = vshrl.u32 %v2733_v59, 16  ;;  %v498_v2 = vshll.u32 %v2733_v59, 16 }
  0x35   : > { %808 = vst [vmem:[#allocation3 + $0xc] sm:$0xf] %v800_v57  ;;  %809 = vst [vmem:[#allocation3 + $0x30] sm:$0xf] %v801_v58  ;;  %v588_v5 = vld [vmem:[#allocation2 + $0xc] sm:$0xf] }
  0x36   : > { %v503_v3 = vshrl.u32 %v3476_v60, 16  ;;  %v506_v4 = vshll.u32 %v3476_v60, 16  ;;  %596 = vst [vmem:[#allocation3 + $0x48] sm:$0xf] %v588_v5  ;;  %v497_v14 = vrot.slane %v495_v1, 7 }
  0x37   : > { %v729_v6 = vld [vmem:[#allocation2] sm:$0xe]  ;;  %v731_v8 = vld [vmem:[#allocation2 + $0x8] sm:$0x1]  ;;  %v732_v20 = vld [vmem:[#allocation2 + $0xc] sm:$0xe] }
  0x38   : > { %v730_v7 = vld [vmem:[#allocation2 + $0x4] sm:$0xf]  ;;  %v2596_v10 = vrot.slane %v729_v6, 9  ;;  %v761_v12 = vrot.slane %v731_v8, 5  ;;  %v586_v13 = vld [vmem:[#allocation2] sm:$0xf]  ;;  %v500_v34 = vor.u32 %v498_v2, %v497_v14 }
  0x39   : > { %v758_v11 = vrot.slane %v730_v7, 5  ;;  %v587_v15 = vld [vmem:[#allocation2 + $0x4] sm:$0xf]  ;;  %594 = vst [vmem:[#allocation3] sm:$0xf] %v586_v13  ;;  %v501_v44 = vrot.slane %v497_v14, 4 }
  0x3a   : > { %v602_v16 = vld [vmem:[#allocation2] sm:$0xf]  ;;  %v603_v17 = vld [vmem:[#allocation2 + $0x4] sm:$0xf]  ;;  %v733_v21 = vld [vmem:[#allocation2 + $0x10] sm:$0xf]  ;;  %v566_v49 = vsel %vm3443_vm8, %v500_v34, %v565_v18 }
  0x3b   : > { %v759_v23 = vsel %vm3483_vm14, %v2596_v10, %v758_v11  ;;  %v760_v24 = vrot.slane %v758_v11, 4  ;;  %595 = vst [vmem:[#allocation3 + $0x24] sm:$0xf] %v587_v15  ;;  %v604_v26 = vld [vmem:[#allocation2 + $0x8] sm:$0x1]  ;;  %v618_v27 = vshrl.u32 %v602_v16, 16 }
  0x3c   : > { %v621_v28 = vshll.u32 %v602_v16, 16  ;;  %792 = vst [vmem:[#allocation3 + $0x8] sm:$0xf] %v759_v23  ;;  %v627_v29 = vshll.u32 %v603_v17, 16  ;;  %v631_v30 = vshrl.u32 %v603_v17, 16  ;;  %v637_v32 = vshll.u32 %v604_v26, 16 }
  0x3d   : > { %v589_v35 = vld [vmem:[#allocation2 + $0x10] sm:$0xf]  ;;  %v762_v36 = vsel %vm3483_vm14, %v760_v24, %v761_v12  ;;  %v620_v37 = vrot.slane %v618_v27, 4  ;;  %v605_v39 = vld [vmem:[#allocation2 + $0xc] sm:$0xf]  ;;  %v3500_v45 = vrot.slane %v503_v3, 7 }
  0x3e   : > { %v623_v38 = vrot.slane %v621_v28, 5  ;;  %597 = vst [vmem:[#allocation3 + $0x6c] sm:$0xf] %v589_v35  ;;  %793 = vst [vmem:[#allocation3 + $0x2c] sm:$0xf] %v762_v36  ;;  %v629_v42 = vrot.slane %v627_v29, 5 }
  0x3f   : > { %v633_v43 = vrot.slane %v631_v30, 4  ;;  %v734_v47 = vld [vmem:[#allocation2 + $0x14] sm:$0x1]  ;;  %v2597_v50 = vrot.slane %v732_v20, 9  ;;  %v765_v51 = vrot.slane %v733_v21, 5  ;;  %v639_v55 = vrot.slane %v637_v32, 5 }
  0x40   : > { %v624_v48 = vor.u32 %v623_v38, %v620_v37  ;;  %v606_v52 = vld [vmem:[#allocation2 + $0x10] sm:$0xf]  ;;  %v508_v56 = vor.u32 %v506_v4, %v3500_v45  ;;  %567 = vst [vmem:[#allocation2 + $0x18] sm:$0xf] %v566_v49  ;;  %v768_v57 = vrot.slane %v734_v47, 5  ;;  %v642_v62 = vshrl.u32 %v605_v39, 16 }
  0x41   : > { %v634_v54 = vor.u32 %v633_v43, %v629_v42  ;;  %v607_v58 = vld [vmem:[#allocation2 + $0x14] sm:$0x1]  ;;  %v766_v60 = vsel %vm3483_vm14, %v2597_v50, %v765_v51  ;;  %v767_v61 = vrot.slane %v765_v51, 4  ;;  %v645_v2 = vshll.u32 %v605_v39, 16  ;;  %v376_v5 = vld [vmem:[#allocation2 + $0x20] sm:$0x1] }
  0x42   : > { %v625_v59 = vrot.slane %v624_v48, 4  ;;  %v509_v1 = vsel %vm3450_vm9, %v501_v44, %v508_v56  ;;  %794 = vst [vmem:[#allocation3 + $0x50] sm:$0xf] %v766_v60  ;;  %v651_v3 = vshll.u32 %v606_v52, 16  ;;  %v3085_v4 = vld [vmem:[%s3958_s2 + $0x1b8] sm:$0xff]   ;;  %v644_v8 = vrot.slane %v642_v62, 4 }
  0x43   : > { %v635_v63 = vrot.slane %v634_v54, 4  ;;  %568 = vst [vmem:[#allocation2 + $0x1c] sm:$0xf] %v509_v1  ;;  %v769_v7 = vsel %vm3483_vm14, %v767_v61, %v768_v57  ;;  %v655_v9 = vshrl.u32 %v606_v52, 16  ;;  %v3091_v11 = vld [vmem:[%s3958_s2 + $0x1f0] sm:$0xff]   ;;  %v647_v12 = vrot.slane %v645_v2, 5 }
  0x44   : > { %v630_v6 = vsel %vm3506_vm15, %v625_v59, %v629_v42  ;;  %795 = vst [vmem:[#allocation3 + $0x74] sm:$0xf] %v769_v7  ;;  %v653_v13 = vrot.slane %v651_v3, 5  ;;  %v661_v14 = vshll.u32 %v607_v58, 16  ;;  %v3082_v16 = vld [vmem:[#allocation3 + $0xc] ss:$36 sps:$4 sm:$0xff]  }
  0x45   : > { %v640_v10 = vsel %vm3506_vm15, %v635_v63, %v639_v55  ;;  %721 = vst [vmem:[#allocation3 + $0x4] sm:$0xf] %v630_v6  ;;  %v3080_v15 = vld [vmem:[#allocation3 + $0x8] ss:$36 sps:$4 sm:$0xff]   ;;  %v657_v17 = vrot.slane %v655_v9, 4  ;;  %v648_v18 = vor.u32 %v647_v12, %v644_v8  ;;  %v295_v21 = vmax.f32 %v3491_v22, 0.0  ;;  %2114 = vmatprep.mubr.bf16.mxu1 %v3082_v16 }
  0x46   : > { %722 = vst [vmem:[#allocation3 + $0x28] sm:$0xf] %v640_v10  ;;  %v663_v20 = vrot.slane %v661_v14, 5  ;;  %v296_v23 = vmax.f32 %v3498_v41, 0.0  ;;  %v2793_v24 = vld [vmem:[%s3377_s8 + $0x18] sm:$0xff]   ;;  %v3092_v26 = vld [vmem:[%s3958_s2 + $0x1b0] sm:$0xff]   ;;  %2115 = vmatmul.mubr.bf16.vlgmr.msra.gmra.mxu1 %v3080_v15  ;;  %s241_s8 = sadd.s32 %s2572_s14, %s4005_s15 }
  0x47   : > { %v802_v27 = vld [vmem:[#allocation2 + $0x18] sm:$0xf]  ;;  %v658_v28 = vor.u32 %v657_v17, %v653_v13  ;;  %v377_v29 = vsel %vm3417_vm4, 0, %v376_v5  ;;  %v2761_v32 = vunpack.c.l.bf16 %v2793_v24  ;;  %v2762_v34 = vunpack.c.h.bf16 %v2793_v24  ;;  %2918 = vmatpush3.bf16.msra.mxu1 %v3085_v4  ;;  %v3095_v52 = vld [vmem:[%s3958_s2 + $0x170] sm:$0xff]   ;;  %v3099_v54 = vld [vmem:[%s3958_s2 + $0x1a8] sm:$0xff]   ;;  %s2573_s23 = sshll.u32 %s241_s8, 1 }
  0x48   : > { %v735_v30 = vld [vmem:[#allocation2 + $0x18] sm:$0xe]  ;;  %v510_v35 = vrot.slane %v3500_v45, 4  ;;  %810 = vst [vmem:[#allocation3 + $0x54] sm:$0xf] %v802_v27  ;;  %v649_v22 = vrot.slane %v648_v18, 4  ;;  %v2735_v36 = vpack.c.bf16 %v295_v21, %v295_v21  ;;  %v2736_v37 = vpack.c.bf16 %v296_v23, %v296_v23  ;;  %2919 = vmatprep.subr.bf16.mxu1 %v3091_v11  ;;  %s243_s26 = scalar_lea.vmem %s3960_s4, %s2573_s23 }
  0x49   : > { %378 = vst [vmem:[#allocation2 + $0x20] sm:$0x1] %v377_v29  ;;  %v590_v38 = vld [vmem:[#allocation2 + $0x18] sm:$0xf]  ;;  %v659_v39 = vrot.slane %v658_v28, 4  ;;  %v2598_v41 = vrot.slane %v735_v30, 9  ;;  %v277_v43 = vmul.f32 %v2761_v32, %v3390_v31  ;;  %v278_v60 = vmul.f32 %v2762_v34, %v3390_v31 }
  0x4a   : > { %598 = vst [vmem:[#allocation3 + $0x90] sm:$0xf] %v590_v38  ;;  %v608_v42 = vld [vmem:[#allocation2 + $0x18] sm:$0xf]  ;;  %v803_v47 = vld [vmem:[#allocation2 + $0x1c] sm:$0xf]  ;;  %v654_v48 = vsel %vm3506_vm15, %v649_v22, %v653_v13 }
  0x4b   : > { %v3090_v44 = vld [vmem:[%s3958_s2 + $0x138] sm:$0xff]   ;;  %v3098_v45 = vld [vmem:[%s3958_s2 + $0x1e8] sm:$0xff]   ;;  %v512_v49 = vshrl.u32 %v2735_v36, 16  ;;  %v515_v50 = vshll.u32 %v2735_v36, 16  ;;  %v520_v51 = vshrl.u32 %v2736_v37, 16  ;;  %v664_v55 = vsel %vm3506_vm15, %v659_v39, %v663_v20  ;;  %2920 = vmatpush3.bf16.msra.mxu1 %v3092_v26  ;;  %v3105_v31 = vld [vmem:[%s3958_s2 + $0x1e0] sm:$0xff]  }
  0x4c   : > { %811 = vst [vmem:[#allocation3 + $0x78] sm:$0xf] %v803_v47  ;;  %723 = vst [vmem:[#allocation3 + $0x4c] sm:$0xf] %v654_v48  ;;  %v523_v56 = vshll.u32 %v2736_v37, 16  ;;  %v289_v1 = vadd.f32 %v3396_v33, %v277_v43  ;;  %v666_v4 = vshrl.u32 %v608_v42, 16  ;;  %2921 = vmatprep.subr.bf16.mxu1 %v3098_v45  ;;  %v290_v15 = vadd.f32 %v3396_v33, %v278_v60 }
  0x4d   : > { %v572_v57 = vld [vmem:[#allocation2 + $0x24] sm:$0xf]  ;;  %v3553_v58 = vld [vmem:[#allocation2 + $0x1c] sm:$0xf]  ;;  %v3086_v61 = vld [vmem:[#allocation3] ss:$36 sps:$4 sm:$0xff]  }
  0x4e   : > { %v591_v59 = vld [vmem:[#allocation2 + $0x1c] sm:$0xf]  ;;  %v3088_v62 = vld [vmem:[#allocation3 + $0x4] ss:$36 sps:$4 sm:$0xff]   ;;  %724 = vst [vmem:[#allocation3 + $0x70] sm:$0xf] %v664_v55 }
  0x4f   : > { %v514_v63 = vrot.slane %v512_v49, 7  ;;  %599 = vst [vmem:[#allocation3 + $0xb4] sm:$0xf] %v591_v59  ;;  %v3557_v2 = vrot.slane %v520_v51, 7  ;;  %v772_v3 = vrot.slane %v3553_v58, 5  ;;  %v669_v6 = vshll.u32 %v608_v42, 16  ;;  %2049 = vmatprep.mubr.bf16.mxu0 %v3088_v62  ;;  %2922 = vmatpush3.bf16.msra.mxu1 %v3099_v54 }
  0x50   : > { %v609_v5 = vld [vmem:[#allocation2 + $0x1c] sm:$0xf]  ;;  %2050 = vmatmul.mubr.bf16.vlgmr.msra.gmra.mxu0 %v3086_v61  ;;  %v3097_v11 = vld [vmem:[%s3958_s2 + $0x130] sm:$0xff]   ;;  %v569_v13 = vld [vmem:[#allocation2 + $0x20] sm:$0x1]  ;;  %v668_v21 = vrot.slane %v666_v4, 4  ;;  %2923 = vmatprep.subr.bf16.mxu1 %v3105_v31 }
  0x51   : > { %v517_v7 = vor.u32 %v515_v50, %v514_v63  ;;  %v518_v8 = vrot.slane %v514_v63, 4  ;;  %v675_v9 = vshll.u32 %v609_v5, 16  ;;  %v679_v10 = vshrl.u32 %v609_v5, 16  ;;  %2878 = vmatpush3.bf16.msra.mxu0 %v3090_v44  ;;  %v3102_v16 = vld [vmem:[%s3958_s2 + $0x168] sm:$0xff]   ;;  %v3106_v17 = vld [vmem:[%s3958_s2 + $0x1a0] sm:$0xff]   ;;  %v3112_v24 = vld [vmem:[%s3958_s2 + $0x1d8] sm:$0xff]  }
  0x52   : > { %v525_v12 = vor.u32 %v523_v56, %v3557_v2  ;;  %v773_v14 = vsel %vm3483_vm14, %v2598_v41, %v772_v3  ;;  %v570_v18 = vsel %vm3407_vm2, %v510_v35, %v569_v13  ;;  %v671_v23 = vrot.slane %v669_v6, 5  ;;  %2879 = vmatprep.subr.bf16.mxu0 %v3095_v52  ;;  %v3096_v29 = vld [vmem:[#allocation3 + $0x50] ss:$36 sps:$4 sm:$0xff]   ;;  %v3104_v30 = vld [vmem:[%s3958_s2 + $0x128] sm:$0xff]   ;;  %v3103_v37 = vld [vmem:[#allocation3 + $0x48] ss:$36 sps:$4 sm:$0xff]  }
  0x53   : > { %v573_v20 = vsel %vm3443_vm8, %v517_v7, %v572_v57  ;;  %796 = vst [vmem:[#allocation3 + $0x98] sm:$0xf] %v773_v14  ;;  %571 = vst [vmem:[#allocation2 + $0x20] sm:$0x1] %v570_v18  ;;  %v677_v26 = vrot.slane %v675_v9, 5  ;;  %v681_v27 = vrot.slane %v679_v10, 4  ;;  %2924 = vmatpush3.bf16.msra.mxu1 %v3106_v17 }
  0x54   : > { %v526_v33 = vsel %vm3450_vm9, %v518_v8, %v525_v12  ;;  %574 = vst [vmem:[#allocation2 + $0x24] sm:$0xf] %v573_v20  ;;  %v3093_v28 = vld [vmem:[#allocation3 + $0x54] ss:$36 sps:$4 sm:$0xff]   ;;  %v672_v32 = vor.u32 %v671_v23, %v668_v21  ;;  %v297_v34 = vmax.f32 %v289_v1, 0.0  ;;  %v298_v36 = vmax.f32 %v290_v15, 0.0  ;;  %2925 = vmatprep.subr.bf16.mxu1 %v3112_v24 }
  0x55   : > { %575 = vst [vmem:[#allocation2 + $0x28] sm:$0xf] %v526_v33  ;;  %v3100_v35 = vld [vmem:[#allocation3 + $0x4c] ss:$36 sps:$4 sm:$0xff]   ;;  %v682_v22 = vor.u32 %v681_v27, %v677_v26  ;;  %2122 = vmatprep.mubr.bf16.mxu1 %v3093_v28  ;;  %2880 = vmatpush3.bf16.msra.mxu0 %v3097_v11  ;;  %v3109_v38 = vld [vmem:[%s3958_s2 + $0x160] sm:$0xff]   ;;  %v774_v42 = vrot.slane %v772_v3, 4 }
  0x56   : > { %v673_v39 = vrot.slane %v672_v32, 4  ;;  %v2737_v41 = vpack.c.bf16 %v297_v34, %v297_v34  ;;  %2123 = vmatmul.mubr.bf16.gmra.mxu1 %v3096_v29  ;;  %2057 = vmatprep.mubr.bf16.mxu0 %v3100_v35  ;;  %v3113_v43 = vld [vmem:[%s3958_s2 + $0x198] sm:$0xff]   ;;  %v362_v44 = vld [vmem:[#allocation2 + $0x30] sm:$0x1]  ;;  %v2738_v47 = vpack.c.bf16 %v298_v36, %v298_v36  ;;  %v3111_v45 = vld [vmem:[%s3958_s2 + $0x120] sm:$0xff]   ;;  %v527_v15 = vrot.slane %v3557_v2, 4 }
  0x57   : > { %2881 = vmatprep.subr.bf16.mxu0 %v3102_v16  ;;  %v683_v49 = vrot.slane %v682_v22, 4  ;;  %v3119_v50 = vld [vmem:[%s3958_s2 + $0x1d0] sm:$0xff]   ;;  %v363_v51 = vsel %vm3407_vm2, 0, %v362_v44  ;;  %v379_v52 = vld [vmem:[#allocation2 + $0x2c] sm:$0x1]  ;;  %v3116_v55 = vld [vmem:[%s3958_s2 + $0x158] sm:$0xff]   ;;  %2926 = vmatpush3.bf16.msra.mxu1 %v3113_v43 }
  0x58   : > { %v678_v48 = vsel %vm3506_vm15, %v673_v39, %v677_v26  ;;  %v529_v54 = vshrl.u32 %v2737_v41, 16  ;;  %2058 = vmatmul.mubr.bf16.gmra.mxu0 %v3103_v37  ;;  %364 = vst [vmem:[#allocation2 + $0x30] sm:$0x1] %v363_v51  ;;  %v380_v56 = vsel %vm3417_vm4, 0, %v379_v52  ;;  %v532_v57 = vshll.u32 %v2737_v41, 16  ;;  %v3120_v63 = vld [vmem:[%s3958_s2 + $0x190] sm:$0xff]   ;;  %2927 = vmatprep.subr.bf16.mxu1 %v3119_v50 }
  0x59   : > { %725 = vst [vmem:[#allocation3 + $0x94] sm:$0xf] %v678_v48  ;;  %v537_v58 = vshrl.u32 %v2738_v47, 16  ;;  %v540_v59 = vshll.u32 %v2738_v47, 16  ;;  %2882 = vmatpush3.bf16.msra.mxu0 %v3104_v30  ;;  %381 = vst [vmem:[#allocation2 + $0x2c] sm:$0x1] %v380_v56 }
  0x5a   : > { %v737_v60 = vld [vmem:[#allocation2 + $0x20] sm:$0x1]  ;;  %2883 = vmatprep.subr.bf16.mxu0 %v3109_v38  ;;  %v531_v4 = vrot.slane %v529_v54, 7  ;;  %v3126_v31 = vld [vmem:[%s3958_s2 + $0x1c8] sm:$0xff]   ;;  %v3118_v7 = vld [vmem:[%s3958_s2 + $0x118] sm:$0xff]  }
  0x5b   : > { %v804_v61 = vld [vmem:[#allocation2 + $0x24] sm:$0xf]  ;;  %v610_v62 = vld [vmem:[#allocation2 + $0x20] sm:$0x1]  ;;  %v775_v1 = vrot.slane %v737_v60, 5  ;;  %v3613_v6 = vrot.slane %v537_v58, 7  ;;  %2928 = vmatpush3.bf16.msra.mxu1 %v3120_v63 }
  0x5c   : > { %v805_v3 = vld [vmem:[#allocation2 + $0x28] sm:$0xf]  ;;  %812 = vst [vmem:[#allocation3 + $0x9c] sm:$0xf] %v804_v61  ;;  %v685_v5 = vshll.u32 %v610_v62, 16  ;;  %v534_v12 = vor.u32 %v532_v57, %v531_v4  ;;  %v535_v13 = vrot.slane %v531_v4, 4  ;;  %2929 = vmatprep.subr.bf16.mxu1 %v3126_v31 }
  0x5d   : > { %813 = vst [vmem:[#allocation3 + $0xc0] sm:$0xf] %v805_v3  ;;  %v738_v8 = vld [vmem:[#allocation2 + $0x24] sm:$0xe]  ;;  %v3621_v9 = vld [vmem:[#allocation2 + $0x28] sm:$0xf]  ;;  %v776_v10 = vsel %vm3483_vm14, %v774_v42, %v775_v1  ;;  %2884 = vmatpush3.bf16.msra.mxu0 %v3111_v45  ;;  %v542_v16 = vor.u32 %v540_v59, %v3613_v6 }
  0x5e   : > { %v687_v11 = vrot.slane %v685_v5, 5  ;;  %v3123_v14 = vld [vmem:[%s3958_s2 + $0x150] sm:$0xff]   ;;  %797 = vst [vmem:[#allocation3 + $0xbc] sm:$0xf] %v776_v10  ;;  %v2599_v17 = vrot.slane %v738_v8, 9  ;;  %v779_v18 = vrot.slane %v3621_v9, 5  ;;  %2885 = vmatprep.subr.bf16.mxu0 %v3116_v55 }
  0x5f   : > { %v3127_v20 = vld [vmem:[%s3958_s2 + $0x188] sm:$0xff]   ;;  %v3133_v23 = vld [vmem:[%s3958_s2 + $0x1c0] sm:$0xff]   ;;  %v543_v2 = vsel %vm3450_vm9, %v535_v13, %v542_v16  ;;  %v579_v33 = vld [vmem:[#allocation2 + $0x30] sm:$0xf] }
  0x60   : > { %v688_v21 = vsel %vm3506_vm15, %v683_v49, %v687_v11  ;;  %v780_v24 = vsel %vm3483_vm14, %v2599_v17, %v779_v18  ;;  %v3125_v26 = vld [vmem:[%s3958_s2 + $0x110] sm:$0xff]   ;;  %v592_v27 = vld [vmem:[#allocation2 + $0x24] sm:$0xf]  ;;  %v576_v28 = vld [vmem:[#allocation2 + $0x2c] sm:$0x1]  ;;  %v580_v29 = vsel %vm3443_vm8, %v534_v12, %v579_v33  ;;  %2930 = vmatpush3.bf16.msra.mxu1 %v3127_v20  ;;  %v781_v56 = vrot.slane %v779_v18, 4 }
  0x61   : > { %726 = vst [vmem:[#allocation3 + $0xb8] sm:$0xf] %v688_v21  ;;  %582 = vst [vmem:[#allocation2 + $0x34] sm:$0xf] %v543_v2  ;;  %v593_v30 = vld [vmem:[#allocation2 + $0x28] sm:$0xf]  ;;  %2886 = vmatpush3.bf16.msra.mxu0 %v3118_v7  ;;  %v577_v34 = vsel %vm3407_vm2, %v527_v15, %v576_v28  ;;  %2931 = vmatprep.subr.bf16.mxu1 %v3133_v23 }
  0x62   : > { %798 = vst [vmem:[#allocation3 + $0xe0] sm:$0xf] %v780_v24  ;;  %600 = vst [vmem:[#allocation3 + $0xd8] sm:$0xf] %v592_v27  ;;  %v611_v32 = vld [vmem:[#allocation2 + $0x24] sm:$0xf]  ;;  %2887 = vmatprep.subr.bf16.mxu0 %v3123_v14 }
  0x63   : > { %581 = vst [vmem:[#allocation2 + $0x30] sm:$0xf] %v580_v29  ;;  %601 = vst [vmem:[#allocation3 + $0xfc] sm:$0xf] %v593_v30  ;;  %v612_v35 = vld [vmem:[#allocation2 + $0x28] sm:$0xf] }
  0x64   : > { %v690_v22 = vshrl.u32 %v611_v32, 16  ;;  %v693_v36 = vshll.u32 %v611_v32, 16  ;;  %v3130_v37 = vld [vmem:[%s3958_s2 + $0x148] sm:$0xff]   ;;  %578 = vst [vmem:[#allocation2 + $0x2c] sm:$0x1] %v577_v34  ;;  %v699_v38 = vshll.u32 %v612_v35, 16 }
  0x65   : > { %v703_v39 = vshrl.u32 %v612_v35, 16  ;;  %v3134_v41 = vld [vmem:[%s3958_s2 + $0x180] sm:$0xff]   ;;  %v3132_v48 = vld [vmem:[%s3958_s2 + $0x108] sm:$0xff]   ;;  %2888 = vmatpush3.bf16.msra.mxu0 %v3125_v26  ;;  %v3671_v52 = vld [vmem:[%s3958_s2 + $0x238] sm:$0xff]   ;;  %v544_v35 = vrot.slane %v3613_v6, 4 }
  0x66   : > { %v692_v42 = vrot.slane %v690_v22, 4  ;;  %v695_v43 = vrot.slane %v693_v36, 5  ;;  %v3107_v44 = vld [vmem:[#allocation3 + $0x9c] ss:$36 sps:$4 sm:$0xff]   ;;  %v701_v45 = vrot.slane %v699_v38, 5  ;;  %2889 = vmatprep.subr.bf16.mxu0 %v3130_v37  ;;  %2932 = vmatpush3.bf16.msra.mxu1 %v3134_v41 }
  0x67   : > { %v3110_v47 = vld [vmem:[#allocation3 + $0x98] ss:$36 sps:$4 sm:$0xff]   ;;  %v705_v50 = vrot.slane %v703_v39, 4  ;;  %2130 = vmatprep.mubr.bf16.mxu1 %v3107_v44  ;;  %v3117_v55 = vld [vmem:[#allocation3 + $0x90] ss:$36 sps:$4 sm:$0xff]   ;;  %2993 = vmatprep.subr.bf16.mxu1 %v3671_v52 }
  0x68   : > { %v696_v49 = vor.u32 %v695_v43, %v692_v42  ;;  %v3135_v51 = vld [vmem:[%s3958_s2 + $0x140] sm:$0xff]   ;;  %2131 = vmatmul.mubr.bf16.gmra.mxu1 %v3110_v47  ;;  %v807_v57 = vld [vmem:[#allocation2 + $0x34] sm:$0xf]  ;;  %v1009_v31 = vld [vmem:[#allocation2 + $0x18] sm:$0xf] }
  0x69   : > { %v3114_v54 = vld [vmem:[#allocation3 + $0x94] ss:$36 sps:$4 sm:$0xff]   ;;  %v706_v59 = vor.u32 %v705_v50, %v701_v45  ;;  %815 = vst [vmem:[#allocation3 + $0x108] sm:$0xf] %v807_v57  ;;  %2890 = vmatpush3.bf16.msra.mxu0 %v3132_v48  ;;  %1017 = vst [vmem:[#allocation3 + $0x18] sm:$0xf] %v1009_v31 }
  0x6a   : > { %v697_v58 = vrot.slane %v696_v49, 4  ;;  %2065 = vmatprep.mubr.bf16.mxu0 %v3114_v54  ;;  %v806_v60 = vld [vmem:[#allocation2 + $0x30] sm:$0xf]  ;;  %v3139_v3 = vld [vmem:[%s3958_s2 + $0x100] sm:$0xff]   ;;  %2891 = vmatprep.subr.bf16.mxu0 %v3135_v51  ;;  %v1010_v7 = vld [vmem:[#allocation2 + $0x1c] sm:$0xf] }
  0x6b   : > { %2066 = vmatmul.mubr.bf16.gmra.mxu0 %v3117_v55  ;;  %v740_v61 = vld [vmem:[#allocation2 + $0x2c] sm:$0x1]  ;;  %814 = vst [vmem:[#allocation3 + $0xe4] sm:$0xf] %v806_v60  ;;  %v707_v1 = vrot.slane %v706_v59, 4  ;;  %v3695_v50 = vld [vmem:[%s325_s24] sm:$0xff]  }
  0x6c   : > { %v613_v62 = vld [vmem:[#allocation2 + $0x2c] sm:$0x1]  ;;  %v702_v63 = vsel %vm3506_vm15, %v697_v58, %v701_v45  ;;  %v782_v5 = vrot.slane %v740_v61, 5  ;;  %v1025_v8 = vld [vmem:[#allocation2 + $0x18] sm:$0xf] }
  0x6d   : > { %v709_v4 = vshll.u32 %v613_v62, 16  ;;  %727 = vst [vmem:[#allocation3 + $0xdc] sm:$0xf] %v702_v63  ;;  %v1026_v9 = vld [vmem:[#allocation2 + $0x1c] sm:$0xf]  ;;  %v1038_v13 = vshrl.u32 %v1025_v8, 16  ;;  %2892 = vmatpush3.bf16.msra.mxu0 %v3139_v3 }
  0x6e   : > { %v783_v10 = vsel %vm3483_vm14, %v781_v56, %v782_v5  ;;  %1018 = vst [vmem:[#allocation3 + $0x3c] sm:$0xf] %v1010_v7  ;;  %v1027_v12 = vld [vmem:[#allocation2 + $0x20] sm:$0x1]  ;;  %v1041_v14 = vshll.u32 %v1025_v8, 16  ;;  %v1047_v15 = vshll.u32 %v1026_v9, 16  ;;  %2969 = vmatprep.subr.bf16.mxu0 %v3671_v52 }
  0x6f   : > { %v711_v11 = vrot.slane %v709_v4, 5  ;;  %799 = vst [vmem:[#allocation3 + $0x104] sm:$0xf] %v783_v10  ;;  %v1051_v16 = vshrl.u32 %v1026_v9, 16  ;;  %v1057_v17 = vshll.u32 %v1027_v12, 16  ;;  %v1040_v20 = vrot.slane %v1038_v13, 4 }
  0x70   : > { %v1043_v21 = vrot.slane %v1041_v14, 5  ;;  %v1049_v23 = vrot.slane %v1047_v15, 5  ;;  %v816_v26 = vld [vmem:[#allocation2 + $0xc] sm:$0xf]  ;;  %v817_v27 = vld [vmem:[#allocation2 + $0x10] sm:$0xf]  ;;  %v2769_v13 = vunpack.c.l.bf16 %v3695_v50 }
  0x71   : > { %v712_v18 = vsel %vm3506_vm15, %v707_v1, %v711_v11  ;;  %v1053_v2 = vrot.slane %v1051_v16, 4  ;;  %v1059_v24 = vrot.slane %v1057_v17, 5  ;;  %v818_v29 = vld [vmem:[#allocation2 + $0x14] sm:$0x1]  ;;  %v829_v30 = vshrl.u32 %v816_v26, 16 }
  0x72   : > { %728 = vst [vmem:[#allocation3 + $0x100] sm:$0xf] %v712_v18  ;;  %v1044_v33 = vor.u32 %v1043_v21, %v1040_v20  ;;  %v832_v32 = vshll.u32 %v816_v26, 16  ;;  %v838_v34 = vshll.u32 %v817_v27, 16  ;;  %v842_v36 = vshrl.u32 %v817_v27, 16 }
  0x73   : > { %v1054_v28 = vor.u32 %v1053_v2, %v1049_v23  ;;  %v848_v37 = vshll.u32 %v818_v29, 16  ;;  %v940_v38 = vld [vmem:[#allocation2 + $0xc] sm:$0xe]  ;;  %v831_v41 = vrot.slane %v829_v30, 4  ;;  %v941_v44 = vld [vmem:[#allocation2 + $0x10] sm:$0xf]  ;;  %v2770_v2 = vunpack.c.h.bf16 %v3695_v50 }
  0x74   : > { %v1045_v22 = vrot.slane %v1044_v33, 4  ;;  %v834_v42 = vrot.slane %v832_v32, 5  ;;  %v840_v43 = vrot.slane %v838_v34, 5  ;;  %v3121_v47 = vld [vmem:[#allocation3 + $0xe4] ss:$36 sps:$4 sm:$0xff]   ;;  %v844_v49 = vrot.slane %v842_v36, 4 }
  0x75   : > { %v1055_v39 = vrot.slane %v1054_v28, 4  ;;  %v850_v55 = vrot.slane %v848_v37, 5  ;;  %v942_v56 = vld [vmem:[#allocation2 + $0x14] sm:$0x1]  ;;  %v2600_v57 = vrot.slane %v940_v38, 9  ;;  %2138 = vmatprep.mubr.bf16.mxu1 %v3121_v47  ;;  %v966_v61 = vrot.slane %v941_v44, 5 }
  0x76   : > { %v3124_v45 = vld [vmem:[#allocation3 + $0xe0] ss:$36 sps:$4 sm:$0xff]   ;;  %v1050_v48 = vsel %vm3506_vm15, %v1045_v22, %v1049_v23  ;;  %v835_v54 = vor.u32 %v834_v42, %v831_v41  ;;  %v3131_v59 = vld [vmem:[#allocation3 + $0xd8] ss:$36 sps:$4 sm:$0xff]   ;;  %v845_v60 = vor.u32 %v844_v49, %v840_v43  ;;  %v969_v63 = vrot.slane %v942_v56, 5  ;;  %v3715_v36 = vld [vmem:[%s3958_s2 + $0x230] sm:$0xff]  }
  0x77   : > { %v1060_v51 = vsel %vm3506_vm15, %v1055_v39, %v1059_v24  ;;  %1141 = vst [vmem:[#allocation3 + $0x1c] sm:$0xf] %v1050_v48  ;;  %2139 = vmatmul.mubr.bf16.gmra.mxu1 %v3124_v45  ;;  %v1011_v1 = vld [vmem:[#allocation2 + $0x24] sm:$0xf]  ;;  %v967_v5 = vsel %vm3483_vm14, %v2600_v57, %v966_v61  ;;  %v968_v4 = vrot.slane %v966_v61, 4  ;;  %v3724_v57 = vld [vmem:[%s3958_s2 + $0x228] sm:$0xff]  }
  0x78   : > { %1142 = vst [vmem:[#allocation3 + $0x40] sm:$0xf] %v1060_v51  ;;  %v836_v62 = vrot.slane %v835_v54, 4  ;;  %v846_v3 = vrot.slane %v845_v60, 4  ;;  %v1012_v31 = vld [vmem:[#allocation2 + $0x28] sm:$0xf] }
  0x79   : > { %v3128_v58 = vld [vmem:[#allocation3 + $0xdc] ss:$36 sps:$4 sm:$0xff]   ;;  %1019 = vst [vmem:[#allocation3 + $0x60] sm:$0xf] %v1011_v1  ;;  %1000 = vst [vmem:[#allocation3 + $0x14] sm:$0xf] %v967_v5  ;;  %v970_v15 = vsel %vm3483_vm14, %v968_v4, %v969_v63 }
  0x7a   : > { %2073 = vmatprep.mubr.bf16.mxu0 %v3128_v58  ;;  %v1028_v7 = vld [vmem:[#allocation2 + $0x24] sm:$0xf]  ;;  %v841_v8 = vsel %vm3506_vm15, %v836_v62, %v840_v43  ;;  %1020 = vst [vmem:[#allocation3 + $0x84] sm:$0xf] %v1012_v31  ;;  %v1029_v9 = vld [vmem:[#allocation2 + $0x28] sm:$0xf]  ;;  %v851_v14 = vsel %vm3506_vm15, %v846_v3, %v850_v55 }
  0x7b   : > { %2074 = vmatmul.mubr.bf16.gmra.mxu0 %v3131_v59  ;;  %v1030_v10 = vld [vmem:[#allocation2 + $0x2c] sm:$0x1]  ;;  %v1062_v11 = vshrl.u32 %v1028_v7, 16  ;;  %v1065_v12 = vshll.u32 %v1028_v7, 16  ;;  %932 = vst [vmem:[#allocation3 + $0x10] sm:$0xf] %v841_v8 }
  0x7c   : > { %v1071_v16 = vshll.u32 %v1029_v9, 16  ;;  %v1075_v17 = vshrl.u32 %v1029_v9, 16  ;;  %933 = vst [vmem:[#allocation3 + $0x34] sm:$0xf] %v851_v14  ;;  %1001 = vst [vmem:[#allocation3 + $0x38] sm:$0xf] %v970_v15 }
  0x7d   : > { %v1064_v18 = vrot.slane %v1062_v11, 4  ;;  %v1067_v20 = vrot.slane %v1065_v12, 5  ;;  %v1081_v21 = vshll.u32 %v1030_v10, 16  ;;  %v819_v23 = vld [vmem:[#allocation2 + $0x18] sm:$0xf]  ;;  %v3734_v9 = vld [vmem:[%s3958_s2 + $0x220] sm:$0xff]  }
  0x7e   : > { %v1073_v33 = vrot.slane %v1071_v16, 5  ;;  %v1077_v24 = vrot.slane %v1075_v17, 4  ;;  %v820_v26 = vld [vmem:[#allocation2 + $0x1c] sm:$0xf]  ;;  %v853_v27 = vshrl.u32 %v819_v23, 16  ;;  %v856_v41 = vshll.u32 %v819_v23, 16 }
  0x7f   : > { %v3136_v28 = vld [vmem:[#allocation3 + $0x18] ss:$36 sps:$4 sm:$0xff]   ;;  %v1068_v30 = vor.u32 %v1067_v20, %v1064_v18  ;;  %v1083_v32 = vrot.slane %v1081_v21, 5  ;;  %v862_v42 = vshll.u32 %v820_v26, 16  ;;  %v866_v44 = vshrl.u32 %v820_v26, 16 }
  0x80   : > { %v3138_v29 = vld [vmem:[#allocation3 + $0x1c] ss:$36 sps:$4 sm:$0xff]   ;;  %v3173_v34 = vld [vmem:[%s3957_s1] ss:$0 sm:$0xff]  ;;  %v1078_v37 = vor.u32 %v1077_v24, %v1073_v33  ;;  %v855_v39 = vrot.slane %v853_v27, 4  ;;  %v858_v50 = vrot.slane %v856_v41, 5 }
  0x81   : > { %v330_v22 = vmul.f32 %v3173_v34, %v2769_v13  ;;  %v821_v38 = vld [vmem:[#allocation2 + $0x20] sm:$0x1]  ;;  %2244 = vmatprep.mubr.bf16.mxu1 %v3138_v29  ;;  %v1069_v43 = vrot.slane %v1068_v30, 4  ;;  %v943_v45 = vld [vmem:[#allocation2 + $0x18] sm:$0xe]  ;;  %v331_v48 = vmul.f32 %v3173_v34, %v2770_v2  ;;  %v864_v51 = vrot.slane %v862_v42, 5 }
  0x82   : > { %v872_v47 = vshll.u32 %v821_v38, 16  ;;  %2245 = vmatmul.mubr.bf16.vlgmr.msra.gmra.mxu1 %v3136_v28  ;;  %v1079_v49 = vrot.slane %v1078_v37, 4  ;;  %v944_v54 = vld [vmem:[#allocation2 + $0x1c] sm:$0xf]  ;;  %v2601_v55 = vrot.slane %v943_v45, 9  ;;  %v868_v58 = vrot.slane %v866_v44, 4 }
  0x83   : > { %3001 = vmatpush3.bf16.msra.mxu1 %v3671_v52  ;;  %v1074_v56 = vsel %vm3506_vm15, %v1069_v43, %v1073_v33  ;;  %v945_v59 = vld [vmem:[#allocation2 + $0x20] sm:$0x1]  ;;  %v973_v60 = vrot.slane %v944_v54, 5  ;;  %v3141_v61 = vld [vmem:[#allocation3 + $0x10] ss:$36 sps:$4 sm:$0xff]   ;;  %v859_v1 = vor.u32 %v858_v50, %v855_v39 }
  0x84   : > { %v3143_v62 = vld [vmem:[#allocation3 + $0x14] ss:$36 sps:$4 sm:$0xff]   ;;  %2994 = vmatprep.subr.bf16.mxu1 %v3715_v36  ;;  %v1084_v63 = vsel %vm3506_vm15, %v1079_v49, %v1083_v32  ;;  %1143 = vst [vmem:[#allocation3 + $0x64] sm:$0xf] %v1074_v56  ;;  %v976_v3 = vrot.slane %v945_v59, 5  ;;  %v869_v5 = vor.u32 %v868_v58, %v864_v51  ;;  %v874_v4 = vrot.slane %v872_v47, 5 }
  0x85   : > { %1144 = vst [vmem:[#allocation3 + $0x88] sm:$0xf] %v1084_v63  ;;  %v974_v31 = vsel %vm3483_vm14, %v2601_v55, %v973_v60  ;;  %v975_v7 = vrot.slane %v973_v60, 4  ;;  %2179 = vmatprep.mubr.bf16.mxu0 %v3143_v62  ;;  %v860_v8 = vrot.slane %v859_v1, 4  ;;  %v382_v10 = vld [vmem:[#allocation2 + $0x38] sm:$0x1] }
  0x86   : > { %1002 = vst [vmem:[#allocation3 + $0x5c] sm:$0xf] %v974_v31  ;;  %v1013_v11 = vld [vmem:[#allocation2 + $0x30] sm:$0xf]  ;;  %v3174_v12 = vld [vmem:[%s3957_s1 + $0x1] ss:$0 sm:$0xff]  ;;  %2180 = vmatmul.mubr.bf16.vlgmr.msra.gmra.mxu0 %v3141_v61 }
  0x87   : > { %v3739_v13 = vadd.f32 %v3174_v12, %v330_v22  ;;  %v3741_v14 = vadd.f32 %v3174_v12, %v331_v48  ;;  %3002 = vmatpush3.bf16.msra.mxu1 %v3715_v36  ;;  %v870_v15 = vrot.slane %v869_v5, 4  ;;  %v977_v16 = vsel %vm3483_vm14, %v975_v7, %v976_v3  ;;  %v1014_v18 = vld [vmem:[#allocation2 + $0x34] sm:$0xf]  ;;  %1021 = vst [vmem:[#allocation3 + $0xa8] sm:$0xf] %v1013_v11  ;;  %v3763_v37 = vld [vmem:[%s3958_s2 + $0x218] sm:$0xff]  }
  0x88   : > { %v383_v17 = vsel %vm3417_vm4, 0, %v382_v10  ;;  %v1031_v20 = vld [vmem:[#allocation2 + $0x30] sm:$0xf]  ;;  %2970 = vmatpush3.bf16.msra.mxu0 %v3671_v52  ;;  %2995 = vmatprep.subr.bf16.mxu1 %v3724_v57  ;;  %v865_v21 = vsel %vm3506_vm15, %v860_v8, %v864_v51  ;;  %1003 = vst [vmem:[#allocation3 + $0x80] sm:$0xf] %v977_v16 }
  0x89   : > { %384 = vst [vmem:[#allocation2 + $0x38] sm:$0x1] %v383_v17  ;;  %1022 = vst [vmem:[#allocation3 + $0xcc] sm:$0xf] %v1014_v18  ;;  %v1032_v23 = vld [vmem:[#allocation2 + $0x34] sm:$0xf]  ;;  %2971 = vmatprep.subr.bf16.mxu0 %v3715_v36  ;;  %v875_v24 = vsel %vm3506_vm15, %v870_v15, %v874_v4 }
  0x8a   : > { %v1086_v2 = vshrl.u32 %v1031_v20, 16  ;;  %v1089_v33 = vshll.u32 %v1031_v20, 16  ;;  %934 = vst [vmem:[#allocation3 + $0x58] sm:$0xf] %v865_v21  ;;  %v1095_v26 = vshll.u32 %v1032_v23, 16  ;;  %v1099_v27 = vshrl.u32 %v1032_v23, 16 }
  0x8b   : > { %v822_v52 = vld [vmem:[#allocation2 + $0x24] sm:$0xf]  ;;  %935 = vst [vmem:[#allocation3 + $0x7c] sm:$0xf] %v875_v24  ;;  %v823_v30 = vld [vmem:[#allocation2 + $0x28] sm:$0xf]  ;;  %3003 = vmatpush3.bf16.msra.mxu1 %v3724_v57  ;;  %v344_v20 = vstv %s343_s30 }
  0x8c   : > { %v1088_v28 = vrot.slane %v1086_v2, 4  ;;  %v1091_v29 = vrot.slane %v1089_v33, 5  ;;  %v334_v32 = vmax.f32 %v3739_v13, 0.0  ;;  %v335_v34 = vmax.f32 %v3741_v14, 0.0  ;;  %v824_v38 = vld [vmem:[#allocation2 + $0x2c] sm:$0x1]  ;;  %2972 = vmatpush3.bf16.msra.mxu0 %v3715_v36  ;;  %2996 = vmatprep.subr.bf16.mxu1 %v3734_v9 }
  0x8d   : > { %v3758_v22 = vrot.slane %v1095_v26, 5  ;;  %v877_v39 = vshrl.u32 %v822_v52, 16  ;;  %v880_v41 = vshll.u32 %v822_v52, 16  ;;  %v3145_v42 = vld [vmem:[#allocation3 + $0x64] ss:$36 sps:$4 sm:$0xff]   ;;  %v886_v47 = vshll.u32 %v823_v30, 16  ;;  %2973 = vmatprep.subr.bf16.mxu0 %v3724_v57 }
  0x8e   : > { %v3147_v43 = vld [vmem:[#allocation3 + $0x60] ss:$36 sps:$4 sm:$0xff]   ;;  %v1092_v44 = vor.u32 %v1091_v29, %v1088_v28  ;;  %v1101_v45 = vrot.slane %v1099_v27, 4  ;;  %v890_v50 = vshrl.u32 %v823_v30, 16  ;;  %v946_v51 = vld [vmem:[#allocation2 + $0x24] sm:$0xe]  ;;  %2252 = vmatprep.mubr.bf16.mxu1 %v3145_v42  ;;  %v336_v12 = vpack.c.bf16 %v335_v34, %v334_v32 }
  0x8f   : > { %v879_v48 = vrot.slane %v877_v39, 4  ;;  %v882_v49 = vrot.slane %v880_v41, 5  ;;  %v888_v55 = vrot.slane %v886_v47, 5  ;;  %v896_v56 = vshll.u32 %v824_v38, 16  ;;  %v947_v58 = vld [vmem:[#allocation2 + $0x28] sm:$0xf]  ;;  %2253 = vmatmul.mubr.bf16.gmra.mxu1 %v3147_v43 }
  0x90   : > { %v1093_v54 = vrot.slane %v1092_v44, 4  ;;  %v2602_v59 = vrot.slane %v946_v51, 9  ;;  %v583_v60 = vld [vmem:[#allocation2 + $0x38] sm:$0x1]  ;;  %v892_v61 = vrot.slane %v890_v50, 4  ;;  %2974 = vmatpush3.bf16.msra.mxu0 %v3724_v57  ;;  %3004 = vmatpush3.bf16.msra.mxu1 %v3734_v9  ;;  %v980_v5 = vrot.slane %v947_v58, 5 }
  0x91   : > { %v883_v36 = vor.u32 %v882_v49, %v879_v48  ;;  %v948_v62 = vld [vmem:[#allocation2 + $0x2c] sm:$0x1]  ;;  %v584_v63 = vsel %vm3407_vm2, %v544_v35, %v583_v60  ;;  %v898_v3 = vrot.slane %v896_v56, 5  ;;  %v3780_v4 = vld [vmem:[%s3958_s2 + $0x210] sm:$0xff]   ;;  %v3149_v57 = vld [vmem:[#allocation3 + $0x5c] ss:$36 sps:$4 sm:$0xff]   ;;  %v1102_v6 = vor.u32 %v1101_v45, %v3758_v22  ;;  %2975 = vmatprep.subr.bf16.mxu0 %v3734_v9  ;;  %2997 = vmatprep.subr.bf16.mxu1 %v3763_v37 }
  0x92   : > { %v1098_v1 = vsel %vm3506_vm15, %v1093_v54, %v3758_v22  ;;  %v3151_v31 = vld [vmem:[#allocation3 + $0x58] ss:$36 sps:$4 sm:$0xff]   ;;  %585 = vst [vmem:[#allocation2 + $0x38] sm:$0x1] %v584_v63  ;;  %v893_v7 = vor.u32 %v892_v61, %v888_v55  ;;  %v981_v8 = vsel %vm3483_vm14, %v2602_v59, %v980_v5  ;;  %v982_v10 = vrot.slane %v980_v5, 4  ;;  %2187 = vmatprep.mubr.bf16.mxu0 %v3149_v57  ;;  %v3794_v17 = vld [vmem:[%s3958_s2 + $0x208] sm:$0xff]  }
  0x93   : > { %1145 = vst [vmem:[#allocation3 + $0xac] sm:$0xf] %v1098_v1  ;;  %v884_v35 = vrot.slane %v883_v36, 4  ;;  %v983_v11 = vrot.slane %v948_v62, 5  ;;  %1004 = vst [vmem:[#allocation3 + $0xa4] sm:$0xf] %v981_v8  ;;  %2188 = vmatmul.mubr.bf16.gmra.mxu0 %v3151_v31 }
  0x94   : > { %v894_v14 = vrot.slane %v893_v7, 4  ;;  %v365_v15 = vld [vmem:[#allocation2 + $0x3c] sm:$0x1]  ;;  %v385_v16 = vld [vmem:[#allocation2 + $0x44] sm:$0x1]  ;;  %3005 = vmatpush3.bf16.msra.mxu1 %v3763_v37  ;;  %v1103_v2 = vrot.slane %v1102_v6, 4  ;;  %2976 = vmatpush3.bf16.msra.mxu0 %v3734_v9 }
  0x95   : > { %v889_v13 = vsel %vm3506_vm15, %v884_v35, %v888_v55  ;;  %v984_v18 = vsel %vm3483_vm14, %v982_v10, %v983_v11  ;;  %v366_v21 = vsel %vm3407_vm2, 0, %v365_v15  ;;  %v386_v23 = vsel %vm3417_vm4, 0, %v385_v16  ;;  %2998 = vmatprep.subr.bf16.mxu1 %v3780_v4  ;;  %v825_v24 = vld [vmem:[#allocation2 + $0x30] sm:$0xf]  ;;  %v826_v26 = vld [vmem:[#allocation2 + $0x34] sm:$0xf]  ;;  %2977 = vmatprep.subr.bf16.mxu0 %v3763_v37 }
  0x96   : > { %936 = vst [vmem:[#allocation3 + $0xa0] sm:$0xf] %v889_v13  ;;  %v899_v33 = vsel %vm3506_vm15, %v894_v14, %v898_v3  ;;  %1005 = vst [vmem:[#allocation3 + $0xc8] sm:$0xf] %v984_v18  ;;  %vm345_vm0 = vcmp.eq.s32.totalorder %v344_v20, 1  ;;  %v901_v46 = vshrl.u32 %v825_v24, 16 }
  0x97   : > { %367 = vst [vmem:[#allocation2 + $0x3c] sm:$0x1] %v366_v21  ;;  %387 = vst [vmem:[#allocation2 + $0x44] sm:$0x1] %v386_v23  ;;  %v346_v27 = vsel %vm345_vm0, 0, %v336_v12  ;;  %v904_v52 = vshll.u32 %v825_v24, 16 }
  0x98   : > { %937 = vst [vmem:[#allocation3 + $0xc4] sm:$0xf] %v899_v33  ;;  %v910_v28 = vshll.u32 %v826_v26, 16  ;;  %v949_v29 = vld [vmem:[#allocation2 + $0x30] sm:$0xe]  ;;  %v2586_v9 = vcombine.low %v346_v27, %v346_v27  ;;  %v2587_v30 = vcombine.high %v346_v27, %v346_v27  ;;  %v914_v32 = vshrl.u32 %v826_v26, 16  ;;  %3006 = vmatpush3.bf16.msra.mxu1 %v3780_v4  ;;  %2978 = vmatpush3.bf16.msra.mxu0 %v3763_v37 }
  0x99   : > { %v950_v34 = vld [vmem:[#allocation2 + $0x34] sm:$0xf]  ;;  %v2603_v22 = vrot.slane %v949_v29, 9  ;;  %v3811_v38 = vld [vmem:[%s3958_s2 + $0x200] sm:$0xff]   ;;  %v1033_v39 = vld [vmem:[#allocation2 + $0x38] sm:$0x1]  ;;  %2999 = vmatprep.subr.bf16.mxu1 %v3794_v17  ;;  %2979 = vmatprep.subr.bf16.mxu0 %v3780_v4 }
  0x9a   : > { %v827_v41 = vld [vmem:[#allocation2 + $0x38] sm:$0x1]  ;;  %v903_v42 = vrot.slane %v901_v46, 4  ;;  %v1105_v43 = vshll.u32 %v1033_v39, 16  ;;  %v430_v44 = vshrl.u32 %v2586_v9, 16  ;;  %v433_v47 = vshll.u32 %v2586_v9, 16 }
  0x9b   : > { %v438_v45 = vshrl.u32 %v2587_v30, 16  ;;  %v951_v48 = vld [vmem:[#allocation2 + $0x38] sm:$0x1]  ;;  %v441_v49 = vshll.u32 %v2587_v30, 16  ;;  %v906_v50 = vrot.slane %v904_v52, 5  ;;  %v912_v51 = vrot.slane %v910_v28, 5 }
  0x9c   : > { %v916_v54 = vrot.slane %v914_v32, 4  ;;  %v1107_v55 = vrot.slane %v1105_v43, 5  ;;  %v432_v56 = vrot.slane %v430_v44, 7  ;;  %v920_v59 = vshll.u32 %v827_v41, 16  ;;  %3007 = vmatpush3.bf16.msra.mxu1 %v3794_v17  ;;  %2980 = vmatpush3.bf16.msra.mxu0 %v3780_v4  ;;  %v1155_v11 = vld [vmem:[#allocation2 + $0x30] sm:$0xe] }
  0x9d   : > { %v440_v58 = vrot.slane %v438_v45, 7  ;;  %v907_v37 = vor.u32 %v906_v50, %v903_v42  ;;  %v987_v62 = vrot.slane %v950_v34, 5  ;;  %v990_v63 = vrot.slane %v951_v48, 5  ;;  %v3157_v3 = vld [vmem:[#allocation3 + $0xa4] ss:$36 sps:$4 sm:$0xff]   ;;  %3000 = vmatprep.subr.bf16.mxu1 %v3811_v38  ;;  %2981 = vmatprep.subr.bf16.mxu0 %v3794_v17 }
  0x9e   : > { %v450_v60 = vld [vmem:[#allocation2 + $0x3c] sm:$0xf]  ;;  %v454_v36 = vld [vmem:[#allocation2 + $0x44] sm:$0x1]  ;;  %v917_v61 = vor.u32 %v916_v54, %v912_v51  ;;  %v1108_v1 = vsel %vm3506_vm15, %v1103_v2, %v1107_v55  ;;  %v435_v57 = vor.u32 %v433_v47, %v432_v56  ;;  %v436_v31 = vrot.slane %v432_v56, 4  ;;  %2195 = vmatprep.mubr.bf16.mxu0 %v3157_v3 }
  0x9f   : > { %v3159_v5 = vld [vmem:[#allocation3 + $0xa0] ss:$36 sps:$4 sm:$0xff]   ;;  %v443_v6 = vor.u32 %v441_v49, %v440_v58  ;;  %1146 = vst [vmem:[#allocation3 + $0xd0] sm:$0xf] %v1108_v1  ;;  %v445_v35 = vrot.slane %v440_v58, 4  ;;  %v908_v7 = vrot.slane %v907_v37, 4  ;;  %v988_v4 = vsel %vm3483_vm14, %v2603_v22, %v987_v62 }
  0xa0   : > { %v918_v8 = vrot.slane %v917_v61, 4  ;;  %v922_v10 = vrot.slane %v920_v59, 5  ;;  %v451_v13 = vsel %vm3443_vm8, %v435_v57, %v450_v60  ;;  %v989_v14 = vrot.slane %v987_v62, 4  ;;  %v1156_v15 = vld [vmem:[#allocation2 + $0x34] sm:$0xf]  ;;  %2196 = vmatmul.mubr.bf16.gmra.mxu0 %v3159_v5  ;;  %3008 = vmatpush3.bf16.msra.mxu1 %v3811_v38 }
  0xa1   : > { %v444_v12 = vsel %vm3450_vm9, %v436_v31, %v443_v6  ;;  %v1157_v16 = vld [vmem:[#allocation2 + $0x38] sm:$0x1]  ;;  %452 = vst [vmem:[#allocation2 + $0x3c] sm:$0xf] %v451_v13  ;;  %v455_v18 = vsel %vm3407_vm2, %v445_v35, %v454_v36  ;;  %v913_v20 = vsel %vm3506_vm15, %v908_v7, %v912_v51  ;;  %1006 = vst [vmem:[#allocation3 + $0xec] sm:$0xf] %v988_v4  ;;  %2982 = vmatpush3.bf16.msra.mxu0 %v3794_v17 }
  0xa2   : > { %453 = vst [vmem:[#allocation2 + $0x40] sm:$0xf] %v444_v12  ;;  %v923_v25 = vsel %vm3506_vm15, %v918_v8, %v922_v10  ;;  %v2606_v19 = vrot.slane %v1155_v11, 9  ;;  %v1149_v21 = vld [vmem:[#allocation2 + $0x18] sm:$0xe]  ;;  %v991_v2 = vsel %vm3483_vm14, %v989_v14, %v990_v63  ;;  %v1189_v40 = vrot.slane %v1156_v15, 5  ;;  %2983 = vmatprep.subr.bf16.mxu0 %v3811_v38 }
  0xa3   : > { %v1150_v23 = vld [vmem:[#allocation2 + $0x1c] sm:$0xf]  ;;  %456 = vst [vmem:[#allocation2 + $0x44] sm:$0x1] %v455_v18  ;;  %938 = vst [vmem:[#allocation3 + $0xe8] sm:$0xf] %v913_v20 }
  0xa4   : > { %939 = vst [vmem:[#allocation3 + $0x10c] sm:$0xf] %v923_v25  ;;  %v1192_v33 = vrot.slane %v1157_v16, 5  ;;  %v1151_v24 = vld [vmem:[#allocation2 + $0x20] sm:$0x1]  ;;  %v2604_v26 = vrot.slane %v1149_v21, 9  ;;  %v1190_v29 = vsel %vm3483_vm14, %v2606_v19, %v1189_v40 }
  0xa5   : > { %1007 = vst [vmem:[#allocation3 + $0x110] sm:$0xf] %v991_v2  ;;  %v1175_v27 = vrot.slane %v1150_v23, 5  ;;  %v1178_v46 = vrot.slane %v1151_v24, 5  ;;  %v1152_v52 = vld [vmem:[#allocation2 + $0x24] sm:$0xe]  ;;  %2984 = vmatpush3.bf16.msra.mxu0 %v3811_v38 }
  0xa6   : > { %v1153_v28 = vld [vmem:[#allocation2 + $0x28] sm:$0xf]  ;;  %v1191_v9 = vrot.slane %v1189_v40, 4  ;;  %v1154_v30 = vld [vmem:[#allocation2 + $0x2c] sm:$0x1]  ;;  %v2605_v32 = vrot.slane %v1152_v52, 9 }
  0xa7   : > { %v1182_v34 = vrot.slane %v1153_v28, 5  ;;  %1213 = vst [vmem:[#allocation3 + $0xb0] sm:$0xf] %v1190_v29  ;;  %v1176_v17 = vsel %vm3483_vm14, %v2604_v26, %v1175_v27  ;;  %v1177_v22 = vrot.slane %v1175_v27, 4  ;;  %v1185_v39 = vrot.slane %v1154_v30, 5 }
  0xa8   : > { %v3153_v41 = vld [vmem:[#allocation3 + $0xac] ss:$36 sps:$4 sm:$0xff]   ;;  %v1193_v43 = vsel %vm3483_vm14, %v1191_v9, %v1192_v33  ;;  %1209 = vst [vmem:[#allocation3 + $0x20] sm:$0xf] %v1176_v17  ;;  %v1015_v48 = vld [vmem:[#allocation2 + $0x3c] sm:$0xf] }
  0xa9   : > { %v3155_v42 = vld [vmem:[#allocation3 + $0xa8] ss:$36 sps:$4 sm:$0xff]   ;;  %v1183_v44 = vsel %vm3483_vm14, %v2605_v32, %v1182_v34  ;;  %v1184_v47 = vrot.slane %v1182_v34, 4  ;;  %1214 = vst [vmem:[#allocation3 + $0xd4] sm:$0xf] %v1193_v43  ;;  %v1179_v45 = vsel %vm3483_vm14, %v1177_v22, %v1178_v46  ;;  %2260 = vmatprep.mubr.bf16.mxu1 %v3153_v41 }
  0xaa   : > { %1211 = vst [vmem:[#allocation3 + $0x68] sm:$0xf] %v1183_v44  ;;  %v1016_v49 = vld [vmem:[#allocation2 + $0x40] sm:$0xf]  ;;  %v1034_v50 = vld [vmem:[#allocation2 + $0x3c] sm:$0xf]  ;;  %2261 = vmatmul.mubr.bf16.gmra.mxu1 %v3155_v42 }
  0xab   : > { %1210 = vst [vmem:[#allocation3 + $0x44] sm:$0xf] %v1179_v45  ;;  %v1186_v51 = vsel %vm3483_vm14, %v1184_v47, %v1185_v39  ;;  %1023 = vst [vmem:[#allocation3 + $0xf0] sm:$0xf] %v1015_v48  ;;  %v1035_v38 = vld [vmem:[#allocation2 + $0x40] sm:$0xf] }
  0xac   : > { %1024 = vst [vmem:[#allocation3 + $0x114] sm:$0xf] %v1016_v49  ;;  %v1036_v54 = vld [vmem:[#allocation2 + $0x44] sm:$0x1]  ;;  %v1110_v55 = vshrl.u32 %v1034_v50, 16  ;;  %v1113_v56 = vshll.u32 %v1034_v50, 16 }
  0xad   : > { %1212 = vst [vmem:[#allocation3 + $0x8c] sm:$0xf] %v1186_v51  ;;  %v1119_v58 = vshll.u32 %v1035_v38, 16  ;;  %v1123_v59 = vshrl.u32 %v1035_v38, 16  ;;  %v1129_v60 = vshll.u32 %v1036_v54, 16 }
  0xae   : > { %v1112_v36 = vrot.slane %v1110_v55, 4  ;;  %v1115_v37 = vrot.slane %v1113_v56, 5  ;;  %v3165_v61 = vld [vmem:[#allocation3 + $0xec] ss:$36 sps:$4 sm:$0xff]   ;;  %v1158_v5 = vld [vmem:[#allocation2 + $0x3c] sm:$0xe] }
  0xaf   : > { %v3167_v62 = vld [vmem:[#allocation3 + $0xe8] ss:$36 sps:$4 sm:$0xff]   ;;  %v1121_v63 = vrot.slane %v1119_v58, 5  ;;  %v1125_v1 = vrot.slane %v1123_v59, 4  ;;  %2203 = vmatprep.mubr.bf16.mxu0 %v3165_v61  ;;  %v1159_v57 = vld [vmem:[#allocation2 + $0x40] sm:$0xf] }
  0xb0   : > { %v1116_v3 = vor.u32 %v1115_v37, %v1112_v36  ;;  %v1160_v31 = vld [vmem:[#allocation2 + $0x44] sm:$0x1]  ;;  %v1131_v35 = vrot.slane %v1129_v60, 5  ;;  %2204 = vmatmul.mubr.bf16.gmra.mxu0 %v3167_v62  ;;  %v2607_v7 = vrot.slane %v1158_v5, 9  ;;  %v1196_v8 = vrot.slane %v1159_v57, 5 }
  0xb1   : > { %v1126_v6 = vor.u32 %v1125_v1, %v1121_v63  ;;  %v1199_v11 = vrot.slane %v1160_v31, 5  ;;  %v3169_v25 = vld [vmem:[#allocation3 + $0xb0] ss:$36 sps:$4 sm:$0xff]  }
  0xb2   : > { %v1117_v10 = vrot.slane %v1116_v3, 4  ;;  %v1197_v13 = vsel %vm3483_vm14, %v2607_v7, %v1196_v8  ;;  %v1198_v4 = vrot.slane %v1196_v8, 4  ;;  %v3171_v14 = vld [vmem:[#allocation3 + $0x20] ss:$36 sps:$4 sm:$0xff]  }
  0xb3   : > { %v1127_v12 = vrot.slane %v1126_v6, 4  ;;  %1215 = vst [vmem:[#allocation3 + $0xf8] sm:$0xf] %v1197_v13  ;;  %2985 = vmatprep.mubr.bf16.mxu0 %v3171_v14  ;;  %v3163_v21 = vld [vmem:[#allocation3 + $0xf0] ss:$36 sps:$4 sm:$0xff]  }
  0xb4   : > { %v1122_v15 = vsel %vm3506_vm15, %v1117_v10, %v1121_v63  ;;  %v1200_v18 = vsel %vm3483_vm14, %v1198_v4, %v1199_v11  ;;  %v3172_v20 = vld [vmem:[#allocation3 + $0x68] ss:$36 sps:$4 sm:$0xff]  }
  0xb5   : > { %v1132_v16 = vsel %vm3506_vm15, %v1127_v12, %v1131_v35  ;;  %1147 = vst [vmem:[#allocation3 + $0xf4] sm:$0xf] %v1122_v15  ;;  %1216 = vst [vmem:[#allocation3 + $0x11c] sm:$0xf] %v1200_v18 }
  0xb6   : > { %1148 = vst [vmem:[#allocation3 + $0x118] sm:$0xf] %v1132_v16 }
  0xb8   : > { %2986 = vmatmul.mubr.bf16.vlgmr.msra.gmra.mxu0 %v3172_v20 }
  0xbc   : > { %v3170_v23 = vld [vmem:[#allocation3 + $0xf8] ss:$36 sps:$4 sm:$0xff]  }
  0xbd   : > { %v3161_v19 = vld [vmem:[#allocation3 + $0xf4] ss:$36 sps:$4 sm:$0xff]  }
  0xbe   : > { %2268 = vmatprep.mubr.bf16.mxu1 %v3161_v19 }
  0xbf   : > { %2269 = vmatmul.mubr.bf16.gmra.mxu1 %v3163_v21 }
  0xc0   : > { %2989 = vmatprep.mubr.bf16.mxu1 %v3169_v25 }
  0xc7   : > { %2990 = vmatmul.mubr.bf16.vlgmr.msra.gmra.mxu1 %v3170_v23 }
 0x106   : > { %v2853_v2 = vpop.f32.mrf.mxu1 }
 0x108   : > { %v2854_v53 = vpop.f32.mrf.mxu1 }
 0x109   : > { %v2855_v13 = vadd.f32 %v2854_v53, %v2853_v2 }
 0x10a   : > { %v2856_v33 = vpop.f32.mrf.mxu1 }
 0x10c   : > { %v2857_v26 = vpop.f32.mrf.mxu1 }
 0x10d   : > { %v2858_v25 = vadd.f32 %v2857_v26, %v2856_v33 }
 0x110   : > { %v2813_v40 = vpop.f32.mrf.mxu0 }
 0x112   : > { %v2814_v24 = vpop.f32.mrf.mxu0 }
 0x113   : > { %v2815_v4 = vadd.f32 %v2814_v24, %v2813_v40 }
 0x114   : > { %v2816_v0 = vpop.f32.mrf.mxu0 }
 0x116   : > { %v2817_v27 = vpop.f32.mrf.mxu0  ;;  %v2859_v52 = vpop.f32.mrf.mxu1 }
 0x117   : > { %v2818_v19 = vadd.f32 %v2817_v27, %v2816_v0 }
 0x118   : > { %v2819_v46 = vpop.f32.mrf.mxu0  ;;  %v2860_v29 = vpop.f32.mrf.mxu1 }
 0x119   : > { %v2861_v15 = vadd.f32 %v2860_v29, %v2859_v52  ;;  %v2120_v40 = vadd.f32 %v2858_v25, %v2818_v19 }
 0x11a   : > { %v2820_v28 = vpop.f32.mrf.mxu0  ;;  %v2862_v30 = vpop.f32.mrf.mxu1 }
 0x11b   : > { %v2821_v16 = vadd.f32 %v2820_v28, %v2819_v46 }
 0x11c   : > { %v2822_v9 = vpop.f32.mrf.mxu0  ;;  %v2863_v34 = vpop.f32.mrf.mxu1 }
 0x11d   : > { %v2864_v18 = vadd.f32 %v2863_v34, %v2862_v30 }
 0x11e   : > { %v2823_v32 = vpop.f32.mrf.mxu0 }
 0x11f   : > { %v2824_v20 = vadd.f32 %v2823_v32, %v2822_v9 }
 0x121   : > { %v2128_v2 = vadd.f32 %v2864_v18, %v2824_v20 }
 0x128   : > { %v3863_v22 = vpop.f32.mrf.mxu1 }
 0x12a   : > { %v3867_v41 = vpop.f32.mrf.mxu1 }
 0x12b   : > { %v3861_v17 = vpop.f32.mrf.mxu0  ;;  %v2867_v32 = vadd.f32 %v3867_v41, %v3863_v22 }
 0x12c   : > { %v3871_v43 = vpop.f32.mrf.mxu1 }
 0x12d   : > { %v3865_v39 = vpop.f32.mrf.mxu0 }
 0x12e   : > { %v3875_v47 = vpop.f32.mrf.mxu1 }
 0x12f   : > { %v3869_v42 = vpop.f32.mrf.mxu0  ;;  %3976 = vst [vmem:[#allocation6_spill] sm:$0xff] %v3875_v47  ;;  %v2125_v47 = vadd.f32 %v2861_v15, %v2821_v16 }
 0x130   : > { %3974 = vst [vmem:[#allocation4_spill] sm:$0xff] %v3869_v42 }
 0x131   : > { %v3873_v44 = vpop.f32.mrf.mxu0 }
 0x132   : > { %3975 = vst [vmem:[#allocation5_spill] sm:$0xff] %v3873_v44 }
 0x137   : > { %v3879_v48 = vpop.f32.mrf.mxu1 }
 0x139   : > { %v3885_v51 = vpop.f32.mrf.mxu1 }
 0x13b   : > { %v3877_v45 = vpop.f32.mrf.mxu0  ;;  %v3889_v54 = vpop.f32.mrf.mxu1 }
 0x13d   : > { %v3881_v49 = vpop.f32.mrf.mxu0  ;;  %v3891_v56 = vpop.f32.mrf.mxu1 }
 0x13f   : > { %v3883_v50 = vpop.f32.mrf.mxu0 }
 0x141   : > { %v3887_v38 = vpop.f32.mrf.mxu0 }
 0x142   : > { %v2933_v59 = vpop.f32.mrf.mxu1 }
 0x144   : > { %v2934_v36 = vpop.f32.mrf.mxu1 }
 0x145   : > { %v2935_v24 = vadd.f32 %v2934_v36, %v2933_v59  ;;  %v2833_v36 = vadd.f32 %v3881_v49, %v3877_v45  ;;  %v3980_v45 = vld [vmem:[#allocation6_spill] sm:$0xff] }
 0x146   : > { %v2893_v55 = vpop.f32.mrf.mxu0  ;;  %v2936_v61 = vpop.f32.mrf.mxu1  ;;  %v2870_v49 = vadd.f32 %v3980_v45, %v3871_v43 }
 0x148   : > { %v2894_v58 = vpop.f32.mrf.mxu0  ;;  %v2937_v1 = vpop.f32.mrf.mxu1 }
 0x149   : > { %v2895_v21 = vadd.f32 %v2894_v58, %v2893_v55  ;;  %v2938_v9 = vadd.f32 %v2937_v1, %v2936_v61  ;;  %v2827_v55 = vadd.f32 %v3865_v39, %v3861_v17  ;;  %v2836_v17 = vadd.f32 %v3887_v38, %v3883_v50 }
 0x14a   : > { %v2896_v60 = vpop.f32.mrf.mxu0 }
 0x14c   : > { %v2897_v37 = vpop.f32.mrf.mxu0 }
 0x14d   : > { %v2898_v53 = vadd.f32 %v2897_v37, %v2896_v60  ;;  %v2873_v60 = vadd.f32 %v3885_v51, %v3879_v48 }
 0x14f   : > { %v2939_v5 = vpop.f32.mrf.mxu1  ;;  %v2185_v30 = vadd.f32 %v2898_v53, %v2120_v40 }
 0x151   : > { %v2940_v31 = vpop.f32.mrf.mxu1 }
 0x152   : > { %v2941_v28 = vadd.f32 %v2940_v31, %v2939_v5  ;;  %v3981_v31 = vld [vmem:[#allocation4_spill] sm:$0xff] }
 0x153   : > { %v2899_v62 = vpop.f32.mrf.mxu0  ;;  %v2942_v7 = vpop.f32.mrf.mxu1 }
 0x155   : > { %v2900_v63 = vpop.f32.mrf.mxu0  ;;  %v2943_v10 = vpop.f32.mrf.mxu1 }
 0x156   : > { %v2944_v0 = vadd.f32 %v2943_v10, %v2942_v7  ;;  %v3982_v7 = vld [vmem:[#allocation5_spill] sm:$0xff]  ;;  %v2141_v10 = vadd.f32 %v2873_v60, %v2833_v36 }
 0x157   : > { %v2902_v3 = vpop.f32.mrf.mxu0 }
 0x159   : > { %v2903_v57 = vpop.f32.mrf.mxu0 }
 0x15a   : > { %v2904_v44 = vadd.f32 %v2903_v57, %v2902_v3  ;;  %v2133_v3 = vadd.f32 %v2867_v32, %v2827_v55 }
 0x15c   : > { %v2193_v26 = vadd.f32 %v2904_v44, %v2128_v2 }
 0x15e   : > { %v2258_v44 = vadd.f32 %v2944_v0, %v2193_v26 }
 0x160   : > { %v2905_v6 = vpop.f32.mrf.mxu0 }
 0x162   : > { %v2906_v35 = vpop.f32.mrf.mxu0 }
 0x163   : > { %v2907_v39 = vadd.f32 %v2906_v35, %v2905_v6 }
 0x164   : > { %v3893_v8 = vpop.f32.mrf.mxu0 }
 0x165   : > { %3977 = vst [vmem:[#allocation7_spill] sm:$0xff] %v3893_v8  ;;  %v2901_v8 = vadd.f32 %v2900_v63, %v2899_v62  ;;  %v2250_v62 = vadd.f32 %v2938_v9, %v2185_v30  ;;  %v2876_v63 = vadd.f32 %v3891_v56, %v3889_v54  ;;  %v2198_v43 = vadd.f32 %v2907_v39, %v2133_v3 }
 0x166   : > { %v3895_v11 = vpop.f32.mrf.mxu0 }
 0x167   : > { %3978 = vst [vmem:[#allocation8_spill] sm:$0xff] %v3895_v11  ;;  %v2117_v11 = vadd.f32 %v2855_v13, %v2815_v4  ;;  %v2190_v33 = vadd.f32 %v2901_v8, %v2125_v47  ;;  %v2830_v8 = vadd.f32 %v3982_v7, %v3981_v31  ;;  %v2144_v35 = vadd.f32 %v2876_v63, %v2836_v17 }
 0x169   : > { %v2182_v46 = vadd.f32 %v2895_v21, %v2117_v11  ;;  %v2255_v47 = vadd.f32 %v2941_v28, %v2190_v33  ;;  %v2136_v2 = vadd.f32 %v2870_v49, %v2830_v8 }
 0x16a   : > { %v3897_v12 = vpop.f32.mrf.mxu1 }
 0x16b   : > { %3979 = vst [vmem:[#allocation9_spill] sm:$0xff] %v3897_v12  ;;  %v2247_v59 = vadd.f32 %v2935_v24, %v2182_v46 }
 0x16c   : > { %v2946_v42 = vpop.f32.mrf.mxu1 }
 0x16e   : > { %v2948_v27 = vpop.f32.mrf.mxu1  ;;  %v3985_v15 = vld [vmem:[#allocation8_spill] sm:$0xff] }
 0x170   : > { %v2911_v14 = vpop.f32.mrf.mxu0  ;;  %v2949_v58 = vpop.f32.mrf.mxu1 }
 0x171   : > { %v2950_v46 = vadd.f32 %v2949_v58, %v2948_v27 }
 0x172   : > { %v2912_v23 = vpop.f32.mrf.mxu0  ;;  %v3983_v13 = vld [vmem:[#allocation9_spill] sm:$0xff] }
 0x173   : > { %v2913_v48 = vadd.f32 %v2912_v23, %v2911_v14  ;;  %v2947_v4 = vadd.f32 %v2946_v42, %v3983_v13  ;;  %v3984_v14 = vld [vmem:[#allocation7_spill] sm:$0xff] }
 0x174   : > { %v2914_v12 = vpop.f32.mrf.mxu0 }
 0x175   : > { %v2206_v18 = vadd.f32 %v2913_v48, %v2141_v10  ;;  %v2263_v33 = vadd.f32 %v2947_v4, %v2198_v43 }
 0x176   : > { %v2915_v52 = vpop.f32.mrf.mxu0 }
 0x177   : > { %v2916_v11 = vadd.f32 %v2915_v52, %v2914_v12  ;;  %v2910_v12 = vadd.f32 %v3985_v15, %v3984_v14 }
 0x178   : > { %v2987_v29 = vpop.f32.mrf.mxu0 }
 0x179   : > { %v2320_v61 = vadd.f32 %v2987_v29, %v2255_v47  ;;  %v2209_v19 = vadd.f32 %v2916_v11, %v2144_v35  ;;  %v2201_v52 = vadd.f32 %v2910_v12, %v2136_v2 }
 0x17a   : > { %v2311_v34 = vpop.f32.mrf.mxu0 }
 0x17b   : > { %v2312_v22 = vadd.f32 %v2311_v34, %v2247_v59  ;;  %v2398_v21 = vmul.f32 %v2320_v61, %v2320_v61  ;;  %v2266_v55 = vadd.f32 %v2950_v46, %v2201_v52 }
 0x17c   : > { %v2988_v37 = vpop.f32.mrf.mxu0 }
 0x17d   : > { %v2323_v41 = vadd.f32 %v2988_v37, %v2258_v44  ;;  %v2396_v38 = vmul.f32 %v2312_v22, %v2312_v22 }
 0x17e   : > { %v2314_v1 = vpop.f32.mrf.mxu0 }
 0x17f   : > { %v2951_v5 = vpop.f32.mrf.mxu1  ;;  %v2779_v51 = vpack.c.bf16 %v2323_v41, %v2320_v61  ;;  %v2315_v57 = vadd.f32 %v2314_v1, %v2250_v62  ;;  %v2399_v26 = vmul.f32 %v2323_v41, %v2323_v41 }
 0x181   : > { %v2952_v50 = vpop.f32.mrf.mxu1  ;;  %2794 = vst [vmem:[%s3926_s13 + $0x8] sm:$0xff] %v2779_v51   ;;  %v2774_v54 = vpack.c.bf16 %v2315_v57, %v2312_v22  ;;  %v2382_v56 = vadd.f32 %v2315_v57, %v2312_v22  ;;  %v2397_v6 = vmul.f32 %v2315_v57, %v2315_v57 }
 0x182   : > { %v2953_v25 = vadd.f32 %v2952_v50, %v2951_v5 }
 0x183   : > { %v2954_v16 = vpop.f32.mrf.mxu1  ;;  %2775 = vst [vmem:[%s3926_s13] sm:$0xff] %v2774_v54   ;;  %v2404_v20 = vadd.f32 %v2397_v6, %v2396_v38  ;;  %v2383_v23 = vadd.f32 %v2382_v56, %v2320_v61 }
 0x184   : > { %v2271_v42 = vadd.f32 %v2953_v25, %v2206_v18 }
 0x185   : > { %v2955_v53 = vpop.f32.mrf.mxu1  ;;  %v2405_v24 = vadd.f32 %v2404_v20, %v2398_v21  ;;  %v2384_v29 = vadd.f32 %v2383_v23, %v2323_v41 }
 0x186   : > { %v2956_v40 = vadd.f32 %v2955_v53, %v2954_v16 }
 0x187   : > { %v2991_v28 = vpop.f32.mrf.mxu1  ;;  %v2406_v32 = vadd.f32 %v2405_v24, %v2399_v26 }
 0x188   : > { %v2274_v0 = vadd.f32 %v2956_v40, %v2209_v19  ;;  %v2336_v47 = vadd.f32 %v2991_v28, %v2271_v42 }
 0x189   : > { %v2327_v9 = vpop.f32.mrf.mxu1 }
 0x18a   : > { %v2328_v30 = vadd.f32 %v2327_v9, %v2263_v33  ;;  %v2402_v62 = vmul.f32 %v2336_v47, %v2336_v47 }
 0x18b   : > { %v2992_v34 = vpop.f32.mrf.mxu1 }
 0x18c   : > { %v2400_v59 = vmul.f32 %v2328_v30, %v2328_v30  ;;  %v2339_v44 = vadd.f32 %v2992_v34, %v2274_v0  ;;  %v2385_v60 = vadd.f32 %v2384_v29, %v2328_v30 }
 0x18d   : > { %v2330_v27 = vpop.f32.mrf.mxu1 }
 0x18e   : > { %v2789_v58 = vpack.c.bf16 %v2339_v44, %v2336_v47  ;;  %v2331_v36 = vadd.f32 %v2330_v27, %v2266_v55  ;;  %v2407_v37 = vadd.f32 %v2406_v32, %v2400_v59  ;;  %v2403_v39 = vmul.f32 %v2339_v44, %v2339_v44 }
 0x190   : > { %2796 = vst [vmem:[%s3926_s13 + $0x18] sm:$0xff] %v2789_v58   ;;  %v2784_v61 = vpack.c.bf16 %v2331_v36, %v2328_v30  ;;  %v2401_v22 = vmul.f32 %v2331_v36, %v2331_v36  ;;  %v2386_v41 = vadd.f32 %v2385_v60, %v2331_v36 }
 0x192   : > { %2795 = vst [vmem:[%s3926_s13 + $0x10] sm:$0xff] %v2784_v61   ;;  %v2387_v63 = vadd.f32 %v2386_v41, %v2336_v47  ;;  %v2408_v17 = vadd.f32 %v2407_v37, %v2401_v22 }
 0x194   : > { %v2388_v1 = vadd.f32 %v2387_v63, %v2339_v44  ;;  %v2409_v3 = vadd.f32 %v2408_v17, %v2402_v62 }
 0x196   : > { %v2389_v5 = vrot.slane %v2388_v1, 4  ;;  %v2410_v48 = vadd.f32 %v2409_v3, %v2403_v39 }
 0x198   : > { %v2390_v51 = vadd.f32 %v2389_v5, %v2388_v1  ;;  %v2411_v57 = vrot.slane %v2410_v48, 4 }
 0x19a   : > { %v2391_v45 = vrot.slane %v2390_v51, 2  ;;  %v2412_v49 = vadd.f32 %v2411_v57, %v2410_v48 }
 0x19c   : > { %v2392_v31 = vadd.f32 %v2391_v45, %v2390_v51  ;;  %v2413_v7 = vrot.slane %v2412_v49, 2 }
 0x19e   : > { %v2393_v8 = vrot.slane %v2392_v31, 1  ;;  %v2414_v10 = vadd.f32 %v2413_v7, %v2412_v49 }
 0x1a0   : > { %v2394_v11 = vadd.f32 %v2393_v8, %v2392_v31  ;;  %v2415_v50 = vrot.slane %v2414_v10, 1 }
 0x1a2   : > { %2395 = vst [vmem:[%s243_s26] sm:$0x1] %v2394_v11  ;;  %v2416_v38 = vadd.f32 %v2415_v50, %v2414_v10 }
 0x1a4   : > { %2417 = vst [vmem:[%s243_s26 + $0x1] sm:$0x1] %v2416_v38 }
 0x1a5 PF: > { %s15_s19 = sadd.s32 1, %s3213_s19   ;;  %s3986_s15 = smov %s3205_s17 }
 0x1a6   : > { %p12_p12 = scmp.ge.s32.totalorder %s15_s19, 10   ;;  %s3987_s16 = smov %s3209_s18 }
 0x1a7   : > { %s3988_s17 = smov %s3991_s20  ;;  %s3989_s18 = smov %s3995_s21 }
 0x1a8   :  { %14 = sbr.rel (!%p12_p12) target bundleno = 3 (0x3), region = 80 }

// kernel: basic_block1_forward.3
= control target key start
LH: loop header
LB: loop body
LE: loop exit
PB: predicated region body
PF: predicated region fallthrough
CT: control target
= control target key end

     0   :  { %s3065_s12 = smov 0   ;;  %s3067_s13 = smov 0   ;;  %s3695_s0 = inlined_call_operand.vmem [shape: bf16[2,16,16,128], index: 0, kind: input, shape index: {}]   ;;  %s3696_s1 = inlined_call_operand.vmem [shape: bf16[1152,128], index: 1, kind: input, shape index: {}]   ;;  %s3697_s2 = inlined_call_operand.vmem [shape: bf16[2,16,16,128], index: 2, kind: output, shape index: {0}]   ;;  %s3698_s3 = inlined_call_operand.vmem [shape: f32[2,4,2,128], index: 3, kind: output, shape index: {1}]  }
   0x1   :  { %s3069_s14 = smov 0   ;;  %s3071_s15 = smov 0  }
   0x2   :  { %s3073_s16 = smov 0  }
   0x3 LB: > { %s23_s17 = sadd.s32 1, %s3035_s14  ;;  %s26_s18 = sadd.s32 1, %s3039_s15  ;;  %s3043_s16 = sphi %s3073_s16, %s14_s16   ;;  %s3039_s15 = sphi %s3071_s15, %s3729_s15   ;;  %s3035_s14 = sphi %s3069_s14, %s3728_s14   ;;  %s3031_s13 = sphi %s3067_s13, %s3727_s13   ;;  %s3027_s12 = sphi %s3065_s12, %s3726_s12  }
   0x4   : > { %p24_p0 = scmp.ge.s32.totalorder %s23_s17, 4  ;;  %p2446_p1 = scmp.ge.s32.totalorder %s3043_s16, 1 }
   0x5   : > { %p156_p2 = scmp.lt.s32.totalorder %s3043_s16, 9 }
   0x6   : > { %s3731_s17 = smov (%p24_p0, %s23_s17), 0  ;;  %s3733_s18 = smov (!%p24_p0, %s26_s18), %s3039_s15 }
   0x7   : > { %p157_p3 = pnand %p2446_p1, %p156_p2  ;;  %p28_p4 = scmp.ge.s32.totalorder %s3733_s18, 2 }
   0x9   : > { %s3735_s18 = smov (%p28_p4, %s3733_s18), 0  ;;  %160 = sbr.rel (%p157_p3) target bundleno = 410 (0x19a), region = 28 }
   0xe   : > { %v2881_v0 = vld [vmem:[%s3696_s1 + $0xf8] sm:$0xff]   ;;  %v2885_v4 = vld [vmem:[%s3696_s1 + $0xf0] sm:$0xff]   ;;  %v2889_v8 = vld [vmem:[%s3696_s1 + $0xe8] sm:$0xff]   ;;  %s3136_s23 = sshll.u32 %s3027_s12, 2  ;;  %p193_p5 = scmp.lt.s32.totalorder %s3031_s13, 1  ;;  %vm258_vm0 = vcmask 1040384  }
   0xf   : > { %v2882_v1 = vld [vmem:[%s3696_s1 + $0xb8] sm:$0xff]   ;;  %2669 = vmatprep.subr.bf16.mxu1 %v2881_v0  ;;  %v2886_v5 = vld [vmem:[%s3696_s1 + $0xb0] sm:$0xff]   ;;  %v2890_v9 = vld [vmem:[%s3696_s1 + $0xa8] sm:$0xff]   ;;  %s2458_s30 = sadd.s32 4294967295, %s3136_s23  ;;  %s2595_s7 = sshll.u32 %s3027_s12, 5  ;;  %vm321_vm1 = vcmask 1043456  }
  0x10   : > { %v2883_v2 = vld [vmem:[%s3696_s1 + $0x78] sm:$0xff]   ;;  %2670 = vmatpush3.bf16.msra.mxu1 %v2882_v1  ;;  %v2887_v6 = vld [vmem:[%s3696_s1 + $0x70] sm:$0xff]   ;;  %v2891_v10 = vld [vmem:[%s3696_s1 + $0x68] sm:$0xff]   ;;  %p231_p6 = scmp.gt.s32.totalorder %s2458_s30, 0  ;;  %s3737_s13 = smov (!%p193_p5, %s3031_s13), 1  ;;  %vm634_vm10 = vcmask 1042432  }
  0x11   : > { %v2884_v3 = vld [vmem:[%s3696_s1 + $0x38] sm:$0xff]   ;;  %2629 = vmatprep.subr.bf16.mxu0 %v2883_v2  ;;  %2671 = vmatprep.subr.bf16.mxu1 %v2885_v4  ;;  %v2888_v7 = vld [vmem:[%s3696_s1 + $0x30] sm:$0xff]   ;;  %v2892_v11 = vld [vmem:[%s3696_s1 + $0x28] sm:$0xff]   ;;  %s2593_s28 = sshll.u32 %s3737_s13, 7  ;;  %p246_p7 = scmp.eq.s32.totalorder %s3027_s12, 0  ;;  %vm635_vm11 = vcmask 1046532  }
  0x12   : > { %2630 = vmatpush3.bf16.msra.mxu0 %v2884_v3  ;;  %v2893_v12 = vld [vmem:[%s3696_s1 + $0xe0] sm:$0xff]   ;;  %v2897_v16 = vld [vmem:[%s3696_s1 + $0xd8] sm:$0xff]   ;;  %v2901_v20 = vld [vmem:[%s3696_s1 + $0xd0] sm:$0xff]   ;;  %s3739_s30 = smov (!%p231_p6, %s2458_s30), 0  ;;  %s3190_s19 = scalar_lea.vmem %s3695_s0, %s2593_s28  ;;  %vm259_vm2 = vsmask.f32 256 }
  0x13   : > { %2631 = vmatprep.subr.bf16.mxu0 %v2887_v6  ;;  %v2894_v13 = vld [vmem:[%s3696_s1 + $0xa0] sm:$0xff]   ;;  %v2898_v17 = vld [vmem:[%s3696_s1 + $0x98] sm:$0xff]   ;;  %v2902_v21 = vld [vmem:[%s3696_s1 + $0x90] sm:$0xff]   ;;  %s2596_s20 = sshll.u32 %s3739_s30, 3  ;;  %s3199_s26 = scalar_lea.vmem %s3190_s19, %s2595_s7  ;;  %vm279_vm4 = vsmask.f32 7938 }
  0x14   : > { %2672 = vmatpush3.bf16.msra.mxu1 %v2886_v5  ;;  %v2895_v14 = vld [vmem:[%s3696_s1 + $0x60] sm:$0xff]   ;;  %v2899_v18 = vld [vmem:[%s3696_s1 + $0x58] sm:$0xff]   ;;  %v2903_v22 = vld [vmem:[%s3696_s1 + $0x50] sm:$0xff]   ;;  %s235_s30 = scalar_lea.vmem %s3190_s19, %s2596_s20  ;;  %vm299_vm6 = vsmask.f32 4368  ;;  %s238_s8 = sadd.s32 4, %s3136_s23 }
  0x15   : > { %2673 = vmatprep.subr.bf16.mxu1 %v2889_v8  ;;  %v2896_v15 = vld [vmem:[%s3696_s1 + $0x20] sm:$0xff]   ;;  %v2900_v19 = vld [vmem:[%s3696_s1 + $0x18] sm:$0xff]   ;;  %v2904_v23 = vld [vmem:[%s3696_s1 + $0x10] sm:$0xff]   ;;  %s247_s7 = scalar_select %p246_p7, 1, 0 }
  0x16   : > { %2632 = vmatpush3.bf16.msra.mxu0 %v2888_v7  ;;  %v2905_v24 = vld [vmem:[%s3696_s1 + $0xc8] sm:$0xff]   ;;  %v2909_v28 = vld [vmem:[%s3696_s1 + $0xc0] sm:$0xff]   ;;  %vm3216_vm3 = vmand %vm258_vm0, %vm259_vm2  ;;  %vm495_vm12 = vsmask.f32 3328  ;;  %vm496_vm13 = vsmask.f32 7440 }
  0x17   : > { %2633 = vmatprep.subr.bf16.mxu0 %v2891_v10  ;;  %v2906_v25 = vld [vmem:[%s3696_s1 + $0x88] sm:$0xff]   ;;  %v2910_v29 = vld [vmem:[%s3696_s1 + $0x80] sm:$0xff]   ;;  %v248_v38 = vstv %s247_s7  ;;  %vm3226_vm5 = vmand %vm258_vm0, %vm279_vm4  ;;  %p3424_p8 = scmp.lt.s32.totalorder %s238_s8, 15  ;;  %p252_p9 = scmp.eq.s32.totalorder %s3027_s12, 3 }
  0x18   : > { %2674 = vmatpush3.bf16.msra.mxu1 %v2890_v9  ;;  %v2907_v26 = vld [vmem:[%s3696_s1 + $0x48] sm:$0xff]   ;;  %v2911_v30 = vld [vmem:[%s3696_s1 + $0x40] sm:$0xff]   ;;  %vm249_vm7 = vcmp.eq.s32.totalorder %v248_v38, 1  ;;  %v2916_v55 = vld [vmem:[%s3696_s1 + $0x1f8] sm:$0xff]   ;;  %p201_p10 = scmp.lt.s32.totalorder %s3136_s23, 15  ;;  %s2451_s7 = sshll.u32 %s3737_s13, 5 }
  0x19   : > { %2675 = vmatprep.subr.bf16.mxu1 %v2893_v12  ;;  %v2908_v27 = vld [vmem:[%s3696_s1 + $0x8] sm:$0xff]   ;;  %v222_v31 = vld [vmem:[%s3199_s26] sm:$0xf]  ;;  %v223_v32 = vld [vmem:[%s3199_s26 + $0x4] sm:$0xf]  ;;  %s3741_s8 = smov (!%p3424_p8, %s238_s8), 15 }
  0x1a   : > { %2634 = vmatpush3.bf16.msra.mxu0 %v2892_v11  ;;  %v236_v33 = vld [vmem:[%s235_s30] sm:$0xf]  ;;  %v237_v34 = vld [vmem:[%s235_s30 + $0x4] sm:$0xf]  ;;  %v264_v37 = vld [vmem:[#allocation2 + $0xc] sm:$0x1] }
  0x1b   : > { %2635 = vmatprep.subr.bf16.mxu0 %v2895_v14  ;;  %v261_v36 = vld [vmem:[#allocation2] sm:$0x1]  ;;  %v265_v40 = vsel %vm3216_vm3, 0, %v264_v37  ;;  %v281_v42 = vld [vmem:[#allocation2 + $0x8] sm:$0x1]  ;;  %v359_v44 = vshrl.u32 %v222_v31, 16  ;;  %vm3242_vm8 = vmor %vm259_vm2, %vm299_vm6 }
  0x1c   : > { %2676 = vmatpush3.bf16.msra.mxu1 %v2894_v13  ;;  %v262_v39 = vsel %vm3216_vm3, 0, %v261_v36  ;;  %266 = vst [vmem:[#allocation2 + $0xc] sm:$0x1] %v265_v40  ;;  %v282_v43 = vsel %vm3226_vm5, 0, %v281_v42  ;;  %v362_v45 = vshll.u32 %v222_v31, 16  ;;  %v250_v46 = vsel %vm249_vm7, 0, %v236_v33  ;;  %vm3248_vm9 = vmand %vm321_vm1, %vm279_vm4 }
  0x1d   : > { %2677 = vmatprep.subr.bf16.mxu1 %v2897_v16  ;;  %263 = vst [vmem:[#allocation2] sm:$0x1] %v262_v39  ;;  %v251_v47 = vsel %vm249_vm7, 0, %v237_v34  ;;  %283 = vst [vmem:[#allocation2 + $0x8] sm:$0x1] %v282_v43  ;;  %v367_v48 = vshrl.u32 %v223_v32, 16 }
  0x1e   : > { %2636 = vmatpush3.bf16.msra.mxu0 %v2896_v15  ;;  %v370_v49 = vshll.u32 %v223_v32, 16  ;;  %v302_v50 = vshrl.u32 %v250_v46, 16  ;;  %v305_v51 = vshll.u32 %v250_v46, 16  ;;  %v310_v52 = vshrl.u32 %v251_v47, 16  ;;  %v2915_v54 = vld [vmem:[%s3696_s1] sm:$0xff]   ;;  %v2921_v1 = vld [vmem:[%s3696_s1 + $0x178] sm:$0xff]   ;;  %vm3273_vm14 = vmor %vm634_vm10, %vm635_vm11 }
  0x1f   : > { %2637 = vmatprep.subr.bf16.mxu0 %v2899_v18  ;;  %v313_v53 = vshll.u32 %v251_v47, 16  ;;  %v361_v56 = vrot.slane %v359_v44, 7  ;;  %v3238_v57 = vrot.slane %v367_v48, 7  ;;  %v224_v14 = vld [vmem:[%s3199_s26 + $0x8] sm:$0xf]  ;;  %vm3290_vm15 = vmor %vm495_vm12, %vm496_vm13  ;;  %s2597_s25 = sshll.u32 %s3741_s8, 3 }
  0x20   : > { %2678 = vmatpush3.bf16.msra.mxu1 %v2898_v17  ;;  %v304_v59 = vrot.slane %v302_v50, 7  ;;  %v312_v60 = vrot.slane %v310_v52, 7  ;;  %v225_v15 = vld [vmem:[%s3199_s26 + $0xc] sm:$0xf]  ;;  %v267_v16 = vld [vmem:[#allocation2 + $0x18] sm:$0x1]  ;;  %s243_s4 = scalar_lea.vmem %s3190_s19, %s2597_s25 }
  0x21   : > { %2679 = vmatprep.subr.bf16.mxu1 %v2901_v20  ;;  %v364_v62 = vor.u32 %v362_v45, %v361_v56  ;;  %v365_v63 = vrot.slane %v361_v56, 4  ;;  %v372_v0 = vor.u32 %v370_v49, %v3238_v57  ;;  %v284_v17 = vld [vmem:[#allocation2 + $0x14] sm:$0x1]  ;;  %v374_v18 = vrot.slane %v3238_v57, 4  ;;  %s3468_s9 = scalar_select %p252_p9, 1, 0 }
  0x22   : > { %2638 = vmatpush3.bf16.msra.mxu0 %v2900_v19  ;;  %v307_v2 = vor.u32 %v305_v51, %v304_v59  ;;  %v308_v3 = vrot.slane %v304_v59, 4  ;;  %v315_v4 = vor.u32 %v313_v53, %v312_v60  ;;  %v317_v5 = vrot.slane %v312_v60, 4  ;;  %v3587_v41 = vld [vmem:[%s3696_s1 + $0x200] sm:$0xff]   ;;  %s3743_s23 = smov (!%p201_p10, %s3136_s23), 15  ;;  %p211_p11 = scmp.lt.s32.totalorder %s3027_s12, 3 }
  0x23   : > { %2639 = vmatprep.subr.bf16.mxu0 %v2903_v22  ;;  %v373_v7 = vsel %vm3242_vm8, %v365_v63, %v372_v0  ;;  %v439_v8 = vld [vmem:[#allocation2 + $0xc] sm:$0xf]  ;;  %v268_v19 = vsel %vm3216_vm3, 0, %v267_v16  ;;  %v285_v20 = vsel %vm3226_vm5, 0, %v284_v17  ;;  %s2450_s6 = sshll.u32 %s3743_s23, 1  ;;  %s2453_s21 = sshll.u32 %s3737_s13, 2 }
  0x24   : > { %2680 = vmatpush3.bf16.msra.mxu1 %v2902_v21  ;;  %v323_v6 = vld [vmem:[#allocation2] sm:$0xf]  ;;  %v316_v9 = vsel %vm3242_vm8, %v308_v3, %v315_v4  ;;  %v327_v11 = vld [vmem:[#allocation2 + $0x8] sm:$0x1]  ;;  %v440_v12 = vsel %vm3248_vm9, %v364_v62, %v439_v8  ;;  %442 = vst [vmem:[#allocation2 + $0x10] sm:$0xf] %v373_v7 }
  0x25   : > { %2681 = vmatprep.subr.bf16.mxu1 %v2905_v24  ;;  %v324_v10 = vsel %vm3248_vm9, %v307_v2, %v323_v6  ;;  %326 = vst [vmem:[#allocation2 + $0x4] sm:$0xf] %v316_v9  ;;  %v328_v13 = vsel %vm3216_vm3, %v317_v5, %v327_v11  ;;  %441 = vst [vmem:[#allocation2 + $0xc] sm:$0xf] %v440_v12  ;;  %v376_v21 = vshrl.u32 %v224_v14, 16  ;;  %s3745_s12 = smov (!%p211_p11, %s3027_s12), 3 }
  0x26   : > { %2640 = vmatpush3.bf16.msra.mxu0 %v2904_v23  ;;  %325 = vst [vmem:[#allocation2] sm:$0xf] %v324_v10  ;;  %329 = vst [vmem:[#allocation2 + $0x8] sm:$0x1] %v328_v13  ;;  %s214_s22 = sadd.s32 %s2453_s21, %s3745_s12 }
  0x27   : > { %2641 = vmatprep.subr.bf16.mxu0 %v2907_v26  ;;  %269 = vst [vmem:[#allocation2 + $0x18] sm:$0x1] %v268_v19  ;;  %286 = vst [vmem:[#allocation2 + $0x14] sm:$0x1] %v285_v20  ;;  %v378_v24 = vrot.slane %v376_v21, 7  ;;  %v384_v26 = vshrl.u32 %v225_v15, 16 }
  0x28   : > { %2682 = vmatpush3.bf16.msra.mxu1 %v2906_v25  ;;  %v379_v25 = vshll.u32 %v224_v14, 16  ;;  %v2923_v21 = vld [vmem:[%s3696_s1 + $0x1f0] sm:$0xff]   ;;  %s2454_s24 = sshll.u32 %s214_s22, 1 }
  0x29   : > { %2683 = vmatprep.subr.bf16.mxu1 %v2909_v28  ;;  %v382_v39 = vrot.slane %v378_v24, 4  ;;  %s216_s28 = scalar_lea.vmem %s3698_s3, %s2454_s24 }
  0x2a   : > { %2642 = vmatpush3.bf16.msra.mxu0 %v2908_v27  ;;  %v387_v27 = vshll.u32 %v225_v15, 16  ;;  %v381_v46 = vor.u32 %v379_v25, %v378_v24  ;;  %v2917_v15 = vld [vmem:[%s3696_s1 + $0x1b8] sm:$0xff]  }
  0x2b   : > { %2643 = vmatprep.subr.bf16.mxu0 %v2911_v30  ;;  %v682_v23 = vld [vmem:[#allocation2 + $0x10] sm:$0xf] }
  0x2c   : > { %2684 = vmatpush3.bf16.msra.mxu1 %v2910_v29  ;;  %v611_v29 = vld [vmem:[#allocation2 + $0x4] sm:$0xf]  ;;  %v681_v30 = vld [vmem:[#allocation2 + $0xc] sm:$0xf]  ;;  %690 = vst [vmem:[#allocation3 + $0x30] sm:$0xf] %v682_v23 }
  0x2d   : > { %2749 = vmatprep.subr.bf16.mxu1 %v2916_v55  ;;  %v610_v28 = vld [vmem:[#allocation2] sm:$0xe]  ;;  %v612_v31 = vld [vmem:[#allocation2 + $0x8] sm:$0x1]  ;;  %v639_v33 = vrot.slane %v611_v29, 5  ;;  %v3281_v55 = vrot.slane %v384_v26, 7 }
  0x2e   : > { %2644 = vmatpush3.bf16.msra.mxu0 %v2915_v54  ;;  %v2463_v32 = vrot.slane %v610_v28, 9  ;;  %689 = vst [vmem:[#allocation3 + $0xc] sm:$0xf] %v681_v30  ;;  %v467_v34 = vld [vmem:[#allocation2] sm:$0xf]  ;;  %v642_v36 = vrot.slane %v612_v31, 5 }
  0x2f   : > { %2709 = vmatprep.subr.bf16.mxu0 %v2921_v1  ;;  %v468_v37 = vld [vmem:[#allocation2 + $0x4] sm:$0xf]  ;;  %475 = vst [vmem:[#allocation3] sm:$0xf] %v467_v34  ;;  %v483_v38 = vld [vmem:[#allocation2] sm:$0xf]  ;;  %v389_v0 = vor.u32 %v387_v27, %v3281_v55 }
  0x30   : > { %v640_v40 = vsel %vm3273_vm14, %v2463_v32, %v639_v33  ;;  %v641_v42 = vrot.slane %v639_v33, 4  ;;  %476 = vst [vmem:[#allocation3 + $0x24] sm:$0xf] %v468_v37  ;;  %v484_v43 = vld [vmem:[#allocation2 + $0x4] sm:$0xf]  ;;  %v499_v45 = vshrl.u32 %v483_v38, 16 }
  0x31   : > { %v485_v44 = vld [vmem:[#allocation2 + $0x8] sm:$0x1]  ;;  %v614_v47 = vld [vmem:[#allocation2 + $0x10] sm:$0xf]  ;;  %673 = vst [vmem:[#allocation3 + $0x8] sm:$0xf] %v640_v40  ;;  %v390_v8 = vsel %vm3242_vm8, %v382_v39, %v389_v0 }
  0x32   : > { %v502_v48 = vshll.u32 %v483_v38, 16  ;;  %v508_v49 = vshll.u32 %v484_v43, 16  ;;  %v512_v50 = vshrl.u32 %v484_v43, 16  ;;  %v518_v51 = vshll.u32 %v485_v44, 16  ;;  %v613_v52 = vld [vmem:[#allocation2 + $0xc] sm:$0xe] }
  0x33   : > { %v643_v53 = vsel %vm3273_vm14, %v641_v42, %v642_v36  ;;  %v501_v54 = vrot.slane %v499_v45, 4  ;;  %v443_v56 = vld [vmem:[#allocation2 + $0x14] sm:$0x1]  ;;  %v446_v57 = vld [vmem:[#allocation2 + $0x18] sm:$0xf]  ;;  %v2464_v6 = vrot.slane %v613_v52, 9 }
  0x34   : > { %674 = vst [vmem:[#allocation3 + $0x2c] sm:$0xf] %v643_v53  ;;  %v504_v59 = vrot.slane %v502_v48, 5  ;;  %v510_v60 = vrot.slane %v508_v49, 5  ;;  %v514_v62 = vrot.slane %v512_v50, 4  ;;  %v520_v63 = vrot.slane %v518_v51, 5 }
  0x35   : > { %v444_v1 = vsel %vm3216_vm3, %v374_v18, %v443_v56  ;;  %v447_v2 = vsel %vm3248_vm9, %v381_v46, %v446_v57  ;;  %v646_v7 = vrot.slane %v614_v47, 5  ;;  %v469_v9 = vld [vmem:[#allocation2 + $0xc] sm:$0xf]  ;;  %v470_v10 = vld [vmem:[#allocation2 + $0x10] sm:$0xf]  ;;  %v2922_v48 = vld [vmem:[%s3696_s1 + $0x138] sm:$0xff]  }
  0x36   : > { %v505_v4 = vor.u32 %v504_v59, %v501_v54  ;;  %v515_v5 = vor.u32 %v514_v62, %v510_v60  ;;  %445 = vst [vmem:[#allocation2 + $0x14] sm:$0x1] %v444_v1  ;;  %448 = vst [vmem:[#allocation2 + $0x18] sm:$0xf] %v447_v2  ;;  %v486_v14 = vld [vmem:[#allocation2 + $0xc] sm:$0xf] }
  0x37   : > { %449 = vst [vmem:[#allocation2 + $0x1c] sm:$0xf] %v390_v8  ;;  %v647_v13 = vsel %vm3273_vm14, %v2464_v6, %v646_v7  ;;  %477 = vst [vmem:[#allocation3 + $0x48] sm:$0xf] %v469_v9  ;;  %v487_v16 = vld [vmem:[#allocation2 + $0x10] sm:$0xf] }
  0x38   : > { %v506_v11 = vrot.slane %v505_v4, 4  ;;  %v516_v12 = vrot.slane %v515_v5, 4  ;;  %478 = vst [vmem:[#allocation3 + $0x6c] sm:$0xf] %v470_v10  ;;  %675 = vst [vmem:[#allocation3 + $0x50] sm:$0xf] %v647_v13 }
  0x39   : > { %v523_v17 = vshrl.u32 %v486_v14, 16  ;;  %v526_v18 = vshll.u32 %v486_v14, 16  ;;  %v532_v23 = vshll.u32 %v487_v16, 16  ;;  %v536_v24 = vshrl.u32 %v487_v16, 16  ;;  %v2914_v26 = vld [vmem:[#allocation3 + $0xc] ss:$36 sps:$4 sm:$0xff]  }
  0x3a   : > { %v511_v19 = vsel %vm3290_vm15, %v506_v11, %v510_v60  ;;  %v521_v20 = vsel %vm3290_vm15, %v516_v12, %v520_v63  ;;  %v648_v28 = vrot.slane %v646_v7, 4  ;;  %1995 = vmatprep.mubr.bf16.mxu1 %v2914_v26  ;;  %v2924_v32 = vld [vmem:[%s3696_s1 + $0x1b0] sm:$0xff]   ;;  %v2930_v44 = vld [vmem:[%s3696_s1 + $0x1e8] sm:$0xff]   ;;  %v270_v52 = vld [vmem:[#allocation2 + $0x24] sm:$0x1] }
  0x3b   : > { %v2912_v25 = vld [vmem:[#allocation3 + $0x8] ss:$36 sps:$4 sm:$0xff]   ;;  %602 = vst [vmem:[#allocation3 + $0x4] sm:$0xf] %v511_v19  ;;  %603 = vst [vmem:[#allocation3 + $0x28] sm:$0xf] %v521_v20 }
  0x3c   : > { %v525_v27 = vrot.slane %v523_v17, 4  ;;  %v528_v29 = vrot.slane %v526_v18, 5  ;;  %v534_v30 = vrot.slane %v532_v23, 5  ;;  %v538_v31 = vrot.slane %v536_v24, 4  ;;  %1996 = vmatmul.mubr.bf16.vlgmr.msra.gmra.mxu1 %v2912_v25  ;;  %v2931_v49 = vld [vmem:[%s3696_s1 + $0x1a8] sm:$0xff]   ;;  %v2927_v54 = vld [vmem:[%s3696_s1 + $0x170] sm:$0xff]  }
  0x3d   : > { %v615_v33 = vld [vmem:[#allocation2 + $0x14] sm:$0x1]  ;;  %v683_v34 = vld [vmem:[#allocation2 + $0x18] sm:$0xf]  ;;  %2750 = vmatpush3.bf16.msra.mxu1 %v2917_v15  ;;  %v226_v50 = vld [vmem:[%s3199_s26 + $0x10] sm:$0xf] }
  0x3e   : > { %v488_v36 = vld [vmem:[#allocation2 + $0x14] sm:$0x1]  ;;  %v649_v37 = vrot.slane %v615_v33, 5  ;;  %691 = vst [vmem:[#allocation3 + $0x54] sm:$0xf] %v683_v34  ;;  %v529_v38 = vor.u32 %v528_v29, %v525_v27  ;;  %v539_v39 = vor.u32 %v538_v31, %v534_v30  ;;  %2751 = vmatprep.subr.bf16.mxu1 %v2923_v21  ;;  %v271_v59 = vsel %vm3216_vm3, 0, %v270_v52 }
  0x3f   : > { %v542_v40 = vshll.u32 %v488_v36, 16  ;;  %v684_v42 = vld [vmem:[#allocation2 + $0x1c] sm:$0xf]  ;;  %v227_v51 = vld [vmem:[%s3199_s26 + $0x14] sm:$0xf]  ;;  %v393_v60 = vshrl.u32 %v226_v50, 16 }
  0x40   : > { %v650_v43 = vsel %vm3273_vm14, %v648_v28, %v649_v37  ;;  %692 = vst [vmem:[#allocation3 + $0x78] sm:$0xf] %v684_v42  ;;  %v530_v45 = vrot.slane %v529_v38, 4  ;;  %v540_v46 = vrot.slane %v539_v39, 4  ;;  %v2918_v53 = vld [vmem:[#allocation3] ss:$36 sps:$4 sm:$0xff]  }
  0x41   : > { %v544_v47 = vrot.slane %v542_v40, 5  ;;  %676 = vst [vmem:[#allocation3 + $0x74] sm:$0xf] %v650_v43  ;;  %2752 = vmatpush3.bf16.msra.mxu1 %v2924_v32  ;;  %v2937_v63 = vld [vmem:[%s3696_s1 + $0x1e0] sm:$0xff]   ;;  %272 = vst [vmem:[#allocation2 + $0x24] sm:$0x1] %v271_v59 }
  0x42   : > { %v535_v56 = vsel %vm3290_vm15, %v530_v45, %v534_v30  ;;  %v2920_v62 = vld [vmem:[#allocation3 + $0x4] ss:$36 sps:$4 sm:$0xff]   ;;  %v287_v0 = vld [vmem:[#allocation2 + $0x20] sm:$0x1]  ;;  %v401_v1 = vshrl.u32 %v227_v51, 16  ;;  %2753 = vmatprep.subr.bf16.mxu1 %v2930_v44  ;;  %v395_v4 = vrot.slane %v393_v60, 7 }
  0x43   : > { %v545_v57 = vsel %vm3290_vm15, %v540_v46, %v544_v47  ;;  %604 = vst [vmem:[#allocation3 + $0x4c] sm:$0xf] %v535_v56  ;;  %v288_v2 = vsel %vm3226_vm5, 0, %v287_v0  ;;  %v396_v5 = vshll.u32 %v226_v50, 16  ;;  %v404_v6 = vshll.u32 %v227_v51, 16  ;;  %1930 = vmatprep.mubr.bf16.mxu0 %v2920_v62  ;;  %v2929_v8 = vld [vmem:[%s3696_s1 + $0x130] sm:$0xff]  }
  0x44   : > { %605 = vst [vmem:[#allocation3 + $0x70] sm:$0xf] %v545_v57  ;;  %v616_v7 = vld [vmem:[#allocation2 + $0x18] sm:$0xe]  ;;  %289 = vst [vmem:[#allocation2 + $0x20] sm:$0x1] %v288_v2  ;;  %1931 = vmatmul.mubr.bf16.vlgmr.msra.gmra.mxu0 %v2918_v53 }
  0x45   : > { %v3341_v9 = vrot.slane %v401_v1, 7  ;;  %v3343_v10 = vld [vmem:[#allocation2 + $0x1c] sm:$0xf]  ;;  %v2465_v11 = vrot.slane %v616_v7, 9  ;;  %v2934_v12 = vld [vmem:[%s3696_s1 + $0x168] sm:$0xff]   ;;  %v399_v13 = vrot.slane %v395_v4, 4  ;;  %2710 = vmatpush3.bf16.msra.mxu0 %v2922_v48  ;;  %2754 = vmatpush3.bf16.msra.mxu1 %v2931_v49  ;;  %v398_v20 = vor.u32 %v396_v5, %v395_v4 }
  0x46   : > { %v653_v14 = vrot.slane %v3343_v10, 5  ;;  %v2938_v15 = vld [vmem:[%s3696_s1 + $0x1a0] sm:$0xff]   ;;  %v391_v17 = vrot.slane %v3281_v55, 4  ;;  %2711 = vmatprep.subr.bf16.mxu0 %v2927_v54  ;;  %2755 = vmatprep.subr.bf16.mxu1 %v2937_v63  ;;  %v2944_v23 = vld [vmem:[%s3696_s1 + $0x1d8] sm:$0xff]   ;;  %v2936_v24 = vld [vmem:[%s3696_s1 + $0x128] sm:$0xff]  }
  0x47   : > { %v406_v16 = vor.u32 %v404_v6, %v3341_v9  ;;  %v2925_v18 = vld [vmem:[#allocation3 + $0x54] ss:$36 sps:$4 sm:$0xff]   ;;  %v2935_v27 = vld [vmem:[#allocation3 + $0x48] ss:$36 sps:$4 sm:$0xff]   ;;  %v471_v32 = vld [vmem:[#allocation2 + $0x18] sm:$0xf] }
  0x48   : > { %v2928_v19 = vld [vmem:[#allocation3 + $0x50] ss:$36 sps:$4 sm:$0xff]   ;;  %v654_v21 = vsel %vm3273_vm14, %v2465_v11, %v653_v14  ;;  %2003 = vmatprep.mubr.bf16.mxu1 %v2925_v18  ;;  %v2941_v26 = vld [vmem:[%s3696_s1 + $0x160] sm:$0xff]   ;;  %479 = vst [vmem:[#allocation3 + $0x90] sm:$0xf] %v471_v32  ;;  %v2951_v53 = vld [vmem:[%s3696_s1 + $0x1d0] sm:$0xff]  }
  0x49   : > { %v407_v25 = vsel %vm3242_vm8, %v399_v13, %v406_v16  ;;  %677 = vst [vmem:[#allocation3 + $0x98] sm:$0xf] %v654_v21  ;;  %2004 = vmatmul.mubr.bf16.gmra.mxu1 %v2928_v19  ;;  %2712 = vmatpush3.bf16.msra.mxu0 %v2929_v8  ;;  %v453_v28 = vld [vmem:[#allocation2 + $0x24] sm:$0xf]  ;;  %v2945_v31 = vld [vmem:[%s3696_s1 + $0x198] sm:$0xff]   ;;  %v655_v54 = vrot.slane %v653_v14, 4 }
  0x4a   : > { %456 = vst [vmem:[#allocation2 + $0x28] sm:$0xf] %v407_v25  ;;  %2713 = vmatprep.subr.bf16.mxu0 %v2934_v12  ;;  %v454_v30 = vsel %vm3248_vm9, %v398_v20, %v453_v28  ;;  %2756 = vmatpush3.bf16.msra.mxu1 %v2938_v15  ;;  %v2943_v34 = vld [vmem:[%s3696_s1 + $0x120] sm:$0xff]   ;;  %v472_v36 = vld [vmem:[#allocation2 + $0x1c] sm:$0xf]  ;;  %v2952_v56 = vld [vmem:[%s3696_s1 + $0x190] sm:$0xff]  }
  0x4b   : > { %v2932_v55 = vld [vmem:[#allocation3 + $0x4c] ss:$36 sps:$4 sm:$0xff]   ;;  %v450_v29 = vld [vmem:[#allocation2 + $0x20] sm:$0x1]  ;;  %455 = vst [vmem:[#allocation2 + $0x24] sm:$0xf] %v454_v30  ;;  %2757 = vmatprep.subr.bf16.mxu1 %v2944_v23 }
  0x4c   : > { %1938 = vmatprep.mubr.bf16.mxu0 %v2932_v55  ;;  %v451_v33 = vsel %vm3216_vm3, %v391_v17, %v450_v29  ;;  %v489_v37 = vld [vmem:[#allocation2 + $0x18] sm:$0xf]  ;;  %v490_v38 = vld [vmem:[#allocation2 + $0x1c] sm:$0xf]  ;;  %480 = vst [vmem:[#allocation3 + $0xb4] sm:$0xf] %v472_v36 }
  0x4d   : > { %1939 = vmatmul.mubr.bf16.gmra.mxu0 %v2935_v27  ;;  %452 = vst [vmem:[#allocation2 + $0x20] sm:$0x1] %v451_v33  ;;  %v547_v39 = vshrl.u32 %v489_v37, 16  ;;  %v550_v40 = vshll.u32 %v489_v37, 16  ;;  %v556_v42 = vshll.u32 %v490_v38, 16  ;;  %v560_v43 = vshrl.u32 %v490_v38, 16 }
  0x4e   : > { %2714 = vmatpush3.bf16.msra.mxu0 %v2936_v24  ;;  %v2948_v44 = vld [vmem:[%s3696_s1 + $0x158] sm:$0xff]   ;;  %2758 = vmatpush3.bf16.msra.mxu1 %v2945_v31  ;;  %v273_v2 = vld [vmem:[#allocation2 + $0x30] sm:$0x1]  ;;  %v290_v8 = vld [vmem:[#allocation2 + $0x2c] sm:$0x1]  ;;  %v408_v30 = vrot.slane %v3341_v9, 4 }
  0x4f   : > { %2715 = vmatprep.subr.bf16.mxu0 %v2941_v26  ;;  %v549_v45 = vrot.slane %v547_v39, 4  ;;  %v552_v46 = vrot.slane %v550_v40, 5  ;;  %v558_v47 = vrot.slane %v556_v42, 5  ;;  %v562_v48 = vrot.slane %v560_v43, 4  ;;  %v2950_v50 = vld [vmem:[%s3696_s1 + $0x118] sm:$0xff]   ;;  %2759 = vmatprep.subr.bf16.mxu1 %v2951_v53  ;;  %v2955_v10 = vld [vmem:[%s3696_s1 + $0x150] sm:$0xff]  }
  0x50   : > { %v228_v57 = vld [vmem:[%s3199_s26 + $0x18] sm:$0xf]  ;;  %v229_v63 = vld [vmem:[%s3199_s26 + $0x1c] sm:$0xf]  ;;  %v274_v7 = vsel %vm3216_vm3, 0, %v273_v2  ;;  %v291_v11 = vsel %vm3226_vm5, 0, %v290_v8 }
  0x51   : > { %v686_v49 = vld [vmem:[#allocation2 + $0x28] sm:$0xf]  ;;  %v553_v51 = vor.u32 %v552_v46, %v549_v45  ;;  %v563_v52 = vor.u32 %v562_v48, %v558_v47  ;;  %275 = vst [vmem:[#allocation2 + $0x30] sm:$0x1] %v274_v7  ;;  %v410_v12 = vshrl.u32 %v228_v57, 16  ;;  %v413_v13 = vshll.u32 %v228_v57, 16 }
  0x52   : > { %694 = vst [vmem:[#allocation3 + $0xc0] sm:$0xf] %v686_v49  ;;  %2716 = vmatpush3.bf16.msra.mxu0 %v2943_v34  ;;  %v685_v59 = vld [vmem:[#allocation2 + $0x24] sm:$0xf]  ;;  %2760 = vmatpush3.bf16.msra.mxu1 %v2952_v56  ;;  %v418_v14 = vshrl.u32 %v229_v63, 16  ;;  %v421_v18 = vshll.u32 %v229_v63, 16 }
  0x53   : > { %v554_v60 = vrot.slane %v553_v51, 4  ;;  %v564_v62 = vrot.slane %v563_v52, 4  ;;  %2717 = vmatprep.subr.bf16.mxu0 %v2948_v44  ;;  %693 = vst [vmem:[#allocation3 + $0x9c] sm:$0xf] %v685_v59  ;;  %v619_v15 = vld [vmem:[#allocation2 + $0x24] sm:$0xe] }
  0x54   : > { %v618_v0 = vld [vmem:[#allocation2 + $0x20] sm:$0x1]  ;;  %292 = vst [vmem:[#allocation2 + $0x2c] sm:$0x1] %v291_v11  ;;  %v620_v19 = vld [vmem:[#allocation2 + $0x28] sm:$0xf] }
  0x55   : > { %v491_v1 = vld [vmem:[#allocation2 + $0x20] sm:$0x1]  ;;  %v656_v4 = vrot.slane %v618_v0, 5  ;;  %v559_v5 = vsel %vm3290_vm15, %v554_v60, %v558_v47  ;;  %v2466_v20 = vrot.slane %v619_v15, 9  ;;  %v2957_v21 = vld [vmem:[%s3696_s1 + $0x110] sm:$0xff]   ;;  %v412_v23 = vrot.slane %v410_v12, 7 }
  0x56   : > { %v566_v6 = vshll.u32 %v491_v1, 16  ;;  %606 = vst [vmem:[#allocation3 + $0x94] sm:$0xf] %v559_v5  ;;  %2718 = vmatpush3.bf16.msra.mxu0 %v2950_v50  ;;  %v3405_v24 = vrot.slane %v418_v14, 7  ;;  %v660_v25 = vrot.slane %v620_v19, 5  ;;  %v2958_v55 = vld [vmem:[%s3696_s1 + $0x1c8] sm:$0xff]  }
  0x57   : > { %v657_v16 = vsel %vm3273_vm14, %v655_v54, %v656_v4  ;;  %2719 = vmatprep.subr.bf16.mxu0 %v2955_v10  ;;  %v415_v27 = vor.u32 %v413_v13, %v412_v23  ;;  %v416_v28 = vrot.slane %v412_v23, 4  ;;  %2761 = vmatprep.subr.bf16.mxu1 %v2958_v55  ;;  %v2959_v33 = vld [vmem:[%s3696_s1 + $0x188] sm:$0xff]   ;;  %v473_v34 = vld [vmem:[#allocation2 + $0x24] sm:$0xf]  ;;  %v2949_v53 = vld [vmem:[#allocation3 + $0x90] ss:$36 sps:$4 sm:$0xff]  }
  0x58   : > { %v568_v17 = vrot.slane %v566_v6, 5  ;;  %678 = vst [vmem:[#allocation3 + $0xbc] sm:$0xf] %v657_v16  ;;  %v423_v29 = vor.u32 %v421_v18, %v3405_v24  ;;  %v661_v31 = vsel %vm3273_vm14, %v2466_v20, %v660_v25  ;;  %v474_v36 = vld [vmem:[#allocation2 + $0x28] sm:$0xf]  ;;  %2762 = vmatpush3.bf16.msra.mxu1 %v2959_v33  ;;  %v2965_v0 = vld [vmem:[%s3696_s1 + $0x1c0] sm:$0xff]  }
  0x59   : > { %679 = vst [vmem:[#allocation3 + $0xe0] sm:$0xf] %v661_v31  ;;  %v460_v37 = vld [vmem:[#allocation2 + $0x30] sm:$0xf]  ;;  %481 = vst [vmem:[#allocation3 + $0xd8] sm:$0xf] %v473_v34  ;;  %2763 = vmatprep.subr.bf16.mxu1 %v2965_v0 }
  0x5a   : > { %v569_v26 = vsel %vm3290_vm15, %v564_v62, %v568_v17  ;;  %2720 = vmatpush3.bf16.msra.mxu0 %v2957_v21  ;;  %v424_v32 = vsel %vm3242_vm8, %v416_v28, %v423_v29  ;;  %482 = vst [vmem:[#allocation3 + $0xfc] sm:$0xf] %v474_v36  ;;  %v492_v38 = vld [vmem:[#allocation2 + $0x24] sm:$0xf]  ;;  %v461_v39 = vsel %vm3248_vm9, %v415_v27, %v460_v37  ;;  %v493_v40 = vld [vmem:[#allocation2 + $0x28] sm:$0xf] }
  0x5b   : > { %607 = vst [vmem:[#allocation3 + $0xb8] sm:$0xf] %v569_v26  ;;  %463 = vst [vmem:[#allocation2 + $0x34] sm:$0xf] %v424_v32  ;;  %v457_v9 = vld [vmem:[#allocation2 + $0x2c] sm:$0x1] }
  0x5c   : > { %v571_v42 = vshrl.u32 %v492_v38, 16  ;;  %v574_v43 = vshll.u32 %v492_v38, 16  ;;  %v2939_v44 = vld [vmem:[#allocation3 + $0x9c] ss:$36 sps:$4 sm:$0xff]   ;;  %v458_v46 = vsel %vm3216_vm3, %v408_v30, %v457_v9  ;;  %462 = vst [vmem:[#allocation2 + $0x30] sm:$0xf] %v461_v39 }
  0x5d   : > { %v580_v47 = vshll.u32 %v493_v40, 16  ;;  %459 = vst [vmem:[#allocation2 + $0x2c] sm:$0x1] %v458_v46  ;;  %v584_v50 = vshrl.u32 %v493_v40, 16  ;;  %v2962_v51 = vld [vmem:[%s3696_s1 + $0x148] sm:$0xff]   ;;  %2011 = vmatprep.mubr.bf16.mxu1 %v2939_v44  ;;  %v662_v1 = vrot.slane %v660_v25, 4 }
  0x5e   : > { %v573_v48 = vrot.slane %v571_v42, 4  ;;  %v576_v49 = vrot.slane %v574_v43, 5  ;;  %2721 = vmatprep.subr.bf16.mxu0 %v2962_v51  ;;  %v2964_v59 = vld [vmem:[%s3696_s1 + $0x108] sm:$0xff]   ;;  %v2966_v2 = vld [vmem:[%s3696_s1 + $0x180] sm:$0xff]   ;;  %v890_v11 = vld [vmem:[#allocation2 + $0x18] sm:$0xf] }
  0x5f   : > { %v2942_v45 = vld [vmem:[#allocation3 + $0x98] ss:$36 sps:$4 sm:$0xff]   ;;  %v582_v54 = vrot.slane %v580_v47, 5  ;;  %v586_v57 = vrot.slane %v584_v50, 4  ;;  %2722 = vmatpush3.bf16.msra.mxu0 %v2964_v59  ;;  %2764 = vmatpush3.bf16.msra.mxu1 %v2966_v2  ;;  %v891_v14 = vld [vmem:[#allocation2 + $0x1c] sm:$0xf] }
  0x60   : > { %2012 = vmatmul.mubr.bf16.gmra.mxu1 %v2942_v45  ;;  %v577_v56 = vor.u32 %v576_v49, %v573_v48  ;;  %v2967_v7 = vld [vmem:[%s3696_s1 + $0x140] sm:$0xff]   ;;  %898 = vst [vmem:[#allocation3 + $0x18] sm:$0xf] %v890_v11  ;;  %v906_v15 = vld [vmem:[#allocation2 + $0x18] sm:$0xf] }
  0x61   : > { %v587_v63 = vor.u32 %v586_v57, %v582_v54  ;;  %2723 = vmatprep.subr.bf16.mxu0 %v2967_v7  ;;  %899 = vst [vmem:[#allocation3 + $0x3c] sm:$0xf] %v891_v14  ;;  %v907_v16 = vld [vmem:[#allocation2 + $0x1c] sm:$0xf]  ;;  %v908_v17 = vld [vmem:[#allocation2 + $0x20] sm:$0x1] }
  0x62   : > { %v2946_v52 = vld [vmem:[#allocation3 + $0x94] ss:$36 sps:$4 sm:$0xff]   ;;  %v688_v60 = vld [vmem:[#allocation2 + $0x34] sm:$0xf]  ;;  %v578_v62 = vrot.slane %v577_v56, 4  ;;  %v919_v18 = vshrl.u32 %v906_v15, 16 }
  0x63   : > { %1946 = vmatprep.mubr.bf16.mxu0 %v2946_v52  ;;  %696 = vst [vmem:[#allocation3 + $0x108] sm:$0xf] %v688_v60  ;;  %v687_v4 = vld [vmem:[#allocation2 + $0x30] sm:$0xf]  ;;  %v588_v6 = vrot.slane %v587_v63, 4  ;;  %v922_v19 = vshll.u32 %v906_v15, 16 }
  0x64   : > { %1947 = vmatmul.mubr.bf16.gmra.mxu0 %v2949_v53  ;;  %v583_v5 = vsel %vm3290_vm15, %v578_v62, %v582_v54  ;;  %v621_v8 = vld [vmem:[#allocation2 + $0x2c] sm:$0x1]  ;;  %695 = vst [vmem:[#allocation3 + $0xe4] sm:$0xf] %v687_v4  ;;  %v928_v23 = vshll.u32 %v907_v16, 16  ;;  %v932_v25 = vshrl.u32 %v907_v16, 16 }
  0x65   : > { %v494_v10 = vld [vmem:[#allocation2 + $0x2c] sm:$0x1]  ;;  %608 = vst [vmem:[#allocation3 + $0xdc] sm:$0xf] %v583_v5  ;;  %v663_v12 = vrot.slane %v621_v8, 5  ;;  %v2971_v55 = vld [vmem:[%s3696_s1 + $0x100] sm:$0xff]  }
  0x66   : > { %v590_v13 = vshll.u32 %v494_v10, 16  ;;  %v921_v26 = vrot.slane %v919_v18, 4  ;;  %v924_v27 = vrot.slane %v922_v19, 5  ;;  %v938_v28 = vshll.u32 %v908_v17, 16  ;;  %v3457_v29 = vld [vmem:[%s3696_s1 + $0x238] sm:$0xff]   ;;  %2724 = vmatpush3.bf16.msra.mxu0 %v2971_v55 }
  0x67   : > { %v664_v20 = vsel %vm3273_vm14, %v662_v1, %v663_v12  ;;  %v930_v31 = vrot.slane %v928_v23, 5  ;;  %v934_v32 = vrot.slane %v932_v25, 4  ;;  %2825 = vmatprep.subr.bf16.mxu1 %v3457_v29  ;;  %v697_v36 = vld [vmem:[#allocation2 + $0xc] sm:$0xf]  ;;  %v698_v37 = vld [vmem:[#allocation2 + $0x10] sm:$0xf]  ;;  %2801 = vmatprep.subr.bf16.mxu0 %v3457_v29 }
  0x68   : > { %v592_v21 = vrot.slane %v590_v13, 5  ;;  %680 = vst [vmem:[#allocation3 + $0x104] sm:$0xf] %v664_v20  ;;  %v925_v33 = vor.u32 %v924_v27, %v921_v26  ;;  %v940_v34 = vrot.slane %v938_v28, 5  ;;  %v699_v9 = vld [vmem:[#allocation2 + $0x14] sm:$0x1] }
  0x69   : > { %v935_v38 = vor.u32 %v934_v32, %v930_v31  ;;  %v710_v39 = vshrl.u32 %v697_v36, 16  ;;  %v713_v40 = vshll.u32 %v697_v36, 16  ;;  %v719_v43 = vshll.u32 %v698_v37, 16  ;;  %v821_v46 = vld [vmem:[#allocation2 + $0xc] sm:$0xe] }
  0x6a   : > { %v593_v30 = vsel %vm3290_vm15, %v588_v6, %v592_v21  ;;  %v926_v42 = vrot.slane %v925_v33, 4  ;;  %v723_v44 = vshrl.u32 %v698_v37, 16  ;;  %v729_v45 = vshll.u32 %v699_v9, 16  ;;  %v822_v50 = vld [vmem:[#allocation2 + $0x10] sm:$0xf] }
  0x6b   : > { %609 = vst [vmem:[#allocation3 + $0x100] sm:$0xf] %v593_v30  ;;  %v936_v47 = vrot.slane %v935_v38, 4  ;;  %v712_v48 = vrot.slane %v710_v39, 4  ;;  %v715_v49 = vrot.slane %v713_v40, 5  ;;  %v2467_v51 = vrot.slane %v821_v46, 9 }
  0x6c   : > { %v931_v52 = vsel %vm3290_vm15, %v926_v42, %v930_v31  ;;  %v721_v53 = vrot.slane %v719_v43, 5  ;;  %v725_v54 = vrot.slane %v723_v44, 4  ;;  %v823_v56 = vld [vmem:[#allocation2 + $0x14] sm:$0x1]  ;;  %v2953_v57 = vld [vmem:[#allocation3 + $0xe4] ss:$36 sps:$4 sm:$0xff]  }
  0x6d   : > { %v941_v60 = vsel %vm3290_vm15, %v936_v47, %v940_v34  ;;  %1022 = vst [vmem:[#allocation3 + $0x1c] sm:$0xf] %v931_v52  ;;  %v716_v62 = vor.u32 %v715_v49, %v712_v48  ;;  %v847_v63 = vrot.slane %v822_v50, 5  ;;  %v731_v1 = vrot.slane %v729_v45, 5  ;;  %2019 = vmatprep.mubr.bf16.mxu1 %v2953_v57  ;;  %v2963_v5 = vld [vmem:[#allocation3 + $0xd8] ss:$36 sps:$4 sm:$0xff]  }
  0x6e   : > { %1023 = vst [vmem:[#allocation3 + $0x40] sm:$0xf] %v941_v60  ;;  %v726_v0 = vor.u32 %v725_v54, %v721_v53  ;;  %v850_v2 = vrot.slane %v823_v56, 5  ;;  %v892_v11 = vld [vmem:[#allocation2 + $0x24] sm:$0xf]  ;;  %v3489_v34 = vld [vmem:[%s3696_s1 + $0x230] sm:$0xff]  }
  0x6f   : > { %v2956_v59 = vld [vmem:[#allocation3 + $0xe0] ss:$36 sps:$4 sm:$0xff]   ;;  %v717_v6 = vrot.slane %v716_v62, 4  ;;  %v848_v7 = vsel %vm3273_vm14, %v2467_v51, %v847_v63  ;;  %v849_v10 = vrot.slane %v847_v63, 4  ;;  %900 = vst [vmem:[#allocation3 + $0x60] sm:$0xf] %v892_v11 }
  0x70   : > { %2020 = vmatmul.mubr.bf16.gmra.mxu1 %v2956_v59  ;;  %v727_v8 = vrot.slane %v726_v0, 4  ;;  %881 = vst [vmem:[#allocation3 + $0x14] sm:$0xf] %v848_v7  ;;  %v893_v12 = vld [vmem:[#allocation2 + $0x28] sm:$0xf] }
  0x71   : > { %v722_v13 = vsel %vm3290_vm15, %v717_v6, %v721_v53  ;;  %901 = vst [vmem:[#allocation3 + $0x84] sm:$0xf] %v893_v12  ;;  %v909_v14 = vld [vmem:[#allocation2 + $0x24] sm:$0xf]  ;;  %v910_v15 = vld [vmem:[#allocation2 + $0x28] sm:$0xf]  ;;  %v851_v18 = vsel %vm3273_vm14, %v849_v10, %v850_v2 }
  0x72   : > { %v2960_v4 = vld [vmem:[#allocation3 + $0xdc] ss:$36 sps:$4 sm:$0xff]   ;;  %v911_v16 = vld [vmem:[#allocation2 + $0x2c] sm:$0x1]  ;;  %v732_v17 = vsel %vm3290_vm15, %v727_v8, %v731_v1  ;;  %813 = vst [vmem:[#allocation3 + $0x10] sm:$0xf] %v722_v13 }
  0x73   : > { %1954 = vmatprep.mubr.bf16.mxu0 %v2960_v4  ;;  %v943_v19 = vshrl.u32 %v909_v14, 16  ;;  %v946_v20 = vshll.u32 %v909_v14, 16  ;;  %814 = vst [vmem:[#allocation3 + $0x34] sm:$0xf] %v732_v17  ;;  %882 = vst [vmem:[#allocation3 + $0x38] sm:$0xf] %v851_v18 }
  0x74   : > { %1955 = vmatmul.mubr.bf16.gmra.mxu0 %v2963_v5  ;;  %v952_v21 = vshll.u32 %v910_v15, 16  ;;  %v956_v23 = vshrl.u32 %v910_v15, 16  ;;  %v962_v25 = vshll.u32 %v911_v16, 16  ;;  %v700_v55 = vld [vmem:[#allocation2 + $0x18] sm:$0xf]  ;;  %v3495_v51 = vld [vmem:[%s3696_s1 + $0x228] sm:$0xff]  }
  0x75   : > { %v945_v26 = vrot.slane %v943_v19, 4  ;;  %v948_v27 = vrot.slane %v946_v20, 5  ;;  %v701_v28 = vld [vmem:[#allocation2 + $0x1c] sm:$0xf]  ;;  %v734_v30 = vshrl.u32 %v700_v55, 16  ;;  %v737_v40 = vshll.u32 %v700_v55, 16 }
  0x76   : > { %v2968_v31 = vld [vmem:[#allocation3 + $0x18] ss:$36 sps:$4 sm:$0xff]   ;;  %v954_v33 = vrot.slane %v952_v21, 5  ;;  %v958_v37 = vrot.slane %v956_v23, 4  ;;  %v964_v38 = vrot.slane %v962_v25, 5  ;;  %v743_v42 = vshll.u32 %v701_v28, 16 }
  0x77   : > { %v2970_v32 = vld [vmem:[#allocation3 + $0x1c] ss:$36 sps:$4 sm:$0xff]   ;;  %v949_v36 = vor.u32 %v948_v27, %v945_v26  ;;  %v702_v9 = vld [vmem:[#allocation2 + $0x20] sm:$0x1]  ;;  %v736_v39 = vrot.slane %v734_v30, 4  ;;  %v747_v43 = vshrl.u32 %v701_v28, 16 }
  0x78   : > { %2125 = vmatprep.mubr.bf16.mxu1 %v2970_v32  ;;  %v753_v44 = vshll.u32 %v702_v9, 16  ;;  %v824_v45 = vld [vmem:[#allocation2 + $0x18] sm:$0xe]  ;;  %v959_v47 = vor.u32 %v958_v37, %v954_v33  ;;  %v825_v48 = vld [vmem:[#allocation2 + $0x1c] sm:$0xf]  ;;  %v739_v52 = vrot.slane %v737_v40, 5  ;;  %v254_v32 = vstv %s3468_s9  ;;  %s3659_s9 = sadd.s32 %s2451_s7, %s2450_s6 }
  0x79   : > { %2126 = vmatmul.mubr.bf16.vlgmr.msra.gmra.mxu1 %v2968_v31  ;;  %v950_v46 = vrot.slane %v949_v36, 4  ;;  %v826_v49 = vld [vmem:[#allocation2 + $0x20] sm:$0x1]  ;;  %v2468_v50 = vrot.slane %v824_v45, 9  ;;  %v745_v53 = vrot.slane %v743_v42, 5  ;;  %v749_v54 = vrot.slane %v747_v43, 4 }
  0x7a   : > { %2833 = vmatpush3.bf16.msra.mxu1 %v3457_v29  ;;  %v755_v56 = vrot.slane %v753_v44, 5  ;;  %v2973_v57 = vld [vmem:[#allocation3 + $0x10] ss:$36 sps:$4 sm:$0xff]   ;;  %v960_v62 = vrot.slane %v959_v47, 4  ;;  %v740_v63 = vor.u32 %v739_v52, %v736_v39  ;;  %v854_v1 = vrot.slane %v825_v48, 5  ;;  %v3510_v14 = vld [vmem:[%s3696_s1 + $0x220] sm:$0xff]  }
  0x7b   : > { %v2975_v59 = vld [vmem:[#allocation3 + $0x14] ss:$36 sps:$4 sm:$0xff]   ;;  %2826 = vmatprep.subr.bf16.mxu1 %v3489_v34  ;;  %v955_v60 = vsel %vm3290_vm15, %v950_v46, %v954_v33  ;;  %v750_v0 = vor.u32 %v749_v54, %v745_v53  ;;  %v857_v2 = vrot.slane %v826_v49, 5  ;;  %v293_v5 = vld [vmem:[#allocation2 + $0x38] sm:$0x1]  ;;  %v425_v23 = vrot.slane %v3405_v24, 4 }
  0x7c   : > { %1024 = vst [vmem:[#allocation3 + $0x64] sm:$0xf] %v955_v60  ;;  %2060 = vmatprep.mubr.bf16.mxu0 %v2975_v59  ;;  %v965_v4 = vsel %vm3290_vm15, %v960_v62, %v964_v38  ;;  %v894_v6 = vld [vmem:[#allocation2 + $0x30] sm:$0xf]  ;;  %v895_v7 = vld [vmem:[#allocation2 + $0x34] sm:$0xf]  ;;  %v855_v11 = vsel %vm3273_vm14, %v2468_v50, %v854_v1 }
  0x7d   : > { %2061 = vmatmul.mubr.bf16.vlgmr.msra.gmra.mxu0 %v2973_v57  ;;  %1025 = vst [vmem:[#allocation3 + $0x88] sm:$0xf] %v965_v4  ;;  %v741_v8 = vrot.slane %v740_v63, 4  ;;  %v751_v10 = vrot.slane %v750_v0, 4  ;;  %v856_v12 = vrot.slane %v854_v1, 4  ;;  %v294_v15 = vsel %vm3226_vm5, 0, %v293_v5 }
  0x7e   : > { %2834 = vmatpush3.bf16.msra.mxu1 %v3489_v34  ;;  %902 = vst [vmem:[#allocation3 + $0xa8] sm:$0xf] %v894_v6  ;;  %903 = vst [vmem:[#allocation3 + $0xcc] sm:$0xf] %v895_v7  ;;  %v912_v13 = vld [vmem:[#allocation2 + $0x30] sm:$0xf]  ;;  %2802 = vmatpush3.bf16.msra.mxu0 %v3457_v29 }
  0x7f   : > { %2827 = vmatprep.subr.bf16.mxu1 %v3495_v51  ;;  %883 = vst [vmem:[#allocation3 + $0x5c] sm:$0xf] %v855_v11  ;;  %v913_v16 = vld [vmem:[#allocation2 + $0x34] sm:$0xf]  ;;  %v967_v17 = vshrl.u32 %v912_v13, 16  ;;  %v970_v18 = vshll.u32 %v912_v13, 16  ;;  %2803 = vmatprep.subr.bf16.mxu0 %v3489_v34  ;;  %v746_v29 = vsel %vm3290_vm15, %v741_v8, %v745_v53  ;;  %v756_v19 = vsel %vm3290_vm15, %v751_v10, %v755_v56 }
  0x80   : > { %v858_v20 = vsel %vm3273_vm14, %v856_v12, %v857_v2  ;;  %295 = vst [vmem:[#allocation2 + $0x38] sm:$0x1] %v294_v15  ;;  %v976_v21 = vshll.u32 %v913_v16, 16  ;;  %815 = vst [vmem:[#allocation3 + $0x58] sm:$0xf] %v746_v29  ;;  %v980_v27 = vshrl.u32 %v913_v16, 16 }
  0x81   : > { %816 = vst [vmem:[#allocation3 + $0x7c] sm:$0xf] %v756_v19  ;;  %884 = vst [vmem:[#allocation3 + $0x80] sm:$0xf] %v858_v20  ;;  %v969_v25 = vrot.slane %v967_v17, 4  ;;  %v972_v55 = vrot.slane %v970_v18, 5 }
  0x82   : > { %v703_v26 = vld [vmem:[#allocation2 + $0x24] sm:$0xf]  ;;  %2835 = vmatpush3.bf16.msra.mxu1 %v3495_v51  ;;  %v704_v28 = vld [vmem:[#allocation2 + $0x28] sm:$0xf]  ;;  %v705_v30 = vld [vmem:[#allocation2 + $0x2c] sm:$0x1]  ;;  %2804 = vmatpush3.bf16.msra.mxu0 %v3489_v34 }
  0x83   : > { %v758_v31 = vshrl.u32 %v703_v26, 16  ;;  %2828 = vmatprep.subr.bf16.mxu1 %v3510_v14  ;;  %v973_v33 = vor.u32 %v972_v55, %v969_v25  ;;  %v3527_v24 = vrot.slane %v976_v21, 5  ;;  %v3532_v36 = vld [vmem:[%s3696_s1 + $0x218] sm:$0xff]   ;;  %v761_v37 = vshll.u32 %v703_v26, 16  ;;  %v827_v9 = vld [vmem:[#allocation2 + $0x24] sm:$0xe]  ;;  %2805 = vmatprep.subr.bf16.mxu0 %v3495_v51 }
  0x84   : > { %v767_v38 = vshll.u32 %v704_v28, 16  ;;  %v771_v40 = vshrl.u32 %v704_v28, 16  ;;  %v777_v42 = vshll.u32 %v705_v30, 16  ;;  %v828_v43 = vld [vmem:[#allocation2 + $0x28] sm:$0xf]  ;;  %v2469_v34 = vrot.slane %v827_v9, 9 }
  0x85   : > { %v760_v39 = vrot.slane %v758_v31, 4  ;;  %v2977_v44 = vld [vmem:[#allocation3 + $0x64] ss:$36 sps:$4 sm:$0xff]   ;;  %v974_v46 = vrot.slane %v973_v33, 4  ;;  %v982_v47 = vrot.slane %v980_v27, 4  ;;  %v763_v48 = vrot.slane %v761_v37, 5 }
  0x86   : > { %v2979_v45 = vld [vmem:[#allocation3 + $0x60] ss:$36 sps:$4 sm:$0xff]   ;;  %2836 = vmatpush3.bf16.msra.mxu1 %v3510_v14  ;;  %v769_v49 = vrot.slane %v767_v38, 5  ;;  %v773_v50 = vrot.slane %v771_v40, 4  ;;  %2133 = vmatprep.mubr.bf16.mxu1 %v2977_v44  ;;  %v861_v56 = vrot.slane %v828_v43, 5  ;;  %v3543_v59 = vld [vmem:[%s3696_s1 + $0x210] sm:$0xff]  }
  0x87   : > { %v829_v52 = vld [vmem:[#allocation2 + $0x2c] sm:$0x1]  ;;  %2806 = vmatpush3.bf16.msra.mxu0 %v3495_v51  ;;  %v464_v53 = vld [vmem:[#allocation2 + $0x38] sm:$0x1]  ;;  %v979_v54 = vsel %vm3290_vm15, %v974_v46, %v3527_v24  ;;  %vm3548_vm0 = vcmp.eq.s32.totalorder %v254_v32, 1  ;;  %2134 = vmatmul.mubr.bf16.gmra.mxu1 %v2979_v45  ;;  %v764_v63 = vor.u32 %v763_v48, %v760_v39  ;;  %v779_v1 = vrot.slane %v777_v42, 5 }
  0x88   : > { %v864_v57 = vrot.slane %v829_v52, 5  ;;  %v2981_v51 = vld [vmem:[#allocation3 + $0x5c] ss:$36 sps:$4 sm:$0xff]   ;;  %v465_v62 = vsel %vm3216_vm3, %v425_v23, %v464_v53  ;;  %1026 = vst [vmem:[#allocation3 + $0xac] sm:$0xf] %v979_v54  ;;  %2807 = vmatprep.subr.bf16.mxu0 %v3510_v14  ;;  %v774_v0 = vor.u32 %v773_v50, %v769_v49  ;;  %2829 = vmatprep.subr.bf16.mxu1 %v3532_v36  ;;  %v863_v5 = vrot.slane %v861_v56, 4 }
  0x89   : > { %v2983_v2 = vld [vmem:[#allocation3 + $0x58] ss:$36 sps:$4 sm:$0xff]   ;;  %466 = vst [vmem:[#allocation2 + $0x38] sm:$0x1] %v465_v62  ;;  %v862_v4 = vsel %vm3273_vm14, %v2469_v34, %v861_v56  ;;  %2068 = vmatprep.mubr.bf16.mxu0 %v2981_v51  ;;  %v983_v6 = vor.u32 %v982_v47, %v3527_v24  ;;  %v765_v7 = vrot.slane %v764_v63, 4  ;;  %v3568_v16 = vld [vmem:[%s3696_s1 + $0x208] sm:$0xff]  }
  0x8a   : > { %2837 = vmatpush3.bf16.msra.mxu1 %v3532_v36  ;;  %v775_v8 = vrot.slane %v774_v0, 4  ;;  %885 = vst [vmem:[#allocation3 + $0xa4] sm:$0xf] %v862_v4  ;;  %v244_v10 = vld [vmem:[%s243_s4] sm:$0xf]  ;;  %2069 = vmatmul.mubr.bf16.gmra.mxu0 %v2983_v2  ;;  %v865_v11 = vsel %vm3273_vm14, %v863_v5, %v864_v57  ;;  %s2452_s23 = sshll.u32 %s3659_s9, 2 }
  0x8b   : > { %2830 = vmatprep.subr.bf16.mxu1 %v3543_v59  ;;  %v245_v12 = vld [vmem:[%s243_s4 + $0x4] sm:$0xf]  ;;  %v256_v13 = vsel %vm3548_vm0, 0, %v244_v10  ;;  %v276_v15 = vld [vmem:[#allocation2 + $0x3c] sm:$0x1]  ;;  %2808 = vmatpush3.bf16.msra.mxu0 %v3510_v14  ;;  %v770_v17 = vsel %vm3290_vm15, %v765_v7, %v769_v49  ;;  %v984_v55 = vrot.slane %v983_v6, 4  ;;  %s3668_s11 = scalar_lea.vmem %s3697_s2, %s2452_s23 }
  0x8c   : > { %v780_v18 = vsel %vm3290_vm15, %v775_v8, %v779_v1  ;;  %886 = vst [vmem:[#allocation3 + $0xc8] sm:$0xf] %v865_v11  ;;  %v257_v29 = vsel %vm3548_vm0, 0, %v245_v12  ;;  %v277_v19 = vsel %vm3216_vm3, 0, %v276_v15  ;;  %v296_v20 = vld [vmem:[#allocation2 + $0x44] sm:$0x1]  ;;  %2809 = vmatprep.subr.bf16.mxu0 %v3532_v36 }
  0x8d   : > { %817 = vst [vmem:[#allocation3 + $0xa0] sm:$0xf] %v770_v17  ;;  %818 = vst [vmem:[#allocation3 + $0xc4] sm:$0xf] %v780_v18  ;;  %v297_v14 = vsel %vm3226_vm5, 0, %v296_v20  ;;  %v331_v21 = vshrl.u32 %v256_v13, 16 }
  0x8e   : > { %278 = vst [vmem:[#allocation2 + $0x3c] sm:$0x1] %v277_v19  ;;  %v334_v23 = vshll.u32 %v256_v13, 16  ;;  %v339_v25 = vshrl.u32 %v257_v29, 16  ;;  %2838 = vmatpush3.bf16.msra.mxu1 %v3543_v59  ;;  %298 = vst [vmem:[#allocation2 + $0x44] sm:$0x1] %v297_v14 }
  0x8f   : > { %v342_v26 = vshll.u32 %v257_v29, 16  ;;  %v706_v27 = vld [vmem:[#allocation2 + $0x30] sm:$0xf]  ;;  %v707_v28 = vld [vmem:[#allocation2 + $0x34] sm:$0xf]  ;;  %v333_v30 = vrot.slane %v331_v21, 7  ;;  %2831 = vmatprep.subr.bf16.mxu1 %v3568_v16  ;;  %2810 = vmatpush3.bf16.msra.mxu0 %v3532_v36 }
  0x90   : > { %v341_v31 = vrot.slane %v339_v25, 7  ;;  %v782_v32 = vshrl.u32 %v706_v27, 16  ;;  %v785_v33 = vshll.u32 %v706_v27, 16  ;;  %v914_v24 = vld [vmem:[#allocation2 + $0x38] sm:$0x1]  ;;  %v791_v38 = vshll.u32 %v707_v28, 16  ;;  %2811 = vmatprep.subr.bf16.mxu0 %v3543_v59 }
  0x91   : > { %v708_v37 = vld [vmem:[#allocation2 + $0x38] sm:$0x1]  ;;  %v795_v9 = vshrl.u32 %v707_v28, 16  ;;  %v986_v39 = vshll.u32 %v914_v24, 16  ;;  %v336_v40 = vor.u32 %v334_v23, %v333_v30  ;;  %v337_v42 = vrot.slane %v333_v30, 4 }
  0x92   : > { %v344_v43 = vor.u32 %v342_v26, %v341_v31  ;;  %v830_v34 = vld [vmem:[#allocation2 + $0x30] sm:$0xe]  ;;  %v831_v44 = vld [vmem:[#allocation2 + $0x34] sm:$0xf]  ;;  %v346_v45 = vrot.slane %v341_v31, 4  ;;  %2839 = vmatpush3.bf16.msra.mxu1 %v3568_v16  ;;  %v784_v46 = vrot.slane %v782_v32, 4 }
  0x93   : > { %v787_v47 = vrot.slane %v785_v33, 5  ;;  %v793_v48 = vrot.slane %v791_v38, 5  ;;  %v832_v49 = vld [vmem:[#allocation2 + $0x38] sm:$0x1]  ;;  %v988_v50 = vrot.slane %v986_v39, 5  ;;  %v797_v52 = vrot.slane %v795_v9, 4  ;;  %2832 = vmatprep.subr.bf16.mxu1 %v3587_v41  ;;  %2812 = vmatpush3.bf16.msra.mxu0 %v3543_v59 }
  0x94   : > { %v345_v36 = vsel %vm3242_vm8, %v337_v42, %v344_v43  ;;  %v801_v53 = vshll.u32 %v708_v37, 16  ;;  %v2989_v54 = vld [vmem:[#allocation3 + $0xa4] ss:$36 sps:$4 sm:$0xff]   ;;  %v2470_v57 = vrot.slane %v830_v34, 9  ;;  %v868_v60 = vrot.slane %v831_v44, 5  ;;  %2813 = vmatprep.subr.bf16.mxu0 %v3568_v16 }
  0x95   : > { %354 = vst [vmem:[#allocation2 + $0x40] sm:$0xf] %v345_v36  ;;  %v788_v56 = vor.u32 %v787_v47, %v784_v46  ;;  %v989_v51 = vsel %vm3290_vm15, %v984_v55, %v988_v50  ;;  %v2991_v62 = vld [vmem:[#allocation3 + $0xa0] ss:$36 sps:$4 sm:$0xff]   ;;  %v351_v63 = vld [vmem:[#allocation2 + $0x3c] sm:$0xf]  ;;  %v798_v1 = vor.u32 %v797_v52, %v793_v48  ;;  %2076 = vmatprep.mubr.bf16.mxu0 %v2989_v54 }
  0x96   : > { %v355_v0 = vld [vmem:[#allocation2 + $0x44] sm:$0x1]  ;;  %1027 = vst [vmem:[#allocation3 + $0xd0] sm:$0xf] %v989_v51  ;;  %v352_v58 = vsel %vm3248_vm9, %v336_v40, %v351_v63  ;;  %v803_v4 = vrot.slane %v801_v53, 5  ;;  %2840 = vmatpush3.bf16.msra.mxu1 %v3587_v41  ;;  %2077 = vmatmul.mubr.bf16.gmra.mxu0 %v2991_v62  ;;  %v869_v7 = vsel %vm3273_vm14, %v2470_v57, %v868_v60  ;;  %v870_v8 = vrot.slane %v868_v60, 4 }
  0x97   : > { %v356_v59 = vsel %vm3216_vm3, %v346_v45, %v355_v0  ;;  %v789_v2 = vrot.slane %v788_v56, 4  ;;  %v1036_v5 = vld [vmem:[#allocation2 + $0x30] sm:$0xe]  ;;  %353 = vst [vmem:[#allocation2 + $0x3c] sm:$0xf] %v352_v58  ;;  %v799_v6 = vrot.slane %v798_v1, 4  ;;  %2814 = vmatpush3.bf16.msra.mxu0 %v3568_v16 }
  0x98   : > { %357 = vst [vmem:[#allocation2 + $0x44] sm:$0x1] %v356_v59  ;;  %v871_v10 = vrot.slane %v832_v49, 5  ;;  %v1037_v11 = vld [vmem:[#allocation2 + $0x34] sm:$0xf]  ;;  %v2473_v12 = vrot.slane %v1036_v5, 9  ;;  %2815 = vmatprep.subr.bf16.mxu0 %v3587_v41 }
  0x99   : > { %v794_v61 = vsel %vm3290_vm15, %v789_v2, %v793_v48  ;;  %887 = vst [vmem:[#allocation3 + $0xec] sm:$0xf] %v869_v7  ;;  %v1038_v35 = vld [vmem:[#allocation2 + $0x38] sm:$0x1]  ;;  %v1070_v13 = vrot.slane %v1037_v11, 5  ;;  %v804_v17 = vsel %vm3290_vm15, %v799_v6, %v803_v4 }
  0x9a   : > { %v1030_v15 = vld [vmem:[#allocation2 + $0x18] sm:$0xe]  ;;  %819 = vst [vmem:[#allocation3 + $0xe8] sm:$0xf] %v794_v61  ;;  %v872_v18 = vsel %vm3273_vm14, %v870_v8, %v871_v10  ;;  %v1073_v29 = vrot.slane %v1038_v35, 5 }
  0x9b   : > { %v1031_v19 = vld [vmem:[#allocation2 + $0x1c] sm:$0xf]  ;;  %v1032_v20 = vld [vmem:[#allocation2 + $0x20] sm:$0x1]  ;;  %v2471_v14 = vrot.slane %v1030_v15, 9  ;;  %v1071_v16 = vsel %vm3273_vm14, %v2473_v12, %v1070_v13  ;;  %v1072_v21 = vrot.slane %v1070_v13, 4  ;;  %2816 = vmatpush3.bf16.msra.mxu0 %v3587_v41 }
  0x9c   : > { %820 = vst [vmem:[#allocation3 + $0x10c] sm:$0xf] %v804_v17  ;;  %888 = vst [vmem:[#allocation3 + $0x110] sm:$0xf] %v872_v18  ;;  %v1056_v23 = vrot.slane %v1031_v19, 5  ;;  %v1059_v25 = vrot.slane %v1032_v20, 5 }
  0x9d   : > { %v897_v55 = vld [vmem:[#allocation2 + $0x40] sm:$0xf]  ;;  %1094 = vst [vmem:[#allocation3 + $0xb0] sm:$0xf] %v1071_v16  ;;  %v1074_v31 = vsel %vm3273_vm14, %v1072_v21, %v1073_v29  ;;  %v2985_v33 = vld [vmem:[#allocation3 + $0xac] ss:$36 sps:$4 sm:$0xff]  }
  0x9e   : > { %v916_v26 = vld [vmem:[#allocation2 + $0x40] sm:$0xf]  ;;  %905 = vst [vmem:[#allocation3 + $0x114] sm:$0xf] %v897_v55  ;;  %v2987_v24 = vld [vmem:[#allocation3 + $0xa8] ss:$36 sps:$4 sm:$0xff]   ;;  %v1057_v37 = vsel %vm3273_vm14, %v2471_v14, %v1056_v23  ;;  %2141 = vmatprep.mubr.bf16.mxu1 %v2985_v33 }
  0x9f   : > { %v1040_v27 = vld [vmem:[#allocation2 + $0x40] sm:$0xf]  ;;  %v1000_v28 = vshll.u32 %v916_v26, 16  ;;  %v1004_v30 = vshrl.u32 %v916_v26, 16  ;;  %1095 = vst [vmem:[#allocation3 + $0xd4] sm:$0xf] %v1074_v31  ;;  %2142 = vmatmul.mubr.bf16.gmra.mxu1 %v2987_v24 }
  0xa0   : > { %v1077_v32 = vrot.slane %v1040_v27, 5  ;;  %v1058_v38 = vrot.slane %v1056_v23, 4  ;;  %v1033_v9 = vld [vmem:[#allocation2 + $0x24] sm:$0xe]  ;;  %v896_v39 = vld [vmem:[#allocation2 + $0x3c] sm:$0xf] }
  0xa1   : > { %v915_v40 = vld [vmem:[#allocation2 + $0x3c] sm:$0xf]  ;;  %v917_v42 = vld [vmem:[#allocation2 + $0x44] sm:$0x1]  ;;  %1090 = vst [vmem:[#allocation3 + $0x20] sm:$0xf] %v1057_v37 }
  0xa2   : > { %v1034_v43 = vld [vmem:[#allocation2 + $0x28] sm:$0xf]  ;;  %904 = vst [vmem:[#allocation3 + $0xf0] sm:$0xf] %v896_v39  ;;  %v991_v34 = vshrl.u32 %v915_v40, 16  ;;  %v994_v44 = vshll.u32 %v915_v40, 16  ;;  %v1060_v36 = vsel %vm3273_vm14, %v1058_v38, %v1059_v25 }
  0xa3   : > { %v1002_v45 = vrot.slane %v1000_v28, 5  ;;  %v1006_v41 = vrot.slane %v1004_v30, 4  ;;  %v1039_v46 = vld [vmem:[#allocation2 + $0x3c] sm:$0xe]  ;;  %v1010_v47 = vshll.u32 %v917_v42, 16  ;;  %v1079_v50 = vrot.slane %v1077_v32, 4 }
  0xa4   : > { %v1041_v48 = vld [vmem:[#allocation2 + $0x44] sm:$0x1]  ;;  %v2474_v49 = vrot.slane %v1039_v46, 9  ;;  %v993_v52 = vrot.slane %v991_v34, 4  ;;  %v996_v53 = vrot.slane %v994_v44, 5  ;;  %v2472_v63 = vrot.slane %v1033_v9, 9 }
  0xa5   : > { %v1007_v54 = vor.u32 %v1006_v41, %v1002_v45  ;;  %v2997_v56 = vld [vmem:[#allocation3 + $0xec] ss:$36 sps:$4 sm:$0xff]   ;;  %v1080_v57 = vrot.slane %v1041_v48, 5  ;;  %1091 = vst [vmem:[#allocation3 + $0x44] sm:$0xf] %v1060_v36  ;;  %v1012_v60 = vrot.slane %v1010_v47, 5 }
  0xa6   : > { %v2999_v51 = vld [vmem:[#allocation3 + $0xe8] ss:$36 sps:$4 sm:$0xff]   ;;  %v1078_v62 = vsel %vm3273_vm14, %v2474_v49, %v1077_v32  ;;  %v997_v0 = vor.u32 %v996_v53, %v993_v52  ;;  %2084 = vmatprep.mubr.bf16.mxu0 %v2997_v56  ;;  %v1035_v59 = vld [vmem:[#allocation2 + $0x2c] sm:$0x1]  ;;  %v1063_v2 = vrot.slane %v1034_v43, 5 }
  0xa7   : > { %v1008_v1 = vrot.slane %v1007_v54, 4  ;;  %v1081_v58 = vsel %vm3273_vm14, %v1079_v50, %v1080_v57  ;;  %1096 = vst [vmem:[#allocation3 + $0xf8] sm:$0xf] %v1078_v62  ;;  %2085 = vmatmul.mubr.bf16.gmra.mxu0 %v2999_v51  ;;  %v1066_v4 = vrot.slane %v1035_v59, 5  ;;  %v3001_v35 = vld [vmem:[#allocation3 + $0xb0] ss:$36 sps:$4 sm:$0xff]  }
  0xa8   : > { %1097 = vst [vmem:[#allocation3 + $0x11c] sm:$0xf] %v1081_v58  ;;  %v998_v5 = vrot.slane %v997_v0, 4  ;;  %v1064_v7 = vsel %vm3273_vm14, %v2472_v63, %v1063_v2  ;;  %v1065_v8 = vrot.slane %v1063_v2, 4 }
  0xa9   : > { %v1013_v6 = vsel %vm3290_vm15, %v1008_v1, %v1012_v60  ;;  %1092 = vst [vmem:[#allocation3 + $0x68] sm:$0xf] %v1064_v7  ;;  %v2995_v13 = vld [vmem:[#allocation3 + $0xf0] ss:$36 sps:$4 sm:$0xff]  }
  0xaa   : > { %1029 = vst [vmem:[#allocation3 + $0x118] sm:$0xf] %v1013_v6  ;;  %v1003_v10 = vsel %vm3290_vm15, %v998_v5, %v1002_v45  ;;  %v1067_v11 = vsel %vm3273_vm14, %v1065_v8, %v1066_v4 }
  0xab   : > { %1028 = vst [vmem:[#allocation3 + $0xf4] sm:$0xf] %v1003_v10  ;;  %1093 = vst [vmem:[#allocation3 + $0x8c] sm:$0xf] %v1067_v11 }
  0xac   : > { %v3003_v61 = vld [vmem:[#allocation3 + $0x20] ss:$36 sps:$4 sm:$0xff]  }
  0xad   : > { %2817 = vmatprep.mubr.bf16.mxu0 %v3003_v61 }
  0xaf   : > { %v3002_v17 = vld [vmem:[#allocation3 + $0xf8] ss:$36 sps:$4 sm:$0xff]  }
  0xb2   : > { %v2993_v12 = vld [vmem:[#allocation3 + $0xf4] ss:$36 sps:$4 sm:$0xff]   ;;  %v3004_v15 = vld [vmem:[#allocation3 + $0x68] ss:$36 sps:$4 sm:$0xff]  }
  0xb3   : > { %2149 = vmatprep.mubr.bf16.mxu1 %v2993_v12  ;;  %2818 = vmatmul.mubr.bf16.vlgmr.msra.gmra.mxu0 %v3004_v15 }
  0xb4   : > { %2150 = vmatmul.mubr.bf16.gmra.mxu1 %v2995_v13 }
  0xb5   : > { %2821 = vmatprep.mubr.bf16.mxu1 %v3001_v35 }
  0xbc   : > { %2822 = vmatmul.mubr.bf16.vlgmr.msra.gmra.mxu1 %v3002_v17 }
  0xfc   : > { %v2685_v18 = vpop.f32.mrf.mxu1 }
  0xfe   : > { %v2686_v29 = vpop.f32.mrf.mxu1 }
  0xff   : > { %v2687_v10 = vadd.f32 %v2686_v29, %v2685_v18 }
 0x100   : > { %v2688_v22 = vpop.f32.mrf.mxu1 }
 0x102   : > { %v2689_v14 = vpop.f32.mrf.mxu1 }
 0x103   : > { %v2690_v61 = vadd.f32 %v2689_v14, %v2688_v22 }
 0x104   : > { %v2645_v3 = vpop.f32.mrf.mxu0 }
 0x106   : > { %v2646_v19 = vpop.f32.mrf.mxu0 }
 0x107   : > { %v2647_v11 = vadd.f32 %v2646_v19, %v2645_v3 }
 0x108   : > { %v2648_v20 = vpop.f32.mrf.mxu0 }
 0x109   : > { %v2691_v21 = vpop.f32.mrf.mxu1 }
 0x10a   : > { %v2649_v16 = vpop.f32.mrf.mxu0 }
 0x10b   : > { %v2692_v25 = vpop.f32.mrf.mxu1  ;;  %v2650_v35 = vadd.f32 %v2649_v16, %v2648_v20 }
 0x10c   : > { %v2693_v12 = vadd.f32 %v2692_v25, %v2691_v21 }
 0x10d   : > { %v2651_v23 = vpop.f32.mrf.mxu0  ;;  %v2694_v26 = vpop.f32.mrf.mxu1 }
 0x10f   : > { %v2652_v55 = vpop.f32.mrf.mxu0  ;;  %v2695_v28 = vpop.f32.mrf.mxu1 }
 0x110   : > { %v2653_v13 = vadd.f32 %v2652_v55, %v2651_v23 }
 0x111   : > { %v2654_v27 = vpop.f32.mrf.mxu0 }
 0x112   : > { %v2006_v18 = vadd.f32 %v2693_v12, %v2653_v13 }
 0x113   : > { %v2655_v30 = vpop.f32.mrf.mxu0 }
 0x120   : > { %v2697_v31 = vpop.f32.mrf.mxu1 }
 0x122   : > { %v2698_v33 = vpop.f32.mrf.mxu1 }
 0x123   : > { %v2699_v14 = vadd.f32 %v2698_v33, %v2697_v31 }
 0x124   : > { %v2657_v32 = vpop.f32.mrf.mxu0  ;;  %v3635_v37 = vpop.f32.mrf.mxu1 }
 0x125   : > { %3714 = vst [vmem:[#allocation4_spill] sm:$0xff] %v3635_v37 }
 0x126   : > { %v2658_v24 = vpop.f32.mrf.mxu0  ;;  %v3639_v9 = vpop.f32.mrf.mxu1 }
 0x127   : > { %3716 = vst [vmem:[#allocation6_spill] sm:$0xff] %v3639_v9  ;;  %v1998_v9 = vadd.f32 %v2687_v10, %v2647_v11  ;;  %v2659_v16 = vadd.f32 %v2658_v24, %v2657_v32 }
 0x128   : > { %v3637_v38 = vpop.f32.mrf.mxu0 }
 0x129   : > { %3715 = vst [vmem:[#allocation5_spill] sm:$0xff] %v3637_v38  ;;  %v2656_v38 = vadd.f32 %v2655_v30, %v2654_v27 }
 0x12a   : > { %v3641_v39 = vpop.f32.mrf.mxu0 }
 0x12b   : > { %3717 = vst [vmem:[#allocation7_spill] sm:$0xff] %v3641_v39  ;;  %v2696_v39 = vadd.f32 %v2695_v28, %v2694_v26 }
 0x12c   : > { %v3720_v31 = vld [vmem:[#allocation4_spill] sm:$0xff] }
 0x12d   : > { %v2009_v20 = vadd.f32 %v2696_v39, %v2656_v38 }
 0x12e   : > { %v3721_v32 = vld [vmem:[#allocation6_spill] sm:$0xff] }
 0x12f   : > { %v2702_v33 = vadd.f32 %v3721_v32, %v3720_v31 }
 0x130   : > { %v2703_v40 = vpop.f32.mrf.mxu1  ;;  %v3722_v24 = vld [vmem:[#allocation5_spill] sm:$0xff] }
 0x132   : > { %v2704_v34 = vpop.f32.mrf.mxu1  ;;  %v3723_v39 = vld [vmem:[#allocation7_spill] sm:$0xff] }
 0x133   : > { %v2705_v21 = vadd.f32 %v2704_v34, %v2703_v40  ;;  %v2662_v40 = vadd.f32 %v3723_v39, %v3722_v24 }
 0x134   : > { %v2663_v42 = vpop.f32.mrf.mxu0  ;;  %v2706_v45 = vpop.f32.mrf.mxu1 }
 0x136   : > { %v2664_v43 = vpop.f32.mrf.mxu0  ;;  %v2707_v46 = vpop.f32.mrf.mxu1 }
 0x137   : > { %v2665_v23 = vadd.f32 %v2664_v43, %v2663_v42  ;;  %v2708_v25 = vadd.f32 %v2707_v46, %v2706_v45 }
 0x138   : > { %v2666_v44 = vpop.f32.mrf.mxu0 }
 0x139   : > { %v2765_v49 = vpop.f32.mrf.mxu1  ;;  %v2022_v42 = vadd.f32 %v2705_v21, %v2665_v23 }
 0x13a   : > { %v2667_v41 = vpop.f32.mrf.mxu0 }
 0x13b   : > { %v2766_v36 = vpop.f32.mrf.mxu1  ;;  %v2668_v55 = vadd.f32 %v2667_v41, %v2666_v44 }
 0x13c   : > { %v2767_v26 = vadd.f32 %v2766_v36, %v2765_v49 }
 0x13d   : > { %v2725_v47 = vpop.f32.mrf.mxu0  ;;  %v2768_v53 = vpop.f32.mrf.mxu1  ;;  %v2025_v44 = vadd.f32 %v2708_v25, %v2668_v55 }
 0x13f   : > { %v2726_v48 = vpop.f32.mrf.mxu0  ;;  %v2769_v57 = vpop.f32.mrf.mxu1 }
 0x140   : > { %v2727_v29 = vadd.f32 %v2726_v48, %v2725_v47  ;;  %v2770_v48 = vadd.f32 %v2769_v57, %v2768_v53 }
 0x141   : > { %v2728_v50 = vpop.f32.mrf.mxu0 }
 0x142   : > { %v2063_v47 = vadd.f32 %v2727_v29, %v1998_v9  ;;  %v2014_v9 = vadd.f32 %v2699_v14, %v2659_v16 }
 0x143   : > { %v2729_v52 = vpop.f32.mrf.mxu0 }
 0x144   : > { %v2730_v3 = vadd.f32 %v2729_v52, %v2728_v50  ;;  %v2128_v53 = vadd.f32 %v2767_v26, %v2063_v47 }
 0x147   : > { %v2771_v51 = vpop.f32.mrf.mxu1 }
 0x149   : > { %v2772_v63 = vpop.f32.mrf.mxu1 }
 0x14a   : > { %v2731_v54 = vpop.f32.mrf.mxu0  ;;  %v2773_v27 = vadd.f32 %v2772_v63, %v2771_v51 }
 0x14b   : > { %v2774_v58 = vpop.f32.mrf.mxu1 }
 0x14c   : > { %v2732_v56 = vpop.f32.mrf.mxu0 }
 0x14d   : > { %v2775_v2 = vpop.f32.mrf.mxu1  ;;  %v2733_v37 = vadd.f32 %v2732_v56, %v2731_v54 }
 0x14e   : > { %v2734_v60 = vpop.f32.mrf.mxu0  ;;  %v2776_v30 = vadd.f32 %v2775_v2, %v2774_v58 }
 0x14f   : > { %v2071_v28 = vadd.f32 %v2733_v37, %v2006_v18 }
 0x150   : > { %v2735_v62 = vpop.f32.mrf.mxu0 }
 0x151   : > { %v2136_v45 = vadd.f32 %v2773_v27, %v2071_v28 }
 0x156   : > { %v2737_v0 = vpop.f32.mrf.mxu0 }
 0x158   : > { %v2738_v1 = vpop.f32.mrf.mxu0 }
 0x159   : > { %v2739_v43 = vadd.f32 %v2738_v1, %v2737_v0  ;;  %v2017_v1 = vadd.f32 %v2702_v33, %v2662_v40 }
 0x15a   : > { %v2740_v59 = vpop.f32.mrf.mxu0 }
 0x15c   : > { %v2741_v4 = vpop.f32.mrf.mxu0 }
 0x15d   : > { %v2742_v46 = vadd.f32 %v2741_v4, %v2740_v59 }
 0x15f   : > { %v3643_v5 = vpop.f32.mrf.mxu1  ;;  %v2082_v12 = vadd.f32 %v2742_v46, %v2017_v1 }
 0x160   : > { %3718 = vst [vmem:[#allocation8_spill] sm:$0xff] %v3643_v5  ;;  %v2736_v5 = vadd.f32 %v2735_v62, %v2734_v60 }
 0x161   : > { %v3645_v7 = vpop.f32.mrf.mxu1 }
 0x162   : > { %3719 = vst [vmem:[#allocation9_spill] sm:$0xff] %v3645_v7  ;;  %v2001_v7 = vadd.f32 %v2690_v61, %v2650_v35  ;;  %v2074_v54 = vadd.f32 %v2736_v5, %v2009_v20 }
 0x163   : > { %v3648_v15 = vpop.f32.mrf.mxu1 }
 0x164   : > { %v2066_v50 = vadd.f32 %v2730_v3, %v2001_v7  ;;  %v2139_v41 = vadd.f32 %v2776_v30, %v2074_v54  ;;  %v2079_v7 = vadd.f32 %v2739_v43, %v2014_v9 }
 0x165   : > { %v2781_v19 = vpop.f32.mrf.mxu1 }
 0x166   : > { %v2131_v51 = vadd.f32 %v2770_v48, %v2066_v50  ;;  %v2782_v35 = vadd.f32 %v2781_v19, %v3648_v15 }
 0x167   : > { %v2743_v6 = vpop.f32.mrf.mxu0  ;;  %v3724_v2 = vld [vmem:[#allocation8_spill] sm:$0xff] }
 0x168   : > { %v2147_v27 = vadd.f32 %v2782_v35, %v2082_v12 }
 0x169   : > { %v2744_v8 = vpop.f32.mrf.mxu0  ;;  %v3725_v5 = vld [vmem:[#allocation9_spill] sm:$0xff] }
 0x16a   : > { %v2745_v56 = vadd.f32 %v2744_v8, %v2743_v6  ;;  %v2779_v6 = vadd.f32 %v3725_v5, %v3724_v2 }
 0x16b   : > { %v2746_v17 = vpop.f32.mrf.mxu0 }
 0x16c   : > { %v2087_v36 = vadd.f32 %v2745_v56, %v2022_v42 }
 0x16d   : > { %v2747_v22 = vpop.f32.mrf.mxu0 }
 0x16e   : > { %v2748_v38 = vadd.f32 %v2747_v22, %v2746_v17  ;;  %v2144_v22 = vadd.f32 %v2779_v6, %v2079_v7 }
 0x170   : > { %v2090_v63 = vadd.f32 %v2748_v38, %v2025_v44 }
 0x173   : > { %v2819_v60 = vpop.f32.mrf.mxu0 }
 0x174   : > { %v2783_v52 = vpop.f32.mrf.mxu1  ;;  %v2201_v58 = vadd.f32 %v2819_v60, %v2136_v45 }
 0x175   : > { %v2192_v34 = vpop.f32.mrf.mxu0 }
 0x176   : > { %v2784_v37 = vpop.f32.mrf.mxu1  ;;  %v2193_v10 = vadd.f32 %v2192_v34, %v2128_v53  ;;  %v2279_v21 = vmul.f32 %v2201_v58, %v2201_v58 }
 0x177   : > { %v2820_v57 = vpop.f32.mrf.mxu0  ;;  %v2785_v62 = vadd.f32 %v2784_v37, %v2783_v52 }
 0x178   : > { %v2786_v49 = vpop.f32.mrf.mxu1  ;;  %v2204_v0 = vadd.f32 %v2820_v57, %v2139_v41  ;;  %v2277_v14 = vmul.f32 %v2193_v10, %v2193_v10 }
 0x179   : > { %v2195_v11 = vpop.f32.mrf.mxu0  ;;  %v2152_v17 = vadd.f32 %v2785_v62, %v2087_v36 }
 0x17a   : > { %v2787_v8 = vpop.f32.mrf.mxu1  ;;  %v2614_v59 = vpack.c.bf16 %v2204_v0, %v2201_v58  ;;  %v2196_v4 = vadd.f32 %v2195_v11, %v2131_v51  ;;  %v2280_v54 = vmul.f32 %v2204_v0, %v2204_v0 }
 0x17b   : > { %v2788_v61 = vadd.f32 %v2787_v8, %v2786_v49 }
 0x17c   : > { %v2823_v13 = vpop.f32.mrf.mxu1  ;;  %2626 = vst [vmem:[%s3668_s11 + $0x8] sm:$0xff] %v2614_v59   ;;  %v2609_v29 = vpack.c.bf16 %v2196_v4, %v2193_v10  ;;  %v2263_v3 = vadd.f32 %v2196_v4, %v2193_v10  ;;  %v2278_v16 = vmul.f32 %v2196_v4, %v2196_v4 }
 0x17d   : > { %v2155_v18 = vadd.f32 %v2788_v61, %v2090_v63  ;;  %v2217_v55 = vadd.f32 %v2823_v13, %v2152_v17 }
 0x17e   : > { %v2208_v20 = vpop.f32.mrf.mxu1  ;;  %2610 = vst [vmem:[%s3668_s11] sm:$0xff] %v2609_v29   ;;  %v2264_v15 = vadd.f32 %v2263_v3, %v2201_v58  ;;  %v2285_v25 = vadd.f32 %v2278_v16, %v2277_v14 }
 0x17f   : > { %v2209_v19 = vadd.f32 %v2208_v20, %v2144_v22  ;;  %v2283_v39 = vmul.f32 %v2217_v55, %v2217_v55 }
 0x180   : > { %v2824_v23 = vpop.f32.mrf.mxu1  ;;  %v2265_v28 = vadd.f32 %v2264_v15, %v2204_v0  ;;  %v2286_v47 = vadd.f32 %v2285_v25, %v2279_v21 }
 0x181   : > { %v2220_v26 = vadd.f32 %v2824_v23, %v2155_v18  ;;  %v2281_v56 = vmul.f32 %v2209_v19, %v2209_v19 }
 0x182   : > { %v2211_v30 = vpop.f32.mrf.mxu1  ;;  %v2266_v52 = vadd.f32 %v2265_v28, %v2209_v19  ;;  %v2287_v60 = vadd.f32 %v2286_v47, %v2280_v54 }
 0x183   : > { %v2624_v48 = vpack.c.bf16 %v2220_v26, %v2217_v55  ;;  %v2212_v50 = vadd.f32 %v2211_v30, %v2147_v27  ;;  %v2284_v43 = vmul.f32 %v2220_v26, %v2220_v26 }
 0x184   : > { %v2288_v33 = vadd.f32 %v2287_v60, %v2281_v56 }
 0x185   : > { %2628 = vst [vmem:[%s3668_s11 + $0x18] sm:$0xff] %v2624_v48   ;;  %v2619_v38 = vpack.c.bf16 %v2212_v50, %v2209_v19  ;;  %v2267_v31 = vadd.f32 %v2266_v52, %v2212_v50  ;;  %v2282_v32 = vmul.f32 %v2212_v50, %v2212_v50 }
 0x187   : > { %2627 = vst [vmem:[%s3668_s11 + $0x10] sm:$0xff] %v2619_v38   ;;  %v2268_v24 = vadd.f32 %v2267_v31, %v2217_v55  ;;  %v2289_v40 = vadd.f32 %v2288_v33, %v2282_v32 }
 0x189   : > { %v2269_v42 = vadd.f32 %v2268_v24, %v2220_v26  ;;  %v2290_v37 = vadd.f32 %v2289_v40, %v2283_v39 }
 0x18b   : > { %v2270_v34 = vrot.slane %v2269_v42, 4  ;;  %v2291_v9 = vadd.f32 %v2290_v37, %v2284_v43 }
 0x18d   : > { %v2271_v44 = vadd.f32 %v2270_v34, %v2269_v42  ;;  %v2292_v45 = vrot.slane %v2291_v9, 4 }
 0x18f   : > { %v2272_v41 = vrot.slane %v2271_v44, 2  ;;  %v2293_v46 = vadd.f32 %v2292_v45, %v2291_v9 }
 0x191   : > { %v2273_v49 = vadd.f32 %v2272_v41, %v2271_v44  ;;  %v2294_v36 = vrot.slane %v2293_v46, 2 }
 0x193   : > { %v2274_v53 = vrot.slane %v2273_v49, 1  ;;  %v2295_v57 = vadd.f32 %v2294_v36, %v2293_v46 }
 0x195   : > { %v2275_v51 = vadd.f32 %v2274_v53, %v2273_v49  ;;  %v2296_v62 = vrot.slane %v2295_v57, 1 }
 0x197   : > { %2276 = vst [vmem:[%s216_s28] sm:$0x1] %v2275_v51  ;;  %v2297_v63 = vadd.f32 %v2296_v62, %v2295_v57 }
 0x199   : > { %2298 = vst [vmem:[%s216_s28 + $0x1] sm:$0x1] %v2297_v63 }
 0x19a PF: > { %s14_s16 = sadd.s32 1, %s3043_s16   ;;  %s3726_s12 = smov %s3035_s14 }
 0x19b   : > { %p11_p12 = scmp.ge.s32.totalorder %s14_s16, 10   ;;  %s3727_s13 = smov %s3039_s15 }
 0x19c   : > { %s3728_s14 = smov %s3731_s17  ;;  %s3729_s15 = smov %s3735_s18 }
 0x19d   :  { %13 = sbr.rel (!%p11_p12) target bundleno = 3 (0x3), region = 76 }

</bundles_post_ra>
